<compile_context>
chip_gen: v7x
topology: tpu7x:2x2x1
jax: 0.10.0
libtpu: 0.0.40
codegen_flags: <defaults>
</compile_context>

<pallas_src>
import jax
import jax.numpy as jnp
from jax import lax
from jax.experimental import pallas as pl
from jax.experimental.pallas import tpu as pltpu

NUM_CLASSES = 5       # MLPPredictor(ndim_out, 5)
CLASS_PAD = 128       # lane-dense predictor output
TILE_N = 128          # node tile (output rows)
TILE_E = 512          # edge tile (reduction axis, also predictor row tile)


def _round_up(x, m):
    return ((x + m - 1) // m) * m


# ---------------- Pallas kernels ----------------

def sage_layer_kernel(dst_ref, invdeg_ref, valid_ref, he_ref, h_node_ref,
                      wm_ref, bm_ref, wa_h_ref, wa_n_ref, ba_ref,
                      out_ref, acc_ref):
    i = pl.program_id(0)           # node-tile index (parallel)
    k = pl.program_id(1)           # edge-tile index (reduction)
    tm = acc_ref.shape[0]

    @pl.when(k == 0)
    def _():
        acc_ref[...] = jnp.zeros_like(acc_ref)

    # Pure 0/1 mask built from a compare only; cast happens at the MXU operand
    # boundary.  A[r, c] = (dst[c] == i*tm + r).  Padded edges carry dst = -1
    # so they never match any row.
    row_ids = i * tm + lax.broadcasted_iota(jnp.int32, (tm, 1), 0)
    mask = (row_ids == dst_ref[...]).astype(jnp.bfloat16)          # (tm, tk)

    # Accumulate raw concatenated [h_src | e] features (sum over in-edges).
    acc_ref[...] += jnp.dot(mask, he_ref[...],
                            preferred_element_type=jnp.float32)

    @pl.when(k == pl.num_programs(1) - 1)
    def _():
        inv = invdeg_ref[...]                                        # (tm, 1) f32
        has_in = (inv > 0.0).astype(jnp.float32)
        # mean of raw feats (f32), then one fused W_msg matmul per node tile.
        agg = acc_ref[...] * inv                                     # (tm, din+de)
        h_neigh = (jnp.dot(agg.astype(jnp.bfloat16), wm_ref[...],
                           preferred_element_type=jnp.float32)
                   + has_in * bm_ref[...])                           # 0 if deg==0 (DGL fn.mean)
        out = (jnp.dot(h_node_ref[...], wa_h_ref[...],
                       preferred_element_type=jnp.float32)
               + jnp.dot(h_neigh.astype(jnp.bfloat16), wa_n_ref[...],
                         preferred_element_type=jnp.float32)
               + ba_ref[...])
        out = jnp.maximum(out, 0.0) * valid_ref[...]                 # zero padded node rows
        out_ref[...] = out.astype(out_ref.dtype)


def predictor_kernel(h_uv_ref, wp_ref, bp_ref, out_ref):
    # score per edge: [h_u | h_v] @ W + b   (single fused matmul, K = 2*do)
    out = (jnp.dot(h_uv_ref[...], wp_ref[...],
                   preferred_element_type=jnp.float32)
           + bp_ref[...])
    out_ref[...] = out.astype(out_ref.dtype)


# ---------------- wrappers ----------------

def sage_layer(dst_agg, inv_deg, node_valid, he, h_node, lp, *, tm=TILE_N, tk=TILE_E):
    n_pad, din = h_node.shape
    e_pad, dhe = he.shape
    do = lp["wa_n"].shape[1]
    grid = (n_pad // tm, e_pad // tk)
    return pl.pallas_call(
        sage_layer_kernel,
        out_shape=jax.ShapeDtypeStruct((n_pad, do), jnp.bfloat16),
        grid_spec=pltpu.PrefetchScalarGridSpec(
            num_scalar_prefetch=0,
            grid=grid,
            in_specs=[
                pl.BlockSpec((1, tk), lambda i, k: (0, k)),        # dst ids (-1 on pad)
                pl.BlockSpec((tm, 1), lambda i, k: (i, 0)),        # 1/deg per node (f32)
                pl.BlockSpec((tm, 1), lambda i, k: (i, 0)),        # node-valid mask
                pl.BlockSpec((tk, dhe), lambda i, k: (k, 0)),      # [h_src | e] per edge
                pl.BlockSpec((tm, din), lambda i, k: (i, 0)),      # node feats (self)
                pl.BlockSpec((dhe, do), lambda i, k: (0, 0)),      # fused W_msg
                pl.BlockSpec((1, do), lambda i, k: (0, 0)),        # b_msg
                pl.BlockSpec((din, do), lambda i, k: (0, 0)),      # W_apply (self part)
                pl.BlockSpec((do, do), lambda i, k: (0, 0)),       # W_apply (neigh part)
                pl.BlockSpec((1, do), lambda i, k: (0, 0)),        # b_apply
            ],
            out_specs=pl.BlockSpec((tm, do), lambda i, k: (i, 0)),
            scratch_shapes=[pltpu.VMEM((tm, dhe), jnp.float32)],
        ),
        compiler_params=pltpu.CompilerParams(
            dimension_semantics=("parallel", "arbitrary"),
            vmem_limit_bytes=32 * 1024 * 1024,
        ),
    )(dst_agg, inv_deg, node_valid, he, h_node,
      lp["wm"], lp["bm"], lp["wa_h"], lp["wa_n"], lp["ba"])


def predictor(h_uv, pp, *, te=TILE_E):
    e_pad, k_in = h_uv.shape
    cp = pp["wp"].shape[1]
    grid = (e_pad // te,)
    return pl.pallas_call(
        predictor_kernel,
        out_shape=jax.ShapeDtypeStruct((e_pad, cp), jnp.bfloat16),
        grid_spec=pltpu.PrefetchScalarGridSpec(
            num_scalar_prefetch=0,
            grid=grid,
            in_specs=[
                pl.BlockSpec((te, k_in), lambda i: (i, 0)),        # [h_u | h_v]
                pl.BlockSpec((k_in, cp), lambda i: (0, 0)),        # fused predictor W
                pl.BlockSpec((1, cp), lambda i: (0, 0)),           # bias
            ],
            out_specs=pl.BlockSpec((te, cp), lambda i: (i, 0)),
        ),
        compiler_params=pltpu.CompilerParams(
            dimension_semantics=("parallel",),
            vmem_limit_bytes=32 * 1024 * 1024,
        ),
    )(h_uv, pp["wp"], pp["bp"])


# ---------------- graph structure (computed once, outside the jit) ----------------

def prepare_graph(src, dst, num_nodes, *, tile_n=TILE_N, tile_e=TILE_E):
    num_edges = int(src.shape[0])
    n_pad = _round_up(max(num_nodes, 1), tile_n)
    e_pad = _round_up(max(num_edges, 1), tile_e)

    src = jnp.asarray(src, jnp.int32)
    dst = jnp.asarray(dst, jnp.int32)

    deg = jnp.zeros((num_nodes,), jnp.float32).at[dst].add(1.0)
    inv = jnp.where(deg > 0.0, 1.0 / jnp.maximum(deg, 1.0), 0.0)
    inv_deg = jnp.zeros((n_pad, 1), jnp.float32).at[:num_nodes, 0].set(inv)
    node_valid = jnp.zeros((n_pad, 1), jnp.float32).at[:num_nodes, 0].set(1.0)

    src_pad = jnp.zeros((e_pad,), jnp.int32).at[:num_edges].set(src)
    dst_pad = jnp.zeros((e_pad,), jnp.int32).at[:num_edges].set(dst)
    # sentinel -1 for padded edges: never matches a node row -> contributes 0
    dst_agg = jnp.full((1, e_pad), -1, jnp.int32).at[0, :num_edges].set(dst)

    return dict(src=src_pad, dst=dst_pad, dst_agg=dst_agg,
                inv_deg=inv_deg, node_valid=node_valid)


# ---------------- forward ----------------

def model_forward(params, graph, nfeats, efeats):
    src_pad = graph["src"]            # (E_pad,)
    dst_pad = graph["dst"]            # (E_pad,)
    dst_agg = graph["dst_agg"]        # (1, E_pad)
    inv_deg = graph["inv_deg"]        # (N_pad, 1)
    node_valid = graph["node_valid"]  # (N_pad, 1)
    n_pad = inv_deg.shape[0]
    e_pad = src_pad.shape[0]
    n = nfeats.shape[0]
    num_edges = efeats.shape[0]

    h0 = nfeats[:, 0, :].astype(jnp.bfloat16)   # squeeze size-1 axis (== .sum(1))
    e0 = efeats[:, 0, :].astype(jnp.bfloat16)
    h = jnp.zeros((n_pad, h0.shape[1]), jnp.bfloat16).at[:n].set(h0)
    e = jnp.zeros((e_pad, e0.shape[1]), jnp.bfloat16).at[:num_edges].set(e0)

    for lp in params["layers"]:
        # TODO(synk): move this gather+concat into the kernel (row-DMA gather on
        #             scalar-prefetched src ids) to kill the (E, D) HBM round-trip.
        he = jnp.concatenate([h[src_pad], e], axis=-1)        # (E_pad, din+de)
        h = sage_layer(dst_agg, inv_deg, node_valid, he, h, lp)

    h_uv = jnp.concatenate([h[src_pad], h[dst_pad]], axis=-1)  # (E_pad, 2*do)
    scores = predictor(h_uv, params["pred"])                   # (E_pad, CLASS_PAD) bf16
    return scores[:num_edges, :NUM_CLASSES].astype(jnp.float32)


# ---------------- deterministic parameter init ----------------

def _linear_params(key, fan_in, fan_out):
    kw, kb = jax.random.split(key)
    w = jax.random.normal(kw, (fan_in, fan_out), jnp.float32) * 0.1   # (in, out) == W.T
    b = jax.random.normal(kb, (1, fan_out), jnp.float32) * 0.1
    return w, b


def make_params(ndim_in, edim, ndim_out, hidden=128, num_classes=NUM_CLASSES,
                class_pad=CLASS_PAD, seed=0):
    keys = jax.random.split(jax.random.PRNGKey(seed), 5)
    layers = []
    din = ndim_in
    for i, dout in enumerate([hidden, ndim_out]):
        wm, bm = _linear_params(keys[2 * i], din + edim, dout)       # W_msg (fused)
        wa, ba = _linear_params(keys[2 * i + 1], din + dout, dout)   # W_apply
        layers.append(dict(
            wm=wm.astype(jnp.bfloat16),
            bm=bm,
            wa_h=wa[:din, :].astype(jnp.bfloat16),
            wa_n=wa[din:, :].astype(jnp.bfloat16),
            ba=ba,
        ))
        din = dout
    wp, bp = _linear_params(keys[4], 2 * ndim_out, num_classes)      # predictor W
    wp_pad = jnp.zeros((2 * ndim_out, class_pad), jnp.float32).at[:, :num_classes].set(wp)
    bp_pad = jnp.zeros((1, class_pad), jnp.float32).at[:, :num_classes].set(bp)
    pred = dict(wp=wp_pad.astype(jnp.bfloat16), bp=bp_pad)
    return dict(layers=layers, pred=pred)


# ---------------- main ----------------

if __name__ == "__main__":
    N, E = 8, 16
    ndim_in, edim, ndim_out = 16, 8, 32

    key = jax.random.PRNGKey(0)
    k1, k2, k3, k4 = jax.random.split(key, 4)
    nfeats = jax.random.normal(k1, (N, 1, ndim_in), jnp.float32)
    efeats = jax.random.normal(k2, (E, 1, edim), jnp.float32)
    src = jax.random.randint(k3, (E,), 0, N)
    dst = jax.random.randint(k4, (E,), 0, N)

    params = make_params(ndim_in, edim, ndim_out)
    graph = prepare_graph(src, dst, N)     # graph glue hoisted out of the jitted forward

    fwd = jax.jit(model_forward)
    scores = fwd(params, graph, nfeats, efeats)
    jax.block_until_ready(scores)
    assert scores.shape == (E, NUM_CLASSES) and scores.dtype == jnp.float32
    print("KERNEL_OK")
</pallas_src>

<mosaic_0001>
module attributes {stable_mosaic.version = 11 : i64} {
  func.func @sage_layer_kernel(%arg0: i32, %arg1: i32, %arg2: memref<1x512xi32, #tpu.memory_space<vmem>>, %arg3: memref<128x1xf32, #tpu.memory_space<vmem>>, %arg4: memref<128x1xf32, #tpu.memory_space<vmem>>, %arg5: memref<512x24xbf16, #tpu.memory_space<vmem>>, %arg6: memref<128x16xbf16, #tpu.memory_space<vmem>>, %arg7: memref<24x128xbf16, #tpu.memory_space<vmem>>, %arg8: memref<1x128xf32, #tpu.memory_space<vmem>>, %arg9: memref<16x128xbf16, #tpu.memory_space<vmem>>, %arg10: memref<128x128xbf16, #tpu.memory_space<vmem>>, %arg11: memref<1x128xf32, #tpu.memory_space<vmem>>, %arg12: memref<128x128xbf16, #tpu.memory_space<vmem>>, %arg13: memref<128x24xf32, #tpu.memory_space<vmem>>) attributes {dimension_semantics = [#tpu.dimension_semantics<parallel>, #tpu.dimension_semantics<arbitrary>], iteration_bounds = array<i64: 1, 1>, scalar_prefetch = 0 : i64, scratch_operands = 1 : i64, tpu.core_type = #tpu.core_type<tc>, window_params = [{transform_indices = @transform_0, window_bounds = array<i64: 1, 512>}, {transform_indices = @transform_1, window_bounds = array<i64: 128, 1>}, {transform_indices = @transform_2, window_bounds = array<i64: 128, 1>}, {transform_indices = @transform_3, window_bounds = array<i64: 512, 24>}, {transform_indices = @transform_4, window_bounds = array<i64: 128, 16>}, {pipeline_mode = #tpu.pipeline_mode<synchronous>, transform_indices = @transform_5, window_bounds = array<i64: 24, 128>}, {pipeline_mode = #tpu.pipeline_mode<synchronous>, transform_indices = @transform_6, window_bounds = array<i64: 1, 128>}, {pipeline_mode = #tpu.pipeline_mode<synchronous>, transform_indices = @transform_7, window_bounds = array<i64: 16, 128>}, {pipeline_mode = #tpu.pipeline_mode<synchronous>, transform_indices = @transform_8, window_bounds = array<i64: 128, 128>}, {pipeline_mode = #tpu.pipeline_mode<synchronous>, transform_indices = @transform_9, window_bounds = array<i64: 1, 128>}, {transform_indices = @transform_10, window_bounds = array<i64: 128, 128>}]} {
    %c0_i32 = arith.constant 0 : i32
    %0 = arith.cmpi eq, %arg1, %c0_i32 : i32
    %1 = arith.extui %0 : i1 to i32
    %c0_i32_0 = arith.constant 0 : i32
    %2 = arith.cmpi ne, %1, %c0_i32_0 : i32
    scf.if %2 {
      %cst_10 = arith.constant 0.000000e+00 : f32
      %22 = vector.broadcast %cst_10 : f32 to vector<128x24xf32>
      %c0_11 = arith.constant 0 : index
      %c0_12 = arith.constant 0 : index
      %23 = vector.load %arg13[%c0_11, %c0_12] : memref<128x24xf32, #tpu.memory_space<vmem>>, vector<128x24xf32>
      tpu.vector_store %arg13[%c0_11, %c0_12], %22 {strides = array<i32>} : memref<128x24xf32, #tpu.memory_space<vmem>>, vector<128x24xf32>,
    } else {
    }
    %c128_i32 = arith.constant 128 : i32
    %3 = arith.muli %arg0, %c128_i32 : i32
    %4 = tpu.iota {dimensions = array<i32: 0>} : vector<128x1xi32>
    %5 = vector.broadcast %3 : i32 to vector<128x1xi32>
    %6 = arith.addi %5, %4 : vector<128x1xi32>
    %c0 = arith.constant 0 : index
    %c0_1 = arith.constant 0 : index
    %7 = vector.load %arg2[%c0, %c0_1] : memref<1x512xi32, #tpu.memory_space<vmem>>, vector<1x512xi32>
    %8 = vector.broadcast %6 : vector<128x1xi32> to vector<128x512xi32>
    %9 = vector.broadcast %7 : vector<1x512xi32> to vector<128x512xi32>
    %10 = arith.cmpi eq, %8, %9 : vector<128x512xi32>
    %11 = arith.extui %10 : vector<128x512xi1> to vector<128x512xi32>
    %12 = arith.sitofp %11 : vector<128x512xi32> to vector<128x512xf32>
    %13 = arith.truncf %12 : vector<128x512xf32> to vector<128x512xbf16>
    %c0_2 = arith.constant 0 : index
    %c0_3 = arith.constant 0 : index
    %14 = vector.load %arg13[%c0_2, %c0_3] : memref<128x24xf32, #tpu.memory_space<vmem>>, vector<128x24xf32>
    %c0_4 = arith.constant 0 : index
    %c0_5 = arith.constant 0 : index
    %15 = vector.load %arg5[%c0_4, %c0_5] : memref<512x24xbf16, #tpu.memory_space<vmem>>, vector<512x24xbf16>
    %cst = arith.constant dense<0.000000e+00> : vector<128x24xf32>
    %16 = tpu.matmul %13, %15, %cst {dimension_numbers = #tpu.dot_dimension_numbers<[1], [0], [0], [1], [0, 0, 1, 1], [], []>} : vector<128x512xbf16>, vector<512x24xbf16>, vector<128x24xf32> -> vector<128x24xf32>
    %17 = arith.addf %14, %16 : vector<128x24xf32>
    %c0_6 = arith.constant 0 : index
    %c0_7 = arith.constant 0 : index
    %18 = vector.load %arg13[%c0_6, %c0_7] : memref<128x24xf32, #tpu.memory_space<vmem>>, vector<128x24xf32>
    tpu.vector_store %arg13[%c0_6, %c0_7], %17 {strides = array<i32>} : memref<128x24xf32, #tpu.memory_space<vmem>>, vector<128x24xf32>,
    %c0_i32_8 = arith.constant 0 : i32
    %19 = arith.cmpi eq, %arg1, %c0_i32_8 : i32
    %20 = arith.extui %19 : i1 to i32
    %c0_i32_9 = arith.constant 0 : i32
    %21 = arith.cmpi ne, %20, %c0_i32_9 : i32
    scf.if %21 {
      %c0_10 = arith.constant 0 : index
      %c0_11 = arith.constant 0 : index
      %22 = vector.load %arg3[%c0_10, %c0_11] : memref<128x1xf32, #tpu.memory_space<vmem>>, vector<128x1xf32>
      %cst_12 = arith.constant 0.000000e+00 : f32
      %23 = vector.broadcast %cst_12 : f32 to vector<128x1xf32>
      %24 = arith.cmpf ogt, %22, %23 : vector<128x1xf32>
      %25 = arith.extui %24 : vector<128x1xi1> to vector<128x1xi32>
      %26 = arith.sitofp %25 : vector<128x1xi32> to vector<128x1xf32>
      %c0_13 = arith.constant 0 : index
      %c0_14 = arith.constant 0 : index
      %27 = vector.load %arg13[%c0_13, %c0_14] : memref<128x24xf32, #tpu.memory_space<vmem>>, vector<128x24xf32>
      %28 = vector.broadcast %22 : vector<128x1xf32> to vector<128x24xf32>
      %29 = arith.mulf %27, %28 : vector<128x24xf32>
      %30 = arith.truncf %29 : vector<128x24xf32> to vector<128x24xbf16>
      %c0_15 = arith.constant 0 : index
      %c0_16 = arith.constant 0 : index
      %31 = vector.load %arg7[%c0_15, %c0_16] : memref<24x128xbf16, #tpu.memory_space<vmem>>, vector<24x128xbf16>
      %cst_17 = arith.constant dense<0.000000e+00> : vector<128x128xf32>
      %32 = tpu.matmul %30, %31, %cst_17 {dimension_numbers = #tpu.dot_dimension_numbers<[1], [0], [0], [1], [0, 0, 1, 1], [], []>} : vector<128x24xbf16>, vector<24x128xbf16>, vector<128x128xf32> -> vector<128x128xf32>
      %c0_18 = arith.constant 0 : index
      %c0_19 = arith.constant 0 : index
      %33 = vector.load %arg8[%c0_18, %c0_19] : memref<1x128xf32, #tpu.memory_space<vmem>>, vector<1x128xf32>
      %34 = vector.broadcast %26 : vector<128x1xf32> to vector<128x128xf32>
      %35 = vector.broadcast %33 : vector<1x128xf32> to vector<128x128xf32>
      %36 = arith.mulf %34, %35 : vector<128x128xf32>
      %37 = arith.addf %32, %36 : vector<128x128xf32>
      %c0_20 = arith.constant 0 : index
      %c0_21 = arith.constant 0 : index
      %38 = vector.load %arg6[%c0_20, %c0_21] : memref<128x16xbf16, #tpu.memory_space<vmem>>, vector<128x16xbf16>
      %c0_22 = arith.constant 0 : index
      %c0_23 = arith.constant 0 : index
      %39 = vector.load %arg9[%c0_22, %c0_23] : memref<16x128xbf16, #tpu.memory_space<vmem>>, vector<16x128xbf16>
      %cst_24 = arith.constant dense<0.000000e+00> : vector<128x128xf32>
      %40 = tpu.matmul %38, %39, %cst_24 {dimension_numbers = #tpu.dot_dimension_numbers<[1], [0], [0], [1], [0, 0, 1, 1], [], []>} : vector<128x16xbf16>, vector<16x128xbf16>, vector<128x128xf32> -> vector<128x128xf32>
      %41 = arith.truncf %37 : vector<128x128xf32> to vector<128x128xbf16>
      %c0_25 = arith.constant 0 : index
      %c0_26 = arith.constant 0 : index
      %42 = vector.load %arg10[%c0_25, %c0_26] : memref<128x128xbf16, #tpu.memory_space<vmem>>, vector<128x128xbf16>
      %cst_27 = arith.constant dense<0.000000e+00> : vector<128x128xf32>
      %43 = tpu.matmul %41, %42, %cst_27 {dimension_numbers = #tpu.dot_dimension_numbers<[1], [0], [0], [1], [0, 0, 1, 1], [], []>} : vector<128x128xbf16>, vector<128x128xbf16>, vector<128x128xf32> -> vector<128x128xf32>
      %44 = arith.addf %40, %43 : vector<128x128xf32>
      %c0_28 = arith.constant 0 : index
      %c0_29 = arith.constant 0 : index
      %45 = vector.load %arg11[%c0_28, %c0_29] : memref<1x128xf32, #tpu.memory_space<vmem>>, vector<1x128xf32>
      %46 = vector.broadcast %45 : vector<1x128xf32> to vector<128x128xf32>
      %47 = arith.addf %44, %46 : vector<128x128xf32>
      %cst_30 = arith.constant 0.000000e+00 : f32
      %48 = vector.broadcast %cst_30 : f32 to vector<128x128xf32>
      %49 = arith.maximumf %47, %48 : vector<128x128xf32>
      %c0_31 = arith.constant 0 : index
      %c0_32 = arith.constant 0 : index
      %50 = vector.load %arg4[%c0_31, %c0_32] : memref<128x1xf32, #tpu.memory_space<vmem>>, vector<128x1xf32>
      %51 = vector.broadcast %50 : vector<128x1xf32> to vector<128x128xf32>
      %52 = arith.mulf %49, %51 : vector<128x128xf32>
      %53 = arith.truncf %52 : vector<128x128xf32> to vector<128x128xbf16>
      %c0_33 = arith.constant 0 : index
      %c0_34 = arith.constant 0 : index
      %54 = vector.load %arg12[%c0_33, %c0_34] : memref<128x128xbf16, #tpu.memory_space<vmem>>, vector<128x128xbf16>
      tpu.vector_store %arg12[%c0_33, %c0_34], %53 {strides = array<i32>} : memref<128x128xbf16, #tpu.memory_space<vmem>>, vector<128x128xbf16>,
    } else {
    }
    return
  }
  func.func @transform_0(%arg0: i32, %arg1: i32) -> (i32, i32) {
    %c0_i32 = arith.constant 0 : i32
    %c0_i32_0 = arith.constant 0 : i32
    return %c0_i32, %arg1 : i32, i32
  }
  func.func @transform_1(%arg0: i32, %arg1: i32) -> (i32, i32) {
    %c0_i32 = arith.constant 0 : i32
    %c0_i32_0 = arith.constant 0 : i32
    return %arg0, %c0_i32 : i32, i32
  }
  func.func @transform_2(%arg0: i32, %arg1: i32) -> (i32, i32) {
    %c0_i32 = arith.constant 0 : i32
    %c0_i32_0 = arith.constant 0 : i32
    return %arg0, %c0_i32 : i32, i32
  }
  func.func @transform_3(%arg0: i32, %arg1: i32) -> (i32, i32) {
    %c0_i32 = arith.constant 0 : i32
    %c0_i32_0 = arith.constant 0 : i32
    return %arg1, %c0_i32 : i32, i32
  }
  func.func @transform_4(%arg0: i32, %arg1: i32) -> (i32, i32) {
    %c0_i32 = arith.constant 0 : i32
    %c0_i32_0 = arith.constant 0 : i32
    return %arg0, %c0_i32 : i32, i32
  }
  func.func @transform_5(%arg0: i32, %arg1: i32) -> (i32, i32) {
    %c0_i32 = arith.constant 0 : i32
    %c0_i32_0 = arith.constant 0 : i32
    %c0_i32_1 = arith.constant 0 : i32
    return %c0_i32, %c0_i32_0 : i32, i32
  }
  func.func @transform_6(%arg0: i32, %arg1: i32) -> (i32, i32) {
    %c0_i32 = arith.constant 0 : i32
    %c0_i32_0 = arith.constant 0 : i32
    %c0_i32_1 = arith.constant 0 : i32
    return %c0_i32, %c0_i32_0 : i32, i32
  }
  func.func @transform_7(%arg0: i32, %arg1: i32) -> (i32, i32) {
    %c0_i32 = arith.constant 0 : i32
    %c0_i32_0 = arith.constant 0 : i32
    %c0_i32_1 = arith.constant 0 : i32
    return %c0_i32, %c0_i32_0 : i32, i32
  }
  func.func @transform_8(%arg0: i32, %arg1: i32) -> (i32, i32) {
    %c0_i32 = arith.constant 0 : i32
    %c0_i32_0 = arith.constant 0 : i32
    %c0_i32_1 = arith.constant 0 : i32
    return %c0_i32, %c0_i32_0 : i32, i32
  }
  func.func @transform_9(%arg0: i32, %arg1: i32) -> (i32, i32) {
    %c0_i32 = arith.constant 0 : i32
    %c0_i32_0 = arith.constant 0 : i32
    %c0_i32_1 = arith.constant 0 : i32
    return %c0_i32, %c0_i32_0 : i32, i32
  }
  func.func @transform_10(%arg0: i32, %arg1: i32) -> (i32, i32) {
    %c0_i32 = arith.constant 0 : i32
    %c0_i32_0 = arith.constant 0 : i32
    return %arg0, %c0_i32 : i32, i32
  }
}

module attributes {stable_mosaic.version = 11 : i64} {
  func.func @sage_layer_kernel(%arg0: i32, %arg1: i32, %arg2: memref<1x512xi32, #tpu.memory_space<vmem>>, %arg3: memref<128x1xf32, #tpu.memory_space<vmem>>, %arg4: memref<128x1xf32, #tpu.memory_space<vmem>>, %arg5: memref<512x136xbf16, #tpu.memory_space<vmem>>, %arg6: memref<128x128xbf16, #tpu.memory_space<vmem>>, %arg7: memref<136x32xbf16, #tpu.memory_space<vmem>>, %arg8: memref<1x32xf32, #tpu.memory_space<vmem>>, %arg9: memref<128x32xbf16, #tpu.memory_space<vmem>>, %arg10: memref<32x32xbf16, #tpu.memory_space<vmem>>, %arg11: memref<1x32xf32, #tpu.memory_space<vmem>>, %arg12: memref<128x32xbf16, #tpu.memory_space<vmem>>, %arg13: memref<128x136xf32, #tpu.memory_space<vmem>>) attributes {dimension_semantics = [#tpu.dimension_semantics<parallel>, #tpu.dimension_semantics<arbitrary>], iteration_bounds = array<i64: 1, 1>, scalar_prefetch = 0 : i64, scratch_operands = 1 : i64, tpu.core_type = #tpu.core_type<tc>, window_params = [{transform_indices = @transform_0, window_bounds = array<i64: 1, 512>}, {transform_indices = @transform_1, window_bounds = array<i64: 128, 1>}, {transform_indices = @transform_2, window_bounds = array<i64: 128, 1>}, {transform_indices = @transform_3, window_bounds = array<i64: 512, 136>}, {transform_indices = @transform_4, window_bounds = array<i64: 128, 128>}, {pipeline_mode = #tpu.pipeline_mode<synchronous>, transform_indices = @transform_5, window_bounds = array<i64: 136, 32>}, {pipeline_mode = #tpu.pipeline_mode<synchronous>, transform_indices = @transform_6, window_bounds = array<i64: 1, 32>}, {pipeline_mode = #tpu.pipeline_mode<synchronous>, transform_indices = @transform_7, window_bounds = array<i64: 128, 32>}, {pipeline_mode = #tpu.pipeline_mode<synchronous>, transform_indices = @transform_8, window_bounds = array<i64: 32, 32>}, {pipeline_mode = #tpu.pipeline_mode<synchronous>, transform_indices = @transform_9, window_bounds = array<i64: 1, 32>}, {transform_indices = @transform_10, window_bounds = array<i64: 128, 32>}]} {
    %c0_i32 = arith.constant 0 : i32
    %0 = arith.cmpi eq, %arg1, %c0_i32 : i32
    %1 = arith.extui %0 : i1 to i32
    %c0_i32_0 = arith.constant 0 : i32
    %2 = arith.cmpi ne, %1, %c0_i32_0 : i32
    scf.if %2 {
      %cst_10 = arith.constant 0.000000e+00 : f32
      %22 = vector.broadcast %cst_10 : f32 to vector<128x136xf32>
      %c0_11 = arith.constant 0 : index
      %c0_12 = arith.constant 0 : index
      %23 = vector.load %arg13[%c0_11, %c0_12] : memref<128x136xf32, #tpu.memory_space<vmem>>, vector<128x136xf32>
      tpu.vector_store %arg13[%c0_11, %c0_12], %22 {strides = array<i32>} : memref<128x136xf32, #tpu.memory_space<vmem>>, vector<128x136xf32>,
    } else {
    }
    %c128_i32 = arith.constant 128 : i32
    %3 = arith.muli %arg0, %c128_i32 : i32
    %4 = tpu.iota {dimensions = array<i32: 0>} : vector<128x1xi32>
    %5 = vector.broadcast %3 : i32 to vector<128x1xi32>
    %6 = arith.addi %5, %4 : vector<128x1xi32>
    %c0 = arith.constant 0 : index
    %c0_1 = arith.constant 0 : index
    %7 = vector.load %arg2[%c0, %c0_1] : memref<1x512xi32, #tpu.memory_space<vmem>>, vector<1x512xi32>
    %8 = vector.broadcast %6 : vector<128x1xi32> to vector<128x512xi32>
    %9 = vector.broadcast %7 : vector<1x512xi32> to vector<128x512xi32>
    %10 = arith.cmpi eq, %8, %9 : vector<128x512xi32>
    %11 = arith.extui %10 : vector<128x512xi1> to vector<128x512xi32>
    %12 = arith.sitofp %11 : vector<128x512xi32> to vector<128x512xf32>
    %13 = arith.truncf %12 : vector<128x512xf32> to vector<128x512xbf16>
    %c0_2 = arith.constant 0 : index
    %c0_3 = arith.constant 0 : index
    %14 = vector.load %arg13[%c0_2, %c0_3] : memref<128x136xf32, #tpu.memory_space<vmem>>, vector<128x136xf32>
    %c0_4 = arith.constant 0 : index
    %c0_5 = arith.constant 0 : index
    %15 = vector.load %arg5[%c0_4, %c0_5] : memref<512x136xbf16, #tpu.memory_space<vmem>>, vector<512x136xbf16>
    %cst = arith.constant dense<0.000000e+00> : vector<128x136xf32>
    %16 = tpu.matmul %13, %15, %cst {dimension_numbers = #tpu.dot_dimension_numbers<[1], [0], [0], [1], [0, 0, 1, 1], [], []>} : vector<128x512xbf16>, vector<512x136xbf16>, vector<128x136xf32> -> vector<128x136xf32>
    %17 = arith.addf %14, %16 : vector<128x136xf32>
    %c0_6 = arith.constant 0 : index
    %c0_7 = arith.constant 0 : index
    %18 = vector.load %arg13[%c0_6, %c0_7] : memref<128x136xf32, #tpu.memory_space<vmem>>, vector<128x136xf32>
    tpu.vector_store %arg13[%c0_6, %c0_7], %17 {strides = array<i32>} : memref<128x136xf32, #tpu.memory_space<vmem>>, vector<128x136xf32>,
    %c0_i32_8 = arith.constant 0 : i32
    %19 = arith.cmpi eq, %arg1, %c0_i32_8 : i32
    %20 = arith.extui %19 : i1 to i32
    %c0_i32_9 = arith.constant 0 : i32
    %21 = arith.cmpi ne, %20, %c0_i32_9 : i32
    scf.if %21 {
      %c0_10 = arith.constant 0 : index
      %c0_11 = arith.constant 0 : index
      %22 = vector.load %arg3[%c0_10, %c0_11] : memref<128x1xf32, #tpu.memory_space<vmem>>, vector<128x1xf32>
      %cst_12 = arith.constant 0.000000e+00 : f32
      %23 = vector.broadcast %cst_12 : f32 to vector<128x1xf32>
      %24 = arith.cmpf ogt, %22, %23 : vector<128x1xf32>
      %25 = arith.extui %24 : vector<128x1xi1> to vector<128x1xi32>
      %26 = arith.sitofp %25 : vector<128x1xi32> to vector<128x1xf32>
      %c0_13 = arith.constant 0 : index
      %c0_14 = arith.constant 0 : index
      %27 = vector.load %arg13[%c0_13, %c0_14] : memref<128x136xf32, #tpu.memory_space<vmem>>, vector<128x136xf32>
      %28 = vector.broadcast %22 : vector<128x1xf32> to vector<128x136xf32>
      %29 = arith.mulf %27, %28 : vector<128x136xf32>
      %30 = arith.truncf %29 : vector<128x136xf32> to vector<128x136xbf16>
      %c0_15 = arith.constant 0 : index
      %c0_16 = arith.constant 0 : index
      %31 = vector.load %arg7[%c0_15, %c0_16] : memref<136x32xbf16, #tpu.memory_space<vmem>>, vector<136x32xbf16>
      %cst_17 = arith.constant dense<0.000000e+00> : vector<128x32xf32>
      %32 = tpu.matmul %30, %31, %cst_17 {dimension_numbers = #tpu.dot_dimension_numbers<[1], [0], [0], [1], [0, 0, 1, 1], [], []>} : vector<128x136xbf16>, vector<136x32xbf16>, vector<128x32xf32> -> vector<128x32xf32>
      %c0_18 = arith.constant 0 : index
      %c0_19 = arith.constant 0 : index
      %33 = vector.load %arg8[%c0_18, %c0_19] : memref<1x32xf32, #tpu.memory_space<vmem>>, vector<1x32xf32>
      %34 = vector.broadcast %26 : vector<128x1xf32> to vector<128x32xf32>
      %35 = vector.broadcast %33 : vector<1x32xf32> to vector<128x32xf32>
      %36 = arith.mulf %34, %35 : vector<128x32xf32>
      %37 = arith.addf %32, %36 : vector<128x32xf32>
      %c0_20 = arith.constant 0 : index
      %c0_21 = arith.constant 0 : index
      %38 = vector.load %arg6[%c0_20, %c0_21] : memref<128x128xbf16, #tpu.memory_space<vmem>>, vector<128x128xbf16>
      %c0_22 = arith.constant 0 : index
      %c0_23 = arith.constant 0 : index
      %39 = vector.load %arg9[%c0_22, %c0_23] : memref<128x32xbf16, #tpu.memory_space<vmem>>, vector<128x32xbf16>
      %cst_24 = arith.constant dense<0.000000e+00> : vector<128x32xf32>
      %40 = tpu.matmul %38, %39, %cst_24 {dimension_numbers = #tpu.dot_dimension_numbers<[1], [0], [0], [1], [0, 0, 1, 1], [], []>} : vector<128x128xbf16>, vector<128x32xbf16>, vector<128x32xf32> -> vector<128x32xf32>
      %41 = arith.truncf %37 : vector<128x32xf32> to vector<128x32xbf16>
      %c0_25 = arith.constant 0 : index
      %c0_26 = arith.constant 0 : index
      %42 = vector.load %arg10[%c0_25, %c0_26] : memref<32x32xbf16, #tpu.memory_space<vmem>>, vector<32x32xbf16>
      %cst_27 = arith.constant dense<0.000000e+00> : vector<128x32xf32>
      %43 = tpu.matmul %41, %42, %cst_27 {dimension_numbers = #tpu.dot_dimension_numbers<[1], [0], [0], [1], [0, 0, 1, 1], [], []>} : vector<128x32xbf16>, vector<32x32xbf16>, vector<128x32xf32> -> vector<128x32xf32>
      %44 = arith.addf %40, %43 : vector<128x32xf32>
      %c0_28 = arith.constant 0 : index
      %c0_29 = arith.constant 0 : index
      %45 = vector.load %arg11[%c0_28, %c0_29] : memref<1x32xf32, #tpu.memory_space<vmem>>, vector<1x32xf32>
      %46 = vector.broadcast %45 : vector<1x32xf32> to vector<128x32xf32>
      %47 = arith.addf %44, %46 : vector<128x32xf32>
      %cst_30 = arith.constant 0.000000e+00 : f32
      %48 = vector.broadcast %cst_30 : f32 to vector<128x32xf32>
      %49 = arith.maximumf %47, %48 : vector<128x32xf32>
      %c0_31 = arith.constant 0 : index
      %c0_32 = arith.constant 0 : index
      %50 = vector.load %arg4[%c0_31, %c0_32] : memref<128x1xf32, #tpu.memory_space<vmem>>, vector<128x1xf32>
      %51 = vector.broadcast %50 : vector<128x1xf32> to vector<128x32xf32>
      %52 = arith.mulf %49, %51 : vector<128x32xf32>
      %53 = arith.truncf %52 : vector<128x32xf32> to vector<128x32xbf16>
      %c0_33 = arith.constant 0 : index
      %c0_34 = arith.constant 0 : index
      %54 = vector.load %arg12[%c0_33, %c0_34] : memref<128x32xbf16, #tpu.memory_space<vmem>>, vector<128x32xbf16>
      tpu.vector_store %arg12[%c0_33, %c0_34], %53 {strides = array<i32>} : memref<128x32xbf16, #tpu.memory_space<vmem>>, vector<128x32xbf16>,
    } else {
    }
    return
  }
  func.func @transform_0(%arg0: i32, %arg1: i32) -> (i32, i32) {
    %c0_i32 = arith.constant 0 : i32
    %c0_i32_0 = arith.constant 0 : i32
    return %c0_i32, %arg1 : i32, i32
  }
  func.func @transform_1(%arg0: i32, %arg1: i32) -> (i32, i32) {
    %c0_i32 = arith.constant 0 : i32
    %c0_i32_0 = arith.constant 0 : i32
    return %arg0, %c0_i32 : i32, i32
  }
  func.func @transform_2(%arg0: i32, %arg1: i32) -> (i32, i32) {
    %c0_i32 = arith.constant 0 : i32
    %c0_i32_0 = arith.constant 0 : i32
    return %arg0, %c0_i32 : i32, i32
  }
  func.func @transform_3(%arg0: i32, %arg1: i32) -> (i32, i32) {
    %c0_i32 = arith.constant 0 : i32
    %c0_i32_0 = arith.constant 0 : i32
    return %arg1, %c0_i32 : i32, i32
  }
  func.func @transform_4(%arg0: i32, %arg1: i32) -> (i32, i32) {
    %c0_i32 = arith.constant 0 : i32
    %c0_i32_0 = arith.constant 0 : i32
    return %arg0, %c0_i32 : i32, i32
  }
  func.func @transform_5(%arg0: i32, %arg1: i32) -> (i32, i32) {
    %c0_i32 = arith.constant 0 : i32
    %c0_i32_0 = arith.constant 0 : i32
    %c0_i32_1 = arith.constant 0 : i32
    return %c0_i32, %c0_i32_0 : i32, i32
  }
  func.func @transform_6(%arg0: i32, %arg1: i32) -> (i32, i32) {
    %c0_i32 = arith.constant 0 : i32
    %c0_i32_0 = arith.constant 0 : i32
    %c0_i32_1 = arith.constant 0 : i32
    return %c0_i32, %c0_i32_0 : i32, i32
  }
  func.func @transform_7(%arg0: i32, %arg1: i32) -> (i32, i32) {
    %c0_i32 = arith.constant 0 : i32
    %c0_i32_0 = arith.constant 0 : i32
    %c0_i32_1 = arith.constant 0 : i32
    return %c0_i32, %c0_i32_0 : i32, i32
  }
  func.func @transform_8(%arg0: i32, %arg1: i32) -> (i32, i32) {
    %c0_i32 = arith.constant 0 : i32
    %c0_i32_0 = arith.constant 0 : i32
    %c0_i32_1 = arith.constant 0 : i32
    return %c0_i32, %c0_i32_0 : i32, i32
  }
  func.func @transform_9(%arg0: i32, %arg1: i32) -> (i32, i32) {
    %c0_i32 = arith.constant 0 : i32
    %c0_i32_0 = arith.constant 0 : i32
    %c0_i32_1 = arith.constant 0 : i32
    return %c0_i32, %c0_i32_0 : i32, i32
  }
  func.func @transform_10(%arg0: i32, %arg1: i32) -> (i32, i32) {
    %c0_i32 = arith.constant 0 : i32
    %c0_i32_0 = arith.constant 0 : i32
    return %arg0, %c0_i32 : i32, i32
  }
}

module attributes {stable_mosaic.version = 11 : i64} {
  func.func @predictor_kernel(%arg0: i32, %arg1: memref<512x64xbf16, #tpu.memory_space<vmem>>, %arg2: memref<64x128xbf16, #tpu.memory_space<vmem>>, %arg3: memref<1x128xf32, #tpu.memory_space<vmem>>, %arg4: memref<512x128xbf16, #tpu.memory_space<vmem>>) attributes {dimension_semantics = [#tpu.dimension_semantics<parallel>], iteration_bounds = array<i64: 1>, scalar_prefetch = 0 : i64, scratch_operands = 0 : i64, tpu.core_type = #tpu.core_type<tc>, window_params = [{transform_indices = @transform_0, window_bounds = array<i64: 512, 64>}, {pipeline_mode = #tpu.pipeline_mode<synchronous>, transform_indices = @transform_1, window_bounds = array<i64: 64, 128>}, {pipeline_mode = #tpu.pipeline_mode<synchronous>, transform_indices = @transform_2, window_bounds = array<i64: 1, 128>}, {transform_indices = @transform_3, window_bounds = array<i64: 512, 128>}]} {
    %c0 = arith.constant 0 : index
    %c0_0 = arith.constant 0 : index
    %0 = vector.load %arg1[%c0, %c0_0] : memref<512x64xbf16, #tpu.memory_space<vmem>>, vector<512x64xbf16>
    %c0_1 = arith.constant 0 : index
    %c0_2 = arith.constant 0 : index
    %1 = vector.load %arg2[%c0_1, %c0_2] : memref<64x128xbf16, #tpu.memory_space<vmem>>, vector<64x128xbf16>
    %cst = arith.constant dense<0.000000e+00> : vector<512x128xf32>
    %2 = tpu.matmul %0, %1, %cst {dimension_numbers = #tpu.dot_dimension_numbers<[1], [0], [0], [1], [0, 0, 1, 1], [], []>} : vector<512x64xbf16>, vector<64x128xbf16>, vector<512x128xf32> -> vector<512x128xf32>
    %c0_3 = arith.constant 0 : index
    %c0_4 = arith.constant 0 : index
    %3 = vector.load %arg3[%c0_3, %c0_4] : memref<1x128xf32, #tpu.memory_space<vmem>>, vector<1x128xf32>
    %4 = vector.broadcast %3 : vector<1x128xf32> to vector<512x128xf32>
    %5 = arith.addf %2, %4 : vector<512x128xf32>
    %6 = arith.truncf %5 : vector<512x128xf32> to vector<512x128xbf16>
    %c0_5 = arith.constant 0 : index
    %c0_6 = arith.constant 0 : index
    %7 = vector.load %arg4[%c0_5, %c0_6] : memref<512x128xbf16, #tpu.memory_space<vmem>>, vector<512x128xbf16>
    tpu.vector_store %arg4[%c0_5, %c0_6], %6 {strides = array<i32>} : memref<512x128xbf16, #tpu.memory_space<vmem>>, vector<512x128xbf16>,
    return
  }
  func.func @transform_0(%arg0: i32) -> (i32, i32) {
    %c0_i32 = arith.constant 0 : i32
    %c0_i32_0 = arith.constant 0 : i32
    return %arg0, %c0_i32 : i32, i32
  }
  func.func @transform_1(%arg0: i32) -> (i32, i32) {
    %c0_i32 = arith.constant 0 : i32
    %c0_i32_0 = arith.constant 0 : i32
    %c0_i32_1 = arith.constant 0 : i32
    return %c0_i32, %c0_i32_0 : i32, i32
  }
  func.func @transform_2(%arg0: i32) -> (i32, i32) {
    %c0_i32 = arith.constant 0 : i32
    %c0_i32_0 = arith.constant 0 : i32
    %c0_i32_1 = arith.constant 0 : i32
    return %c0_i32, %c0_i32_0 : i32, i32
  }
  func.func @transform_3(%arg0: i32) -> (i32, i32) {
    %c0_i32 = arith.constant 0 : i32
    %c0_i32_0 = arith.constant 0 : i32
    return %arg0, %c0_i32 : i32, i32
  }
}

</mosaic_0001>

<bundles_post_ra>
// kernel: model_forward.5
= control target key start
LH: loop header
LB: loop body
LE: loop exit
PB: predicated region body
PF: predicated region fallthrough
CT: control target
= control target key end

     0   :  { %vm278_vm0 = vcmask 523264   ;;  %s1853_s1 = inlined_call_operand.vmem [shape: bf16[64,128], index: 1, kind: input, shape index: {}]   ;;  %s1854_s0 = inlined_call_operand.vmem [shape: bf16[512,64], index: 0, kind: input, shape index: {}]   ;;  %s1855_s2 = inlined_call_operand.vmem [shape: f32[1,128], index: 2, kind: input, shape index: {}]   ;;  %s1856_s3 = inlined_call_operand.vmem [shape: bf16[512,128], index: 3, kind: output, shape index: {}]  }
   0x1   :  { %v1492_v0 = vld [vmem:[%s1853_s1] sm:$0xff]   ;;  %v1493_v1 = vld [vmem:[%s1853_s1 + $0x8] sm:$0xff]   ;;  %v1494_v2 = vld [vmem:[%s1853_s1 + $0x10] sm:$0xff]  }
   0x2   :  { %1412 = vmatprep.subr.bf16.mxu0 %v1492_v0  ;;  %1484 = vmatprep.subr.bf16.mxu1 %v1492_v0  ;;  %v1496_v3 = vld [vmem:[%s1854_s0] sm:$0xff]   ;;  %v1495_v5 = vld [vmem:[%s1853_s1 + $0x18] sm:$0xff]   ;;  %v1498_v6 = vld [vmem:[%s1854_s0 + $0x8] sm:$0xff]  }
   0x3   :  { %1413 = vmatpush3.bf16.msra.mxu0 %v1492_v0  ;;  %1488 = vmatpush3.bf16.msra.mxu1 %v1492_v0  ;;  %v1497_v4 = vld [vmem:[%s1854_s0 + $0x80] sm:$0xff]   ;;  %v1499_v7 = vld [vmem:[%s1854_s0 + $0x88] sm:$0xff]   ;;  %v1500_v8 = vld [vmem:[%s1854_s0 + $0x10] sm:$0xff]  }
   0x4   :  { %1414 = vmatprep.subr.bf16.mxu0 %v1493_v1  ;;  %1485 = vmatprep.subr.bf16.mxu1 %v1493_v1  ;;  %v1501_v9 = vld [vmem:[%s1854_s0 + $0x90] sm:$0xff]   ;;  %v1502_v10 = vld [vmem:[%s1854_s0 + $0x18] sm:$0xff]   ;;  %v1504_v12 = vld [vmem:[%s1854_s0 + $0x20] sm:$0xff]  }
   0x5   :  { %1420 = vmatprep.mubr.msk.bf16.mxu0 %vm278_vm0, %v1496_v3  ;;  %1452 = vmatprep.mubr.msk.bf16.mxu1 %vm278_vm0, %v1497_v4  ;;  %v1503_v11 = vld [vmem:[%s1854_s0 + $0x98] sm:$0xff]   ;;  %v1505_v13 = vld [vmem:[%s1854_s0 + $0xa0] sm:$0xff]   ;;  %v1506_v14 = vld [vmem:[%s1854_s0 + $0x28] sm:$0xff]  }
   0x6   :  { %v1507_v15 = vld [vmem:[%s1854_s0 + $0xa8] sm:$0xff]   ;;  %v1508_v16 = vld [vmem:[%s1854_s0 + $0x30] sm:$0xff]   ;;  %v1510_v18 = vld [vmem:[%s1854_s0 + $0x38] sm:$0xff]  }
   0x7   :  { %1415 = vmatpush3.bf16.msra.mxu0 %v1493_v1  ;;  %1489 = vmatpush3.bf16.msra.mxu1 %v1493_v1  ;;  %v1509_v17 = vld [vmem:[%s1854_s0 + $0xb0] sm:$0xff]   ;;  %v1511_v19 = vld [vmem:[%s1854_s0 + $0xb8] sm:$0xff]   ;;  %v1512_v20 = vld [vmem:[%s1854_s0 + $0x40] sm:$0xff]  }
   0x8   :  { %1416 = vmatprep.subr.bf16.mxu0 %v1494_v2  ;;  %1486 = vmatprep.subr.bf16.mxu1 %v1494_v2  ;;  %v1513_v21 = vld [vmem:[%s1854_s0 + $0xc0] sm:$0xff]   ;;  %v1514_v22 = vld [vmem:[%s1854_s0 + $0x48] sm:$0xff]   ;;  %v1516_v24 = vld [vmem:[%s1854_s0 + $0x50] sm:$0xff]  }
   0x9   :  { %v1515_v23 = vld [vmem:[%s1854_s0 + $0xc8] sm:$0xff]   ;;  %v1517_v25 = vld [vmem:[%s1854_s0 + $0xd0] sm:$0xff]   ;;  %v1518_v26 = vld [vmem:[%s1854_s0 + $0x58] sm:$0xff]  }
   0xa   :  { %v1519_v27 = vld [vmem:[%s1854_s0 + $0xd8] sm:$0xff]   ;;  %v1520_v28 = vld [vmem:[%s1854_s0 + $0x60] sm:$0xff]   ;;  %v1522_v30 = vld [vmem:[%s1854_s0 + $0x68] sm:$0xff]  }
   0xb   :  { %1417 = vmatpush3.bf16.msra.mxu0 %v1494_v2  ;;  %1490 = vmatpush3.bf16.msra.mxu1 %v1494_v2  ;;  %v1521_v29 = vld [vmem:[%s1854_s0 + $0xe0] sm:$0xff]   ;;  %v1523_v31 = vld [vmem:[%s1854_s0 + $0xe8] sm:$0xff]   ;;  %v1524_v32 = vld [vmem:[%s1854_s0 + $0x70] sm:$0xff]  }
   0xc   :  { %1418 = vmatprep.subr.bf16.mxu0 %v1495_v5  ;;  %1487 = vmatprep.subr.bf16.mxu1 %v1495_v5  ;;  %v1525_v33 = vld [vmem:[%s1854_s0 + $0xf0] sm:$0xff]   ;;  %v1526_v34 = vld [vmem:[%s1854_s0 + $0x78] sm:$0xff]   ;;  %v1691_v37 = vld [vmem:[%s1855_s2] ss:$0 sm:$0xff] }
   0xd   :  { %v1527_v35 = vld [vmem:[%s1854_s0 + $0xf8] sm:$0xff]  }
   0xf   :  { %1419 = vmatpush3.bf16.msra.mxu0 %v1495_v5  ;;  %1491 = vmatpush3.bf16.msra.mxu1 %v1495_v5 }
  0x12   :  { %1421 = vmatmul.mubr.msk.bf16.vlgmr.msra.gmra.mrb[0].mxu0 %vm278_vm0, %v1498_v6  ;;  %1453 = vmatmul.mubr.msk.bf16.vlgmr.msra.gmra.mrb[0].mxu1 %vm278_vm0, %v1499_v7 }
  0x13   :  { %1424 = vmatprep.mubr.msk.bf16.mxu0 %vm278_vm0, %v1500_v8  ;;  %1456 = vmatprep.mubr.msk.bf16.mxu1 %vm278_vm0, %v1501_v9 }
  0x1a   :  { %1425 = vmatmul.mubr.msk.bf16.gmra.mrb[4].mxu0 %vm278_vm0, %v1502_v10  ;;  %1457 = vmatmul.mubr.msk.bf16.gmra.mrb[4].mxu1 %vm278_vm0, %v1503_v11 }
  0x1b   :  { %1428 = vmatprep.mubr.msk.bf16.mxu0 %vm278_vm0, %v1504_v12  ;;  %1460 = vmatprep.mubr.msk.bf16.mxu1 %vm278_vm0, %v1505_v13 }
  0x22   :  { %1429 = vmatmul.mubr.msk.bf16.gmra.mrb[8].mxu0 %vm278_vm0, %v1506_v14  ;;  %1461 = vmatmul.mubr.msk.bf16.gmra.mrb[8].mxu1 %vm278_vm0, %v1507_v15 }
  0x23   :  { %1432 = vmatprep.mubr.msk.bf16.mxu0 %vm278_vm0, %v1508_v16  ;;  %1464 = vmatprep.mubr.msk.bf16.mxu1 %vm278_vm0, %v1509_v17 }
  0x2a   :  { %1433 = vmatmul.mubr.msk.bf16.gmra.mrb[12].mxu0 %vm278_vm0, %v1510_v18  ;;  %1465 = vmatmul.mubr.msk.bf16.gmra.mrb[12].mxu1 %vm278_vm0, %v1511_v19 }
  0x2b   :  { %1436 = vmatprep.mubr.msk.bf16.mxu0 %vm278_vm0, %v1512_v20  ;;  %1468 = vmatprep.mubr.msk.bf16.mxu1 %vm278_vm0, %v1513_v21 }
  0x32   :  { %1437 = vmatmul.mubr.msk.bf16.gmra.mrb[16].mxu0 %vm278_vm0, %v1514_v22  ;;  %1469 = vmatmul.mubr.msk.bf16.gmra.mrb[16].mxu1 %vm278_vm0, %v1515_v23 }
  0x33   :  { %1440 = vmatprep.mubr.msk.bf16.mxu0 %vm278_vm0, %v1516_v24  ;;  %1472 = vmatprep.mubr.msk.bf16.mxu1 %vm278_vm0, %v1517_v25 }
  0x3a   :  { %1441 = vmatmul.mubr.msk.bf16.gmra.mrb[20].mxu0 %vm278_vm0, %v1518_v26  ;;  %1473 = vmatmul.mubr.msk.bf16.gmra.mrb[20].mxu1 %vm278_vm0, %v1519_v27 }
  0x3b   :  { %1444 = vmatprep.mubr.msk.bf16.mxu0 %vm278_vm0, %v1520_v28  ;;  %1476 = vmatprep.mubr.msk.bf16.mxu1 %vm278_vm0, %v1521_v29 }
  0x42   :  { %1445 = vmatmul.mubr.msk.bf16.gmra.mrb[24].mxu0 %vm278_vm0, %v1522_v30  ;;  %1477 = vmatmul.mubr.msk.bf16.gmra.mrb[24].mxu1 %vm278_vm0, %v1523_v31 }
  0x43   :  { %1448 = vmatprep.mubr.msk.bf16.mxu0 %vm278_vm0, %v1524_v32  ;;  %1480 = vmatprep.mubr.msk.bf16.mxu1 %vm278_vm0, %v1525_v33 }
  0x4a   :  { %1449 = vmatmul.mubr.msk.bf16.gmra.mrb[28].mxu0 %vm278_vm0, %v1526_v34  ;;  %1481 = vmatmul.mubr.msk.bf16.gmra.mrb[28].mxu1 %vm278_vm0, %v1527_v35 }
  0xe5   :  { %v1422_v36 = vpop.f32.mrb[0].mxu0  ;;  %v1454_v38 = vpop.f32.mrb[0].mxu1 }
  0xe6   :  { %v409_v39 = vpop.f32.mrb[1].mxu0  ;;  %v537_v40 = vpop.f32.mrb[1].mxu1  ;;  %v418_v43 = vadd.f32 %v1422_v36, %v1691_v37  ;;  %v546_v44 = vadd.f32 %v1454_v38, %v1691_v37 }
  0xe7   :  { %v1423_v41 = vpop.f32.mrb[2].mxu0  ;;  %v1455_v42 = vpop.f32.mrb[2].mxu1  ;;  %v410_v49 = vadd.f32 %v1691_v37, %v409_v39  ;;  %v538_v50 = vadd.f32 %v1691_v37, %v537_v40 }
  0xe8   :  { %v421_v45 = vadd.f32 %v1423_v41, %v1691_v37  ;;  %v549_v46 = vadd.f32 %v1455_v42, %v1691_v37  ;;  %v412_v47 = vpop.f32.mrb[3].mxu0  ;;  %v540_v48 = vpop.f32.mrb[3].mxu1 }
  0xe9   :  { %v413_v51 = vadd.f32 %v1691_v37, %v412_v47  ;;  %v541_v52 = vadd.f32 %v1691_v37, %v540_v48 }
  0xea   :  { %v1193_v53 = vpack.c.bf16 %v421_v45, %v418_v43  ;;  %v1273_v54 = vpack.c.bf16 %v549_v46, %v546_v44 }
  0xeb   :  { %v1188_v55 = vpack.c.bf16 %v413_v51, %v410_v49  ;;  %v1268_v56 = vpack.c.bf16 %v541_v52, %v538_v50 }
  0xec   :  { %1345 = vst [vmem:[%s1856_s3 + $0x8] sm:$0xff] %v1193_v53   ;;  %1361 = vst [vmem:[%s1856_s3 + $0x88] sm:$0xff] %v1273_v54  }
  0xed   :  { %1189 = vst [vmem:[%s1856_s3] sm:$0xff] %v1188_v55   ;;  %1360 = vst [vmem:[%s1856_s3 + $0x80] sm:$0xff] %v1268_v56   ;;  %v1426_v57 = vpop.f32.mrb[4].mxu0  ;;  %v1458_v58 = vpop.f32.mrb[4].mxu1 }
  0xee   :  { %v425_v59 = vpop.f32.mrb[5].mxu0  ;;  %v553_v60 = vpop.f32.mrb[5].mxu1  ;;  %v434_v63 = vadd.f32 %v1426_v57, %v1691_v37  ;;  %v562_v0 = vadd.f32 %v1458_v58, %v1691_v37 }
  0xef   :  { %v1427_v61 = vpop.f32.mrb[6].mxu0  ;;  %v1459_v62 = vpop.f32.mrb[6].mxu1  ;;  %v426_v5 = vadd.f32 %v1691_v37, %v425_v59  ;;  %v554_v6 = vadd.f32 %v1691_v37, %v553_v60 }
  0xf0   :  { %v437_v1 = vadd.f32 %v1427_v61, %v1691_v37  ;;  %v565_v2 = vadd.f32 %v1459_v62, %v1691_v37  ;;  %v428_v3 = vpop.f32.mrb[7].mxu0  ;;  %v556_v4 = vpop.f32.mrb[7].mxu1 }
  0xf1   :  { %v429_v7 = vadd.f32 %v1691_v37, %v428_v3  ;;  %v557_v8 = vadd.f32 %v1691_v37, %v556_v4 }
  0xf2   :  { %v1203_v9 = vpack.c.bf16 %v437_v1, %v434_v63  ;;  %v1283_v10 = vpack.c.bf16 %v565_v2, %v562_v0 }
  0xf3   :  { %v1198_v11 = vpack.c.bf16 %v429_v7, %v426_v5  ;;  %v1278_v12 = vpack.c.bf16 %v557_v8, %v554_v6 }
  0xf4   :  { %1347 = vst [vmem:[%s1856_s3 + $0x18] sm:$0xff] %v1203_v9   ;;  %1363 = vst [vmem:[%s1856_s3 + $0x98] sm:$0xff] %v1283_v10  }
  0xf5   :  { %1346 = vst [vmem:[%s1856_s3 + $0x10] sm:$0xff] %v1198_v11   ;;  %1362 = vst [vmem:[%s1856_s3 + $0x90] sm:$0xff] %v1278_v12   ;;  %v1430_v13 = vpop.f32.mrb[8].mxu0  ;;  %v1462_v14 = vpop.f32.mrb[8].mxu1 }
  0xf6   :  { %v441_v15 = vpop.f32.mrb[9].mxu0  ;;  %v569_v16 = vpop.f32.mrb[9].mxu1  ;;  %v450_v19 = vadd.f32 %v1430_v13, %v1691_v37  ;;  %v578_v20 = vadd.f32 %v1462_v14, %v1691_v37 }
  0xf7   :  { %v1431_v17 = vpop.f32.mrb[10].mxu0  ;;  %v1463_v18 = vpop.f32.mrb[10].mxu1  ;;  %v442_v25 = vadd.f32 %v1691_v37, %v441_v15  ;;  %v570_v26 = vadd.f32 %v1691_v37, %v569_v16 }
  0xf8   :  { %v453_v21 = vadd.f32 %v1431_v17, %v1691_v37  ;;  %v581_v22 = vadd.f32 %v1463_v18, %v1691_v37  ;;  %v444_v23 = vpop.f32.mrb[11].mxu0  ;;  %v572_v24 = vpop.f32.mrb[11].mxu1 }
  0xf9   :  { %v445_v27 = vadd.f32 %v1691_v37, %v444_v23  ;;  %v573_v28 = vadd.f32 %v1691_v37, %v572_v24 }
  0xfa   :  { %v1213_v29 = vpack.c.bf16 %v453_v21, %v450_v19  ;;  %v1293_v30 = vpack.c.bf16 %v581_v22, %v578_v20 }
  0xfb   :  { %v1208_v31 = vpack.c.bf16 %v445_v27, %v442_v25  ;;  %v1288_v32 = vpack.c.bf16 %v573_v28, %v570_v26 }
  0xfc   :  { %1349 = vst [vmem:[%s1856_s3 + $0x28] sm:$0xff] %v1213_v29   ;;  %1365 = vst [vmem:[%s1856_s3 + $0xa8] sm:$0xff] %v1293_v30  }
  0xfd   :  { %1348 = vst [vmem:[%s1856_s3 + $0x20] sm:$0xff] %v1208_v31   ;;  %1364 = vst [vmem:[%s1856_s3 + $0xa0] sm:$0xff] %v1288_v32   ;;  %v1434_v33 = vpop.f32.mrb[12].mxu0  ;;  %v1466_v34 = vpop.f32.mrb[12].mxu1 }
  0xfe   :  { %v457_v35 = vpop.f32.mrb[13].mxu0  ;;  %v585_v36 = vpop.f32.mrb[13].mxu1  ;;  %v466_v40 = vadd.f32 %v1434_v33, %v1691_v37  ;;  %v594_v41 = vadd.f32 %v1466_v34, %v1691_v37 }
  0xff   :  { %v1435_v38 = vpop.f32.mrb[14].mxu0  ;;  %v1467_v39 = vpop.f32.mrb[14].mxu1  ;;  %v458_v46 = vadd.f32 %v1691_v37, %v457_v35  ;;  %v586_v47 = vadd.f32 %v1691_v37, %v585_v36 }
 0x100   :  { %v469_v42 = vadd.f32 %v1435_v38, %v1691_v37  ;;  %v597_v43 = vadd.f32 %v1467_v39, %v1691_v37  ;;  %v460_v44 = vpop.f32.mrb[15].mxu0  ;;  %v588_v45 = vpop.f32.mrb[15].mxu1 }
 0x101   :  { %v461_v48 = vadd.f32 %v1691_v37, %v460_v44  ;;  %v589_v49 = vadd.f32 %v1691_v37, %v588_v45 }
 0x102   :  { %v1223_v50 = vpack.c.bf16 %v469_v42, %v466_v40  ;;  %v1303_v51 = vpack.c.bf16 %v597_v43, %v594_v41 }
 0x103   :  { %v1218_v52 = vpack.c.bf16 %v461_v48, %v458_v46  ;;  %v1298_v53 = vpack.c.bf16 %v589_v49, %v586_v47 }
 0x104   :  { %1351 = vst [vmem:[%s1856_s3 + $0x38] sm:$0xff] %v1223_v50   ;;  %1367 = vst [vmem:[%s1856_s3 + $0xb8] sm:$0xff] %v1303_v51  }
 0x105   :  { %1350 = vst [vmem:[%s1856_s3 + $0x30] sm:$0xff] %v1218_v52   ;;  %1366 = vst [vmem:[%s1856_s3 + $0xb0] sm:$0xff] %v1298_v53   ;;  %v1438_v54 = vpop.f32.mrb[16].mxu0  ;;  %v1470_v55 = vpop.f32.mrb[16].mxu1 }
 0x106   :  { %v473_v56 = vpop.f32.mrb[17].mxu0  ;;  %v601_v57 = vpop.f32.mrb[17].mxu1  ;;  %v482_v60 = vadd.f32 %v1438_v54, %v1691_v37  ;;  %v610_v61 = vadd.f32 %v1470_v55, %v1691_v37 }
 0x107   :  { %v1439_v58 = vpop.f32.mrb[18].mxu0  ;;  %v1471_v59 = vpop.f32.mrb[18].mxu1  ;;  %v474_v2 = vadd.f32 %v1691_v37, %v473_v56  ;;  %v602_v3 = vadd.f32 %v1691_v37, %v601_v57 }
 0x108   :  { %v485_v62 = vadd.f32 %v1439_v58, %v1691_v37  ;;  %v613_v63 = vadd.f32 %v1471_v59, %v1691_v37  ;;  %v476_v0 = vpop.f32.mrb[19].mxu0  ;;  %v604_v1 = vpop.f32.mrb[19].mxu1 }
 0x109   :  { %v477_v4 = vadd.f32 %v1691_v37, %v476_v0  ;;  %v605_v5 = vadd.f32 %v1691_v37, %v604_v1 }
 0x10a   :  { %v1233_v6 = vpack.c.bf16 %v485_v62, %v482_v60  ;;  %v1313_v7 = vpack.c.bf16 %v613_v63, %v610_v61 }
 0x10b   :  { %v1228_v8 = vpack.c.bf16 %v477_v4, %v474_v2  ;;  %v1308_v9 = vpack.c.bf16 %v605_v5, %v602_v3 }
 0x10c   :  { %1353 = vst [vmem:[%s1856_s3 + $0x48] sm:$0xff] %v1233_v6   ;;  %1369 = vst [vmem:[%s1856_s3 + $0xc8] sm:$0xff] %v1313_v7  }
 0x10d   :  { %1352 = vst [vmem:[%s1856_s3 + $0x40] sm:$0xff] %v1228_v8   ;;  %1368 = vst [vmem:[%s1856_s3 + $0xc0] sm:$0xff] %v1308_v9   ;;  %v1442_v10 = vpop.f32.mrb[20].mxu0  ;;  %v1474_v11 = vpop.f32.mrb[20].mxu1 }
 0x10e   :  { %v489_v12 = vpop.f32.mrb[21].mxu0  ;;  %v617_v13 = vpop.f32.mrb[21].mxu1  ;;  %v498_v16 = vadd.f32 %v1442_v10, %v1691_v37  ;;  %v626_v17 = vadd.f32 %v1474_v11, %v1691_v37 }
 0x10f   :  { %v1443_v14 = vpop.f32.mrb[22].mxu0  ;;  %v1475_v15 = vpop.f32.mrb[22].mxu1  ;;  %v490_v22 = vadd.f32 %v1691_v37, %v489_v12  ;;  %v618_v23 = vadd.f32 %v1691_v37, %v617_v13 }
 0x110   :  { %v501_v18 = vadd.f32 %v1443_v14, %v1691_v37  ;;  %v629_v19 = vadd.f32 %v1475_v15, %v1691_v37  ;;  %v492_v20 = vpop.f32.mrb[23].mxu0  ;;  %v620_v21 = vpop.f32.mrb[23].mxu1 }
 0x111   :  { %v493_v24 = vadd.f32 %v1691_v37, %v492_v20  ;;  %v621_v25 = vadd.f32 %v1691_v37, %v620_v21 }
 0x112   :  { %v1243_v26 = vpack.c.bf16 %v501_v18, %v498_v16  ;;  %v1323_v27 = vpack.c.bf16 %v629_v19, %v626_v17 }
 0x113   :  { %v1238_v28 = vpack.c.bf16 %v493_v24, %v490_v22  ;;  %v1318_v29 = vpack.c.bf16 %v621_v25, %v618_v23 }
 0x114   :  { %1355 = vst [vmem:[%s1856_s3 + $0x58] sm:$0xff] %v1243_v26   ;;  %1371 = vst [vmem:[%s1856_s3 + $0xd8] sm:$0xff] %v1323_v27  }
 0x115   :  { %1354 = vst [vmem:[%s1856_s3 + $0x50] sm:$0xff] %v1238_v28   ;;  %1370 = vst [vmem:[%s1856_s3 + $0xd0] sm:$0xff] %v1318_v29   ;;  %v1446_v30 = vpop.f32.mrb[24].mxu0  ;;  %v1478_v31 = vpop.f32.mrb[24].mxu1 }
 0x116   :  { %v505_v32 = vpop.f32.mrb[25].mxu0  ;;  %v633_v33 = vpop.f32.mrb[25].mxu1  ;;  %v514_v36 = vadd.f32 %v1446_v30, %v1691_v37  ;;  %v642_v38 = vadd.f32 %v1478_v31, %v1691_v37 }
 0x117   :  { %v1447_v34 = vpop.f32.mrb[26].mxu0  ;;  %v1479_v35 = vpop.f32.mrb[26].mxu1  ;;  %v506_v43 = vadd.f32 %v1691_v37, %v505_v32  ;;  %v634_v44 = vadd.f32 %v1691_v37, %v633_v33 }
 0x118   :  { %v517_v39 = vadd.f32 %v1447_v34, %v1691_v37  ;;  %v645_v40 = vadd.f32 %v1479_v35, %v1691_v37  ;;  %v508_v41 = vpop.f32.mrb[27].mxu0  ;;  %v636_v42 = vpop.f32.mrb[27].mxu1 }
 0x119   :  { %v509_v45 = vadd.f32 %v1691_v37, %v508_v41  ;;  %v637_v46 = vadd.f32 %v1691_v37, %v636_v42 }
 0x11a   :  { %v1253_v47 = vpack.c.bf16 %v517_v39, %v514_v36  ;;  %v1333_v48 = vpack.c.bf16 %v645_v40, %v642_v38 }
 0x11b   :  { %v1248_v49 = vpack.c.bf16 %v509_v45, %v506_v43  ;;  %v1328_v50 = vpack.c.bf16 %v637_v46, %v634_v44 }
 0x11c   :  { %1357 = vst [vmem:[%s1856_s3 + $0x68] sm:$0xff] %v1253_v47   ;;  %1373 = vst [vmem:[%s1856_s3 + $0xe8] sm:$0xff] %v1333_v48  }
 0x11d   :  { %1356 = vst [vmem:[%s1856_s3 + $0x60] sm:$0xff] %v1248_v49   ;;  %1372 = vst [vmem:[%s1856_s3 + $0xe0] sm:$0xff] %v1328_v50   ;;  %v1450_v51 = vpop.f32.mrb[28].mxu0  ;;  %v1482_v52 = vpop.f32.mrb[28].mxu1 }
 0x11e   :  { %v521_v53 = vpop.f32.mrb[29].mxu0  ;;  %v649_v54 = vpop.f32.mrb[29].mxu1  ;;  %v530_v57 = vadd.f32 %v1450_v51, %v1691_v37  ;;  %v658_v58 = vadd.f32 %v1482_v52, %v1691_v37 }
 0x11f   :  { %v1451_v55 = vpop.f32.mrb[30].mxu0  ;;  %v1483_v56 = vpop.f32.mrb[30].mxu1  ;;  %v522_v63 = vadd.f32 %v1691_v37, %v521_v53  ;;  %v650_v0 = vadd.f32 %v1691_v37, %v649_v54 }
 0x120   :  { %v533_v59 = vadd.f32 %v1451_v55, %v1691_v37  ;;  %v661_v60 = vadd.f32 %v1483_v56, %v1691_v37  ;;  %v524_v61 = vpop.f32.mrb[31].mxu0  ;;  %v652_v62 = vpop.f32.mrb[31].mxu1 }
 0x121   :  { %v525_v1 = vadd.f32 %v1691_v37, %v524_v61  ;;  %v653_v2 = vadd.f32 %v1691_v37, %v652_v62 }
 0x122   :  { %v1263_v3 = vpack.c.bf16 %v533_v59, %v530_v57  ;;  %v1343_v4 = vpack.c.bf16 %v661_v60, %v658_v58 }
 0x123   :  { %v1258_v5 = vpack.c.bf16 %v525_v1, %v522_v63  ;;  %v1338_v6 = vpack.c.bf16 %v653_v2, %v650_v0 }
 0x124   :  { %1359 = vst [vmem:[%s1856_s3 + $0x78] sm:$0xff] %v1263_v3   ;;  %1375 = vst [vmem:[%s1856_s3 + $0xf8] sm:$0xff] %v1343_v4  }
 0x125   :  { %1358 = vst [vmem:[%s1856_s3 + $0x70] sm:$0xff] %v1258_v5   ;;  %1374 = vst [vmem:[%s1856_s3 + $0xf0] sm:$0xff] %v1338_v6  }

// kernel: model_forward.3
= control target key start
LH: loop header
LB: loop body
LE: loop exit
PB: predicated region body
PF: predicated region fallthrough
CT: control target
= control target key end

     0   :  { %v2503_v1 = vmov 0   ;;  %v58_v12 = vlaneseq  ;;  %v2504_v42 = vmov 1.0|1.0   ;;  %s3423_s3 = inlined_call_operand.vmem [shape: bf16[512,24], index: 3, kind: input, shape index: {}]   ;;  %s3424_s0 = inlined_call_operand.vmem [shape: s32[1,512], index: 0, kind: input, shape index: {}]   ;;  %s3425_s1 = inlined_call_operand.vmem [shape: f32[128,1], index: 1, kind: input, shape index: {}]   ;;  %s3426_s2 = inlined_call_operand.vmem [shape: f32[128,1], index: 2, kind: input, shape index: {}]   ;;  %s3427_s5 = inlined_call_operand.vmem [shape: bf16[24,128], index: 5, kind: input, shape index: {}]   ;;  %s3428_s8 = inlined_call_operand.vmem [shape: bf16[128,128], index: 8, kind: input, shape index: {}]   ;;  %s3429_s7 = inlined_call_operand.vmem [shape: bf16[16,128], index: 7, kind: input, shape index: {}]   ;;  %s3430_s4 = inlined_call_operand.vmem [shape: bf16[128,16], index: 4, kind: input, shape index: {}]   ;;  %s3431_s6 = inlined_call_operand.vmem [shape: f32[1,128], index: 6, kind: input, shape index: {}]   ;;  %s3432_s9 = inlined_call_operand.vmem [shape: f32[1,128], index: 9, kind: input, shape index: {}]   ;;  %s3433_s10 = inlined_call_operand.vmem [shape: bf16[128,128], index: 10, kind: output, shape index: {}]  }
   0x1   :  { %v2452_v0 = vld [vmem:[%s3423_s3 + $0x40] sm:$0xff]   ;;  %2410 = vset.pattern.permute.xlu0 %v2503_v1  ;;  %2411 = vset.pattern.permute.xlu1 %v2503_v1  ;;  %v2454_v3 = vld [vmem:[%s3423_s3 + $0x48] sm:$0xff]   ;;  %v2456_v5 = vld [vmem:[%s3423_s3 + $0x50] sm:$0xff]  }
   0x2   :  { %v2453_v2 = vld [vmem:[%s3423_s3] sm:$0xff]   ;;  %2141 = vmatprep.subr.bf16.mxu0 %v2452_v0  ;;  %v2455_v4 = vld [vmem:[%s3423_s3 + $0x8] sm:$0xff]   ;;  %v2457_v6 = vld [vmem:[%s3423_s3 + $0x10] sm:$0xff]   ;;  %v2617_v17 = vshrl.u32 %v58_v12, 7 }
   0x3   :  { %2142 = vmatpush3.bf16.msra.mxu0 %v2453_v2  ;;  %v2458_v7 = vld [vmem:[%s3423_s3 + $0x58] sm:$0xff]   ;;  %v2585_v8 = vld [vmem:[%s3423_s3 + $0xc0] sm:$0xff]   ;;  %v2603_v13 = vld [vmem:[%s3423_s3 + $0xc8] sm:$0xff]  }
   0x4   :  { %2143 = vmatprep.subr.bf16.mxu0 %v2454_v3  ;;  %v2459_v9 = vld [vmem:[%s3423_s3 + $0x18] sm:$0xff]   ;;  %2374 = vmatprep.subr.bf16.mxu1 %v2585_v8  ;;  %v2594_v10 = vld [vmem:[%s3423_s3 + $0x80] sm:$0xff]   ;;  %v2612_v15 = vld [vmem:[%s3423_s3 + $0x88] sm:$0xff]   ;;  %v2635_v21 = vadd.s32 8, %v2617_v17  ;;  %v99_v23 = vsub.s32 1, %v2617_v17  ;;  %v95_v26 = vsub.s32 0, %v2617_v17 }
   0x5   :  { %v2460_v11 = vld [vmem:[%s3423_s3 + $0x60] sm:$0xff]   ;;  %2382 = vmatpush3.bf16.msra.mxu1 %v2594_v10  ;;  %v2464_v16 = vld [vmem:[%s3423_s3 + $0x68] sm:$0xff]   ;;  %v2623_v18 = vld [vmem:[%s3423_s3 + $0xd0] sm:$0xff]   ;;  %v2655_v28 = vadd.s32 16, %v2617_v17  ;;  %v107_v30 = vsub.s32 3, %v2617_v17  ;;  %v2681_v36 = vadd.s32 24, %v2617_v17 }
   0x6   :  { %v2462_v14 = vld [vmem:[%s3423_s3 + $0x20] sm:$0xff]   ;;  %2375 = vmatprep.subr.bf16.mxu1 %v2603_v13  ;;  %v2466_v19 = vld [vmem:[%s3423_s3 + $0x28] sm:$0xff]   ;;  %v2632_v20 = vld [vmem:[%s3423_s3 + $0x90] sm:$0xff]   ;;  %v2689_v38 = vadd.s32 32, %v2617_v17  ;;  %v2701_v40 = vadd.s32 40, %v2617_v17  ;;  %v103_v45 = vsub.s32 2, %v2617_v17 }
   0x7   :  { %2144 = vmatpush3.bf16.msra.mxu0 %v2455_v4  ;;  %v2468_v22 = vld [vmem:[%s3423_s3 + $0x70] sm:$0xff]   ;;  %v2648_v25 = vld [vmem:[%s3423_s3 + $0xd8] sm:$0xff]   ;;  %v92_v31 = vld [vmem:[%s3424_s0] sm:$0xf]  ;;  %v2751_v49 = vadd.s32 48, %v2617_v17  ;;  %v2754_v50 = vadd.s32 56, %v2617_v17 }
   0x8   :  { %2145 = vmatprep.subr.bf16.mxu0 %v2456_v5  ;;  %v2470_v24 = vld [vmem:[%s3423_s3 + $0x30] sm:$0xff]   ;;  %v2472_v27 = vld [vmem:[%s3423_s3 + $0x78] sm:$0xff]   ;;  %v2671_v33 = vrot.slane %v92_v31, %v99_v23  ;;  %v2673_v34 = vrot.slane %v92_v31, %v95_v26  ;;  %v2678_v35 = vld [vmem:[%s3423_s3 + $0xe0] sm:$0xff]   ;;  %v2703_v41 = vrot.slane %v92_v31, %v107_v30  ;;  %v2746_v48 = vrot.slane %v92_v31, %v103_v45 }
   0x9   :  { %2383 = vmatpush3.bf16.msra.mxu1 %v2612_v15  ;;  %v2661_v29 = vld [vmem:[%s3423_s3 + $0x98] sm:$0xff]   ;;  %v2686_v37 = vld [vmem:[%s3423_s3 + $0xa0] sm:$0xff]   ;;  %v2698_v39 = vld [vmem:[%s3423_s3 + $0xe8] sm:$0xff]   ;;  %v2793_v53 = vadd.s32 64, %v2617_v17  ;;  %v2796_v54 = vadd.s32 72, %v2617_v17  ;;  %v2843_v58 = vadd.s32 80, %v2617_v17 }
   0xa   :  { %2376 = vmatprep.subr.bf16.mxu1 %v2623_v18  ;;  %v2474_v32 = vld [vmem:[%s3423_s3 + $0x38] sm:$0xff]   ;;  %vm110_vm0 = vcmp.eq.s32.totalorder %v2617_v17, %v2671_v33  ;;  %vm114_vm1 = vcmp.eq.s32.totalorder %v2635_v21, %v2671_v33  ;;  %vm109_vm3 = vcmp.eq.s32.totalorder %v2617_v17, %v2673_v34  ;;  %vm113_vm4 = vcmp.eq.s32.totalorder %v2635_v21, %v2673_v34  ;;  %v2715_v43 = vld [vmem:[%s3423_s3 + $0xa8] sm:$0xff]   ;;  %v2725_v44 = vld [vmem:[%s3423_s3 + $0xf0] sm:$0xff]  }
   0xb   :  { %2146 = vmatpush3.bf16.msra.mxu0 %v2457_v6  ;;  %vm1945_vm2 = vmpackc.low %vm114_vm1, %vm110_vm0  ;;  %vm118_vm5 = vcmp.eq.s32.totalorder %v2655_v28, %v2671_v33  ;;  %vm122_vm6 = vcmp.eq.s32.totalorder %v2681_v36, %v2671_v33  ;;  %vm128_vm8 = vcmp.eq.s32.totalorder %v2689_v38, %v2703_v41  ;;  %vm132_vm9 = vcmp.eq.s32.totalorder %v2701_v40, %v2703_v41  ;;  %v2737_v46 = vld [vmem:[%s3423_s3 + $0xb0] sm:$0xff]   ;;  %v2744_v47 = vld [vmem:[%s3423_s3 + $0xf8] sm:$0xff]  }
   0xc   :  { %2147 = vmatprep.subr.bf16.mxu0 %v2458_v7  ;;  %1946 = vmatprep.mubr.msk.bf16.mxu0 %vm1945_vm2, %v2504_v42  ;;  %vm1947_vm7 = vmpackc.low %vm113_vm4, %vm109_vm3  ;;  %vm117_vm12 = vcmp.eq.s32.totalorder %v2655_v28, %v2673_v34  ;;  %vm121_vm13 = vcmp.eq.s32.totalorder %v2681_v36, %v2673_v34  ;;  %v2766_v51 = vld [vmem:[%s3423_s3 + $0xb8] sm:$0xff]   ;;  %vm126_vm14 = vcmp.eq.s32.totalorder %v2689_v38, %v2671_v33  ;;  %v2788_v52 = vld [vmem:[%s3425_s1] sm:$0xff]  ;;  %v2846_v59 = vadd.s32 88, %v2617_v17 }
   0xd   :  { %2384 = vmatpush3.bf16.msra.mxu1 %v2632_v20  ;;  %vm1949_vm10 = vmpackc.low %vm122_vm6, %vm118_vm5  ;;  %vm130_vm15 = vcmp.eq.s32.totalorder %v2701_v40, %v2671_v33  ;;  %vm127_vm0 = vcmp.eq.s32.totalorder %v2689_v38, %v2746_v48  ;;  %vm131_vm1 = vcmp.eq.s32.totalorder %v2701_v40, %v2746_v48  ;;  %vm136_vm3 = vcmp.eq.s32.totalorder %v2751_v49, %v2703_v41  ;;  %v2805_v55 = vld [vmem:[%s3425_s1 + $0x10] sm:$0xff]  ;;  %v2827_v56 = vld [vmem:[%s3425_s1 + $0x8] sm:$0xff] }
   0xe   :  { %2377 = vmatprep.subr.bf16.mxu1 %v2648_v25  ;;  %vm1985_vm11 = vmpackc.low %vm132_vm9, %vm128_vm8  ;;  %vm140_vm4 = vcmp.eq.s32.totalorder %v2754_v50, %v2703_v41  ;;  %vm120_vm8 = vcmp.eq.s32.totalorder %v2655_v28, %v2703_v41  ;;  %vm124_vm9 = vcmp.eq.s32.totalorder %v2681_v36, %v2703_v41  ;;  %917 = vperm.xlu0 %2410, %v2788_v52   ;;  %v2837_v57 = vld [vmem:[%s3425_s1 + $0x18] sm:$0xff]  ;;  %v2852_v60 = vld [vmem:[%s3425_s1 + $0x20] sm:$0xff]  ;;  %v2930_v5 = vadd.s32 96, %v2617_v17 }
   0xf   :  { %2148 = vmatpush3.bf16.msra.mxu0 %v2459_v9  ;;  %1986 = vmatprep.mubr.msk.bf16.mxu1 %vm1985_vm11, %v2504_v42  ;;  %vm1951_vm2 = vmpackc.low %vm121_vm13, %vm117_vm12  ;;  %vm129_vm11 = vcmp.eq.s32.totalorder %v2701_v40, %v2673_v34  ;;  %vm134_vm12 = vcmp.eq.s32.totalorder %v2751_v49, %v2671_v33  ;;  %vm138_vm13 = vcmp.eq.s32.totalorder %v2754_v50, %v2671_v33  ;;  %v2863_v61 = vld [vmem:[%s3425_s1 + $0x28] sm:$0xff]  ;;  %v2889_v63 = vld [vmem:[%s3425_s1 + $0x30] sm:$0xff]  ;;  %v2933_v6 = vadd.s32 104, %v2617_v17 }
  0x10   :  { %2149 = vmatprep.subr.bf16.mxu0 %v2460_v11  ;;  %vm1953_vm5 = vmpackc.low %vm130_vm15, %vm126_vm14  ;;  %vm135_vm14 = vcmp.eq.s32.totalorder %v2751_v49, %v2746_v48  ;;  %vm139_vm15 = vcmp.eq.s32.totalorder %v2754_v50, %v2746_v48  ;;  %927 = vperm.xlu1 %2411, %v2805_v55   ;;  %v2899_v0 = vld [vmem:[%s3425_s1 + $0x38] sm:$0xff]  ;;  %v2926_v4 = vld [vmem:[%s3425_s1 + $0x40] sm:$0xff] }
  0x11   :  { %2385 = vmatpush3.bf16.msra.mxu1 %v2661_v29  ;;  %vm1987_vm6 = vmpackc.low %vm131_vm1, %vm127_vm0  ;;  %vm144_vm1 = vcmp.eq.s32.totalorder %v2793_v53, %v2703_v41  ;;  %v2995_v11 = vld [vmem:[%s3425_s1 + $0x58] sm:$0xff]  ;;  %v2484_v62 = vld [vmem:[%s3427_s5] sm:$0xff]  }
  0x12   :  { %2378 = vmatprep.subr.bf16.mxu1 %v2678_v35  ;;  %922 = vperm.xlu0 %2410, %v2827_v56   ;;  %v2486_v1 = vld [vmem:[%s3428_s8] sm:$0xff]   ;;  %v2487_v2 = vld [vmem:[%s3428_s8 + $0x8] sm:$0xff]   ;;  %v2488_v3 = vld [vmem:[%s3428_s8 + $0x10] sm:$0xff]  }
  0x13   :  { %2150 = vmatpush3.bf16.msra.mxu0 %v2462_v14  ;;  %v3007_v14 = vadd.s32 120, %v2617_v17  ;;  %v2491_v12 = vld [vmem:[%s3428_s8 + $0x28] sm:$0xff]  }
  0x14   :  { %2151 = vmatprep.subr.bf16.mxu0 %v2464_v16  ;;  %932 = vperm.xlu1 %2411, %v2837_v57   ;;  %v3021_v16 = vld [vmem:[%s3425_s1 + $0x68] sm:$0xff] }
  0x15   :  { %2386 = vmatpush3.bf16.msra.mxu1 %v2686_v37 }
  0x16   :  { %2379 = vmatprep.subr.bf16.mxu1 %v2698_v39  ;;  %937 = vperm.xlu0 %2410, %v2852_v60  }
  0x17   :  { %2152 = vmatpush3.bf16.msra.mxu0 %v2466_v19 }
  0x18   :  { %2153 = vmatprep.subr.bf16.mxu0 %v2468_v22  ;;  %942 = vperm.xlu1 %2411, %v2863_v61   ;;  %v849_v22 = vld [vmem:[%s3425_s1 + $0x70] sm:$0xff] }
  0x19   :  { %2387 = vmatpush3.bf16.msra.mxu1 %v2715_v43 }
  0x1a   :  { %2380 = vmatprep.subr.bf16.mxu1 %v2725_v44  ;;  %947 = vperm.xlu0 %2410, %v2889_v63  }
  0x1b   :  { %2154 = vmatpush3.bf16.msra.mxu0 %v2470_v24 }
  0x1c   :  { %2155 = vmatprep.subr.bf16.mxu0 %v2472_v27  ;;  %952 = vperm.xlu1 %2411, %v2899_v0  }
  0x1d   :  { %2388 = vmatpush3.bf16.msra.mxu1 %v2737_v46 }
  0x1e   :  { %2381 = vmatprep.subr.bf16.mxu1 %v2744_v47  ;;  %957 = vperm.xlu0 %2410, %v2926_v4  }
  0x1f   :  { %2156 = vmatpush3.bf16.msra.mxu0 %v2474_v32 }
  0x20   :  { %2205 = vmatprep.subr.bf16.mxu0 %v2585_v8  ;;  %v2949_v8 = vld [vmem:[%s3425_s1 + $0x48] sm:$0xff] }
  0x21   :  { %2389 = vmatpush3.bf16.msra.mxu1 %v2766_v51  ;;  %962 = vperm.xlu1 %2411, %v2949_v8  }
  0x22   :  { %1948 = vmatmul.mubr.msk.bf16.vlgmr.msra.gmra.mrb[0].mxu0 %vm1947_vm7, %v2504_v42  ;;  %vm1989_vm7 = vmpackc.low %vm140_vm4, %vm136_vm3  ;;  %2324 = vmatprep.subr.bf16.mxu1 %v2486_v1 }
  0x23   :  { %2206 = vmatpush3.bf16.msra.mxu0 %v2594_v10  ;;  %1950 = vmatprep.mubr.msk.bf16.mxu0 %vm1949_vm10, %v2504_v42  ;;  %vm125_vm10 = vcmp.eq.s32.totalorder %v2689_v38, %v2673_v34  ;;  %vm1957_vm3 = vmpackc.low %vm138_vm13, %vm134_vm12  ;;  %vm143_vm12 = vcmp.eq.s32.totalorder %v2793_v53, %v2746_v48  ;;  %vm147_vm13 = vcmp.eq.s32.totalorder %v2796_v54, %v2746_v48  ;;  %v2985_v10 = vld [vmem:[%s3425_s1 + $0x50] sm:$0xff] }
  0x24   :  { %2207 = vmatprep.subr.bf16.mxu0 %v2603_v13  ;;  %1988 = vmatmul.mubr.msk.bf16.vlgmr.msra.gmra.mrb[0].mxu1 %vm1987_vm6, %v2504_v42  ;;  %vm1955_vm0 = vmpackc.low %vm129_vm11, %vm125_vm10  ;;  %vm133_vm6 = vcmp.eq.s32.totalorder %v2751_v49, %v2673_v34  ;;  %vm142_vm10 = vcmp.eq.s32.totalorder %v2793_v53, %v2671_v33  ;;  %vm146_vm11 = vcmp.eq.s32.totalorder %v2796_v54, %v2671_v33  ;;  %v3004_v13 = vadd.s32 112, %v2617_v17 }
  0x25   :  { %1990 = vmatprep.mubr.msk.bf16.mxu1 %vm1989_vm7, %v2504_v42  ;;  %vm1991_vm4 = vmpackc.low %vm139_vm15, %vm135_vm14  ;;  %vm137_vm7 = vcmp.eq.s32.totalorder %v2754_v50, %v2673_v34  ;;  %vm152_vm15 = vcmp.eq.s32.totalorder %v2843_v58, %v2703_v41  ;;  %967 = vperm.xlu0 %2410, %v2985_v10  }
  0x26   :  { %vm2877_vm14 = vmpackc.low %vm137_vm7, %vm133_vm6  ;;  %vm119_vm6 = vcmp.eq.s32.totalorder %v2655_v28, %v2746_v48  ;;  %vm123_vm7 = vcmp.eq.s32.totalorder %v2681_v36, %v2746_v48  ;;  %972 = vperm.xlu1 %2411, %v2995_v11   ;;  %2325 = vmatpush3.bf16.msra.mxu1 %v2486_v1 }
  0x27   :  { %2208 = vmatpush3.bf16.msra.mxu0 %v2612_v15  ;;  %v3014_v15 = vld [vmem:[%s3425_s1 + $0x60] sm:$0xff]  ;;  %2326 = vmatprep.subr.bf16.mxu1 %v2487_v2 }
  0x28   :  { %2209 = vmatprep.subr.bf16.mxu0 %v2623_v18  ;;  %v2505_v18 = vmov 0.0  }
  0x29   :  { %977 = vperm.xlu0 %2410, %v3014_v15  }
  0x2a   :  { %1952 = vmatmul.mubr.msk.bf16.gmra.mrb[4].mxu0 %vm1951_vm2, %v2504_v42  ;;  %vm148_vm2 = vcmp.eq.s32.totalorder %v2796_v54, %v2703_v41  ;;  %982 = vperm.xlu1 %2411, %v3021_v16  }
  0x2b   :  { %1954 = vmatprep.mubr.msk.bf16.mxu0 %vm1953_vm5, %v2504_v42  ;;  %2210 = vmatpush3.bf16.msra.mxu0 %v2632_v20  ;;  %vm1993_vm5 = vmpackc.low %vm148_vm2, %vm144_vm1  ;;  %vm111_vm2 = vcmp.eq.s32.totalorder %v2617_v17, %v2746_v48 }
  0x2c   :  { %2211 = vmatprep.subr.bf16.mxu0 %v2648_v25  ;;  %1992 = vmatmul.mubr.msk.bf16.gmra.mrb[4].mxu1 %vm1991_vm4, %v2504_v42  ;;  %vm1961_vm1 = vmpackc.low %vm146_vm11, %vm142_vm10  ;;  %v850_v25 = vld [vmem:[%s3425_s1 + $0x78] sm:$0xff] }
  0x2d   :  { %1994 = vmatprep.mubr.msk.bf16.mxu1 %vm1993_vm5, %v2504_v42  ;;  %vm2901_vm4 = vmpackc.low %vm147_vm13, %vm143_vm12  ;;  %vm141_vm12 = vcmp.eq.s32.totalorder %v2793_v53, %v2673_v34  ;;  %vm145_vm13 = vcmp.eq.s32.totalorder %v2796_v54, %v2673_v34  ;;  %987 = vperm.xlu0 %2410, %v849_v22   ;;  %v1659_v53 = vld [vmem:[%s3426_s2 + $0x30] sm:$0xff]  ;;  %v1660_v54 = vld [vmem:[%s3426_s2 + $0x38] sm:$0xff] }
  0x2e   :  { %vm2942_vm11 = vmpackc.low %vm124_vm9, %vm120_vm8  ;;  %vm150_vm9 = vcmp.eq.s32.totalorder %v2843_v58, %v2671_v33  ;;  %992 = vperm.xlu1 %2411, %v850_v25   ;;  %2327 = vmatpush3.bf16.msra.mxu1 %v2487_v2 }
  0x2f   :  { %2212 = vmatpush3.bf16.msra.mxu0 %v2661_v29  ;;  %vm2965_vm8 = vmpackc.low %vm123_vm7, %vm119_vm6  ;;  %vm851_vm7 = vcmp.gt.f32.partialorder %v2788_v52, 0.0  ;;  %v1658_v52 = vld [vmem:[%s3426_s2 + $0x28] sm:$0xff]  ;;  %2328 = vmatprep.subr.bf16.mxu1 %v2488_v3 }
  0x30   :  { %2213 = vmatprep.subr.bf16.mxu0 %v2678_v35  ;;  %v2009_v19 = vsel %vm851_vm7, 1.0, %v2505_v18  ;;  %vm855_vm7 = vcmp.gt.f32.partialorder %v2852_v60, 0.0  ;;  %v1667_v60 = vld [vmem:[%s3426_s2 + $0x70] sm:$0xff] }
  0x31   :  { %v2013_v29 = vsel %vm855_vm7, 1.0, %v2505_v18  ;;  %vm862_vm7 = vcmp.gt.f32.partialorder %v2995_v11, 0.0 }
  0x32   :  { %1956 = vmatmul.mubr.msk.bf16.gmra.mrb[8].mxu0 %vm1955_vm0, %v2504_v42  ;;  %vm156_vm0 = vcmp.eq.s32.totalorder %v2846_v59, %v2703_v41  ;;  %2329 = vmatpush3.bf16.msra.mxu1 %v2488_v3 }
  0x33   :  { %1958 = vmatprep.mubr.msk.bf16.mxu0 %vm1957_vm3, %v2504_v42  ;;  %2214 = vmatpush3.bf16.msra.mxu0 %v2686_v37  ;;  %vm115_vm3 = vcmp.eq.s32.totalorder %v2635_v21, %v2746_v48  ;;  %vm2906_vm5 = vmpackc.low %vm156_vm0, %vm152_vm15  ;;  %vm151_vm15 = vcmp.eq.s32.totalorder %v2843_v58, %v2746_v48  ;;  %vm155_vm0 = vcmp.eq.s32.totalorder %v2846_v59, %v2746_v48 }
  0x34   :  { %2215 = vmatprep.subr.bf16.mxu0 %v2698_v39  ;;  %vm2918_vm10 = vmpackc.low %vm115_vm3, %vm111_vm2  ;;  %1996 = vmatmul.mubr.msk.bf16.gmra.mrb[8].mxu1 %vm2901_vm4, %v2504_v42  ;;  %vm160_vm2 = vcmp.eq.s32.totalorder %v2930_v5, %v2703_v41  ;;  %vm164_vm3 = vcmp.eq.s32.totalorder %v2933_v6, %v2703_v41 }
  0x35   :  { %1998 = vmatprep.mubr.msk.bf16.mxu1 %vm2906_vm5, %v2504_v42  ;;  %vm1999_vm5 = vmpackc.low %vm155_vm0, %vm151_vm15  ;;  %vm854_vm15 = vcmp.gt.f32.partialorder %v2837_v57, 0.0  ;;  %vm158_vm0 = vcmp.eq.s32.totalorder %v2930_v5, %v2671_v33  ;;  %v1663_v57 = vld [vmem:[%s3426_s2 + $0x50] sm:$0xff] }
  0x36   :  { %vm2999_vm6 = vmpackc.low %vm164_vm3, %vm160_vm2  ;;  %vm159_vm2 = vcmp.eq.s32.totalorder %v2930_v5, %v2746_v48  ;;  %vm163_vm3 = vcmp.eq.s32.totalorder %v2933_v6, %v2746_v48  ;;  %v2012_v24 = vsel %vm854_vm15, 1.0, %v2505_v18 }
  0x37   :  { %2216 = vmatpush3.bf16.msra.mxu0 %v2715_v43  ;;  %vm3087_vm15 = vmpackc.low %vm163_vm3, %vm159_vm2  ;;  %vm859_vm2 = vcmp.gt.f32.partialorder %v2926_v4, 0.0  ;;  %vm860_vm3 = vcmp.gt.f32.partialorder %v2949_v8, 0.0  ;;  %v2020_v43 = vsel %vm862_vm7, 1.0, %v2505_v18  ;;  %vm112_vm7 = vcmp.eq.s32.totalorder %v2617_v17, %v2703_v41  ;;  %v1654_v17 = vld [vmem:[%s3426_s2 + $0x8] sm:$0xff]  ;;  %v2489_v4 = vld [vmem:[%s3428_s8 + $0x18] sm:$0xff]  }
  0x38   :  { %2217 = vmatprep.subr.bf16.mxu0 %v2725_v44  ;;  %v2017_v37 = vsel %vm859_vm2, 1.0, %v2505_v18  ;;  %v2018_v38 = vsel %vm860_vm3, 1.0, %v2505_v18  ;;  %vm865_vm3 = vcmp.gt.f32.partialorder %v849_v22, 0.0  ;;  %2330 = vmatprep.subr.bf16.mxu1 %v2489_v4  ;;  %v2492_v22 = vld [vmem:[%s3428_s8 + $0x30] sm:$0xff]  }
  0x39   :  { %v2432_v44 = vpack.i.bf16 %v2018_v38, %v2017_v37  ;;  %2331 = vmatpush3.bf16.msra.mxu1 %v2489_v4 }
  0x3a   :  { %1960 = vmatmul.mubr.msk.bf16.gmra.mrb[12].mxu0 %vm2877_vm14, %v2504_v42  ;;  %vm154_vm14 = vcmp.eq.s32.totalorder %v2846_v59, %v2671_v33 }
  0x3b   :  { %1962 = vmatprep.mubr.msk.bf16.mxu0 %vm1961_vm1, %v2504_v42  ;;  %2218 = vmatpush3.bf16.msra.mxu0 %v2737_v46  ;;  %vm1963_vm1 = vmpackc.low %vm145_vm13, %vm141_vm12  ;;  %vm852_vm12 = vcmp.gt.f32.partialorder %v2827_v56, 0.0  ;;  %vm149_vm13 = vcmp.eq.s32.totalorder %v2843_v58, %v2673_v34  ;;  %v1662_v56 = vld [vmem:[%s3426_s2 + $0x48] sm:$0xff]  ;;  %v1664_v58 = vld [vmem:[%s3426_s2 + $0x58] sm:$0xff] }
  0x3c   :  { %2219 = vmatprep.subr.bf16.mxu0 %v2744_v47  ;;  %vm1965_vm4 = vmpackc.low %vm154_vm14, %vm150_vm9  ;;  %vm153_vm9 = vcmp.eq.s32.totalorder %v2846_v59, %v2673_v34  ;;  %2000 = vmatmul.mubr.msk.bf16.gmra.mrb[12].mxu1 %vm1999_vm5, %v2504_v42  ;;  %vm853_vm14 = vcmp.gt.f32.partialorder %v2805_v55, 0.0  ;;  %vm172_vm5 = vcmp.eq.s32.totalorder %v3007_v14, %v2703_v41  ;;  %v2010_v20 = vsel %vm852_vm12, 1.0, %v2505_v18  ;;  %v1661_v55 = vld [vmem:[%s3426_s2 + $0x40] sm:$0xff]  ;;  %v1666_v59 = vld [vmem:[%s3426_s2 + $0x68] sm:$0xff] }
  0x3d   :  { %2002 = vmatprep.mubr.msk.bf16.mxu1 %vm2999_vm6, %v2504_v42  ;;  %vm1967_vm6 = vmpackc.low %vm153_vm9, %vm149_vm13  ;;  %v2011_v23 = vsel %vm853_vm14, 1.0, %v2505_v18  ;;  %vm856_vm12 = vcmp.gt.f32.partialorder %v2863_v61, 0.0  ;;  %vm857_vm9 = vcmp.gt.f32.partialorder %v2889_v63, 0.0  ;;  %vm858_vm14 = vcmp.gt.f32.partialorder %v2899_v0, 0.0  ;;  %v1668_v61 = vld [vmem:[%s3426_s2 + $0x78] sm:$0xff] }
  0x3e   :  { %v2412_v27 = vpack.i.bf16 %v2010_v20, %v2009_v19  ;;  %v2014_v30 = vsel %vm856_vm12, 1.0, %v2505_v18  ;;  %v2417_v31 = vpack.i.bf16 %v2012_v24, %v2011_v23  ;;  %v2015_v32 = vsel %vm857_vm9, 1.0, %v2505_v18  ;;  %v2485_v63 = vld [vmem:[%s3427_s5 + $0x8] ss:$0 sps:$4 sm:$0xff]  }
  0x3f   :  { %2220 = vmatpush3.bf16.msra.mxu0 %v2766_v51  ;;  %v2016_v35 = vsel %vm858_vm14, 1.0, %v2505_v18  ;;  %vm170_vm12 = vcmp.eq.s32.totalorder %v3007_v14, %v2671_v33  ;;  %v2422_v36 = vpack.i.bf16 %v2014_v30, %v2013_v29  ;;  %vm171_vm9 = vcmp.eq.s32.totalorder %v3007_v14, %v2746_v48  ;;  %v1657_v51 = vld [vmem:[%s3426_s2 + $0x20] sm:$0xff] }
  0x40   :  { %2413 = vperm.xlu0 %2410, %v2412_v27   ;;  %2418 = vperm.xlu1 %2411, %v2417_v31   ;;  %v2427_v39 = vpack.i.bf16 %v2016_v35, %v2015_v32 }
  0x41   :  { %2304 = vmatprep.subr.bf16.mxu0 %v2484_v62 }
  0x42   :  { %1964 = vmatmul.mubr.msk.bf16.gmra.mrb[16].mxu0 %vm1963_vm1, %v2504_v42  ;;  %vm162_vm1 = vcmp.eq.s32.totalorder %v2933_v6, %v2671_v33 }
  0x43   :  { %1966 = vmatprep.mubr.msk.bf16.mxu0 %vm1965_vm4, %v2504_v42  ;;  %vm168_vm4 = vcmp.eq.s32.totalorder %v3004_v13, %v2703_v41  ;;  %vm1969_vm13 = vmpackc.low %vm162_vm1, %vm158_vm0  ;;  %vm157_vm0 = vcmp.eq.s32.totalorder %v2930_v5, %v2673_v34 }
  0x44   :  { %vm3100_vm1 = vmpackc.low %vm172_vm5, %vm168_vm4  ;;  %vm161_vm4 = vcmp.eq.s32.totalorder %v2933_v6, %v2673_v34  ;;  %2004 = vmatmul.mubr.msk.bf16.gmra.mrb[16].mxu1 %vm3087_vm15, %v2504_v42  ;;  %vm166_vm5 = vcmp.eq.s32.totalorder %v3004_v13, %v2671_v33  ;;  %vm863_vm15 = vcmp.gt.f32.partialorder %v3014_v15, 0.0  ;;  %2423 = vperm.xlu0 %2410, %v2422_v36   ;;  %v2023_v33 = vsel %vm865_vm3, 1.0, %v2505_v18 }
  0x45   :  { %2006 = vmatprep.mubr.msk.bf16.mxu1 %vm3100_vm1, %v2504_v42  ;;  %vm1971_vm14 = vmpackc.low %vm161_vm4, %vm157_vm0  ;;  %vm864_vm1 = vcmp.gt.f32.partialorder %v3021_v16, 0.0  ;;  %vm3452_vm0 = vcmp.eq.s32.totalorder %v3004_v13, %v2746_v48  ;;  %v2021_v45 = vsel %vm863_vm15, 1.0, %v2505_v18  ;;  %2428 = vperm.xlu1 %2411, %v2427_v39  }
  0x46   :  { %vm1973_vm2 = vmpackc.low %vm170_vm12, %vm166_vm5  ;;  %v2022_v46 = vsel %vm864_vm1, 1.0, %v2505_v18  ;;  %vm165_vm5 = vcmp.eq.s32.totalorder %v3004_v13, %v2673_v34  ;;  %vm116_vm12 = vcmp.eq.s32.totalorder %v2635_v21, %v2703_v41  ;;  %v1655_v21 = vld [vmem:[%s3426_s2 + $0x10] sm:$0xff]  ;;  %v1656_v41 = vld [vmem:[%s3426_s2 + $0x18] sm:$0xff] }
  0x47   :  { %vm2007_vm4 = vmpackc.low %vm171_vm9, %vm3452_vm0  ;;  %v2442_v48 = vpack.i.bf16 %v2022_v46, %v2021_v45 }
  0x48   :  { %2433 = vperm.xlu0 %2410, %v2432_v44  }
  0x4a   :  { %1968 = vmatmul.mubr.msk.bf16.gmra.mrb[20].mxu0 %vm1967_vm6, %v2504_v42  ;;  %vm861_vm6 = vcmp.gt.f32.partialorder %v2985_v10, 0.0  ;;  %v2490_v10 = vld [vmem:[%s3428_s8 + $0x20] sm:$0xff]  }
  0x4b   :  { %1970 = vmatprep.mubr.msk.bf16.mxu0 %vm1969_vm13, %v2504_v42  ;;  %v2019_v40 = vsel %vm861_vm6, 1.0, %v2505_v18  ;;  %vm866_vm13 = vcmp.gt.f32.partialorder %v850_v25, 0.0  ;;  %vm169_vm6 = vcmp.eq.s32.totalorder %v3007_v14, %v2673_v34  ;;  %v1653_v34 = vld [vmem:[%s3426_s2] sm:$0xff]  ;;  %2332 = vmatprep.subr.bf16.mxu1 %v2490_v10 }
  0x4c   :  { %v2437_v47 = vpack.i.bf16 %v2020_v43, %v2019_v40  ;;  %v2024_v49 = vsel %vm866_vm13, 1.0, %v2505_v18  ;;  %2008 = vmatmul.mubr.msk.bf16.gmra.mrb[20].mxu1 %vm2007_vm4, %v2504_v42  ;;  %vm1975_vm9 = vmpackc.low %vm169_vm6, %vm165_vm5  ;;  %2443 = vperm.xlu0 %2410, %v2442_v48  }
  0x4d   :  { %v2447_v50 = vpack.i.bf16 %v2024_v49, %v2023_v33  ;;  %vm1977_vm13 = vmpackc.low %vm116_vm12, %vm112_vm7  ;;  %2333 = vmatpush3.bf16.msra.mxu1 %v2490_v10 }
  0x4e   :  { %2438 = vperm.xlu1 %2411, %v2437_v47   ;;  %2334 = vmatprep.subr.bf16.mxu1 %v2491_v12 }
  0x50   :  { %1671 = vperm.xlu0 %2410, %v1653_v34  }
  0x51   :  { %2335 = vmatpush3.bf16.msra.mxu1 %v2491_v12 }
  0x52   :  { %1972 = vmatmul.mubr.msk.bf16.gmra.mrb[24].mxu0 %vm1971_vm14, %v2504_v42  ;;  %2448 = vperm.xlu1 %2411, %v2447_v50  }
  0x53   :  { %1974 = vmatprep.mubr.msk.bf16.mxu0 %vm1973_vm2, %v2504_v42  ;;  %2336 = vmatprep.subr.bf16.mxu1 %v2492_v22 }
  0x54   :  { %1681 = vperm.xlu0 %2410, %v1655_v21  }
  0x55   :  { %2337 = vmatpush3.bf16.msra.mxu1 %v2492_v22 }
  0x56   :  { %1676 = vperm.xlu1 %2411, %v1654_v17  }
  0x58   :  { %1691 = vperm.xlu0 %2410, %v1657_v51  }
  0x5a   :  { %1976 = vmatmul.mubr.msk.bf16.gmra.mrb[28].mxu0 %vm1975_vm9, %v2504_v42  ;;  %1686 = vperm.xlu1 %2411, %v1656_v41  }
  0x5b   :  { %1978 = vmatprep.mubr.msk.bf16.mxu0 %vm1977_vm13, %v2504_v42 }
  0x5c   :  { %1701 = vperm.xlu0 %2410, %v1659_v53  }
  0x5e   :  { %1696 = vperm.xlu1 %2411, %v1658_v52  }
  0x60   :  { %1711 = vperm.xlu0 %2410, %v1661_v55  }
  0x62   :  { %1980 = vmatmul.mubr.msk.bf16.vlgmr.msra.gmra.mrb[32].mxu0 %vm2918_vm10, %v2504_v42  ;;  %1706 = vperm.xlu1 %2411, %v1660_v54   ;;  %vm40_vm10 = vcmask 195584  }
  0x63   :  { %1982 = vmatprep.mubr.msk.bf16.mxu0 %vm2942_vm11, %v2504_v42  ;;  %45 = vst.msk [vmem:[#allocation2 + $0x20] sm:$0xff] %vm40_vm10, %v2505_v18  ;;  %41 = vst.msk [vmem:[#allocation2] sm:$0xff] %vm40_vm10, %v2505_v18  ;;  %vm1158_vm11 = vcmask 1043456   ;;  %2305 = vmatpush3.bf16.msra.mxu0 %v2484_v62 }
  0x64   :  { %1721 = vperm.xlu0 %2410, %v1663_v57   ;;  %42 = vst.msk [vmem:[#allocation2 + $0x8] sm:$0xff] %vm40_vm10, %v2505_v18  ;;  %43 = vst.msk [vmem:[#allocation2 + $0x10] sm:$0xff] %vm40_vm10, %v2505_v18  ;;  %2406 = vmatprep.subr.msk.bf16.mxu0 %vm1158_vm11, %v2485_v63  ;;  %v1160_v0 = vsel %vm1158_vm11, %v2485_v63, 0 }
  0x65   :  { %44 = vst.msk [vmem:[#allocation2 + $0x18] sm:$0xff] %vm40_vm10, %v2505_v18  ;;  %46 = vst.msk [vmem:[#allocation2 + $0x28] sm:$0xff] %vm40_vm10, %v2505_v18 }
  0x66   :  { %1716 = vperm.xlu1 %2411, %v1662_v56   ;;  %47 = vst.msk [vmem:[#allocation2 + $0x30] sm:$0xff] %vm40_vm10, %v2505_v18  ;;  %48 = vst.msk [vmem:[#allocation2 + $0x38] sm:$0xff] %vm40_vm10, %v2505_v18 }
  0x67   :  { %49 = vst.msk [vmem:[#allocation2 + $0x40] sm:$0xff] %vm40_vm10, %v2505_v18  ;;  %50 = vst.msk [vmem:[#allocation2 + $0x48] sm:$0xff] %vm40_vm10, %v2505_v18  ;;  %2307 = vmatpush3.bf16.msra.mxu0 %v1160_v0 }
  0x68   :  { %51 = vst.msk [vmem:[#allocation2 + $0x50] sm:$0xff] %vm40_vm10, %v2505_v18  ;;  %52 = vst.msk [vmem:[#allocation2 + $0x58] sm:$0xff] %vm40_vm10, %v2505_v18 }
  0x69   :  { %53 = vst.msk [vmem:[#allocation2 + $0x60] sm:$0xff] %vm40_vm10, %v2505_v18  ;;  %54 = vst.msk [vmem:[#allocation2 + $0x68] sm:$0xff] %vm40_vm10, %v2505_v18 }
  0x6a   :  { %1984 = vmatmul.mubr.msk.bf16.gmra.mrb[36].mxu0 %vm2965_vm8, %v2504_v42  ;;  %1726 = vperm.xlu1 %2411, %v1664_v58   ;;  %v1665_v42 = vld [vmem:[%s3426_s2 + $0x60] sm:$0xff]  ;;  %55 = vst.msk [vmem:[#allocation2 + $0x70] sm:$0xff] %vm40_vm10, %v2505_v18  ;;  %56 = vst.msk [vmem:[#allocation2 + $0x78] sm:$0xff] %vm40_vm10, %v2505_v18  ;;  %vm1492_vm8 = vcmask 130048  }
  0x6b   :  { %1731 = vperm.xlu0 %2410, %v1665_v42   ;;  %v337_v35 = vld [vmem:[#allocation2 + $0x20] sm:$0xff] }
  0x6c   :  { %v338_v44 = vld [vmem:[#allocation2 + $0x28] sm:$0xff] }
  0x6d   :  { %v339_v41 = vld [vmem:[#allocation2 + $0x30] sm:$0xff]  ;;  %v340_v57 = vld [vmem:[#allocation2 + $0x38] sm:$0xff] }
  0x6e   :  { %1736 = vperm.xlu1 %2411, %v1666_v59   ;;  %v341_v3 = vld [vmem:[#allocation2 + $0x40] sm:$0xff]  ;;  %v342_v12 = vld [vmem:[#allocation2 + $0x48] sm:$0xff] }
  0x6f   :  { %1741 = vperm.xlu0 %2410, %v1667_v60  }
  0x72   :  { %1746 = vperm.xlu1 %2411, %v1668_v61  }
  0xf5   :  { %v2157_v5 = vpop.f32.mrb[0].mxu0 }
  0xf6   :  { %v2158_v6 = vpop.f32.mrb[1].mxu0 }
  0xf7   :  { %v3274_v7 = vadd.f32 %v2158_v6, %v2157_v5  ;;  %v2160_v8 = vpop.f32.mrb[2].mxu0  ;;  %v2233_v18 = vpop.f32.mrb[0].mxu1 }
  0xf8   :  { %v2161_v9 = vpop.f32.mrb[3].mxu0  ;;  %v2234_v20 = vpop.f32.mrb[1].mxu1 }
  0xf9   :  { %v3279_v11 = vadd.f32 %v2161_v9, %v2160_v8  ;;  %v2235_v24 = vadd.f32 %v2234_v20, %v2233_v18  ;;  %v2236_v25 = vpop.f32.mrb[2].mxu1 }
  0xfa   :  { %v2237_v26 = vpop.f32.mrb[3].mxu1 }
  0xfb   :  { %v2238_v27 = vadd.f32 %v2237_v26, %v2236_v25 }
  0xfd   :  { %v2163_v13 = vpop.f32.mrb[4].mxu0 }
  0xfe   :  { %v2164_v14 = vpop.f32.mrb[5].mxu0 }
  0xff   :  { %v3284_v15 = vadd.f32 %v2164_v14, %v2163_v13  ;;  %v2166_v16 = vpop.f32.mrb[6].mxu0  ;;  %v2239_v32 = vpop.f32.mrb[4].mxu1 }
 0x100   :  { %v2167_v19 = vpop.f32.mrb[7].mxu0  ;;  %v2240_v37 = vpop.f32.mrb[5].mxu1 }
 0x101   :  { %v3289_v23 = vadd.f32 %v2167_v19, %v2166_v16  ;;  %v2241_v40 = vadd.f32 %v2240_v37, %v2239_v32  ;;  %v2242_v43 = vpop.f32.mrb[6].mxu1 }
 0x102   :  { %v2243_v45 = vpop.f32.mrb[7].mxu1 }
 0x103   :  { %v2244_v33 = vadd.f32 %v2243_v45, %v2242_v43 }
 0x105   :  { %v2169_v28 = vpop.f32.mrb[8].mxu0 }
 0x106   :  { %v2170_v29 = vpop.f32.mrb[9].mxu0 }
 0x107   :  { %v2171_v30 = vadd.f32 %v2170_v29, %v2169_v28  ;;  %v2172_v31 = vpop.f32.mrb[10].mxu0  ;;  %v2245_v21 = vpop.f32.mrb[8].mxu1 }
 0x108   :  { %v2173_v36 = vpop.f32.mrb[11].mxu0  ;;  %v2246_v52 = vpop.f32.mrb[9].mxu1 }
 0x109   :  { %v753_v38 = vadd.f32 %v2235_v24, %v2171_v30  ;;  %v2174_v39 = vadd.f32 %v2173_v36, %v2172_v31  ;;  %v2247_v55 = vadd.f32 %v2246_v52, %v2245_v21  ;;  %v2248_v56 = vpop.f32.mrb[10].mxu1  ;;  %v344_v36 = vld [vmem:[#allocation2 + $0x58] sm:$0xff] }
 0x10a   :  { %v2249_v58 = vpop.f32.mrb[11].mxu1 }
 0x10b   :  { %v803_v46 = vadd.f32 %v753_v38, %v337_v35  ;;  %v756_v47 = vadd.f32 %v2238_v27, %v2174_v39  ;;  %v2250_v60 = vadd.f32 %v2249_v58, %v2248_v56  ;;  %v343_v27 = vld [vmem:[#allocation2 + $0x50] sm:$0xff] }
 0x10d   :  { %820 = vst.msk [vmem:[#allocation2 + $0x20] sm:$0xff] %vm40_vm10, %v803_v46  ;;  %v804_v49 = vadd.f32 %v756_v47, %v338_v44  ;;  %v2175_v48 = vpop.f32.mrb[12].mxu0 }
 0x10e   :  { %v2176_v50 = vpop.f32.mrb[13].mxu0 }
 0x10f   :  { %821 = vst.msk [vmem:[#allocation2 + $0x28] sm:$0xff] %vm40_vm10, %v804_v49  ;;  %v2177_v34 = vadd.f32 %v2176_v50, %v2175_v48  ;;  %v2178_v17 = vpop.f32.mrb[14].mxu0  ;;  %v2251_v2 = vpop.f32.mrb[12].mxu1  ;;  %v345_v49 = vld [vmem:[#allocation2 + $0x60] sm:$0xff] }
 0x110   :  { %v2179_v51 = vpop.f32.mrb[15].mxu0  ;;  %v2252_v5 = vpop.f32.mrb[13].mxu1 }
 0x111   :  { %v761_v53 = vadd.f32 %v2241_v40, %v2177_v34  ;;  %v2180_v54 = vadd.f32 %v2179_v51, %v2178_v17  ;;  %v2253_v9 = vadd.f32 %v2252_v5, %v2251_v2  ;;  %v2254_v10 = vpop.f32.mrb[14].mxu1  ;;  %v346_v51 = vld [vmem:[#allocation2 + $0x68] sm:$0xff] }
 0x112   :  { %v2255_v13 = vpop.f32.mrb[15].mxu1 }
 0x113   :  { %v805_v42 = vadd.f32 %v761_v53, %v339_v41  ;;  %v764_v59 = vadd.f32 %v2244_v33, %v2180_v54  ;;  %v2256_v18 = vadd.f32 %v2255_v13, %v2254_v10 }
 0x115   :  { %822 = vst.msk [vmem:[#allocation2 + $0x30] sm:$0xff] %vm40_vm10, %v805_v42  ;;  %v806_v61 = vadd.f32 %v764_v59, %v340_v57  ;;  %v2181_v62 = vpop.f32.mrb[16].mxu0 }
 0x116   :  { %v2182_v63 = vpop.f32.mrb[17].mxu0 }
 0x117   :  { %823 = vst.msk [vmem:[#allocation2 + $0x38] sm:$0xff] %vm40_vm10, %v806_v61  ;;  %v2183_v0 = vadd.f32 %v2182_v63, %v2181_v62  ;;  %v2184_v1 = vpop.f32.mrb[18].mxu0  ;;  %v2257_v26 = vpop.f32.mrb[16].mxu1 }
 0x118   :  { %v2185_v4 = vpop.f32.mrb[19].mxu0  ;;  %v2258_v29 = vpop.f32.mrb[17].mxu1 }
 0x119   :  { %v769_v6 = vadd.f32 %v2247_v55, %v2183_v0  ;;  %v2186_v8 = vadd.f32 %v2185_v4, %v2184_v1  ;;  %v2259_v32 = vadd.f32 %v2258_v29, %v2257_v26  ;;  %v2260_v35 = vpop.f32.mrb[18].mxu1  ;;  %v348_v0 = vld [vmem:[#allocation2 + $0x78] sm:$0xff]  ;;  %v335_v29 = vld [vmem:[#allocation2 + $0x10] sm:$0xff] }
 0x11a   :  { %v2261_v37 = vpop.f32.mrb[19].mxu1 }
 0x11b   :  { %v807_v14 = vadd.f32 %v769_v6, %v341_v3  ;;  %v772_v16 = vadd.f32 %v2250_v60, %v2186_v8  ;;  %v2262_v40 = vadd.f32 %v2261_v37, %v2260_v35  ;;  %v347_v60 = vld [vmem:[#allocation2 + $0x70] sm:$0xff]  ;;  %v336_v35 = vld [vmem:[#allocation2 + $0x18] sm:$0xff] }
 0x11d   :  { %824 = vst.msk [vmem:[#allocation2 + $0x40] sm:$0xff] %vm40_vm10, %v807_v14  ;;  %v808_v19 = vadd.f32 %v772_v16, %v342_v12  ;;  %v2187_v20 = vpop.f32.mrb[20].mxu0  ;;  %v928_v12 = vpop.permute.xlu1 %927  ;;  %v334_v16 = vld [vmem:[#allocation2 + $0x8] sm:$0xff] }
 0x11e   :  { %v2188_v22 = vpop.f32.mrb[21].mxu0 }
 0x11f   :  { %825 = vst.msk [vmem:[#allocation2 + $0x48] sm:$0xff] %vm40_vm10, %v808_v19  ;;  %v2189_v24 = vadd.f32 %v2188_v22, %v2187_v20  ;;  %v2190_v25 = vpop.f32.mrb[22].mxu0  ;;  %v2263_v33 = vpop.f32.mrb[20].mxu1 }
 0x120   :  { %v2191_v28 = vpop.f32.mrb[23].mxu0  ;;  %v2264_v50 = vpop.f32.mrb[21].mxu1 }
 0x121   :  { %v777_v30 = vadd.f32 %v2253_v9, %v2189_v24  ;;  %v2192_v31 = vadd.f32 %v2191_v28, %v2190_v25  ;;  %v2265_v21 = vadd.f32 %v2264_v50, %v2263_v33  ;;  %v2266_v41 = vpop.f32.mrb[22].mxu1  ;;  %v333_v9 = vld [vmem:[#allocation2] sm:$0xff]  ;;  %v933_v26 = vpop.permute.xlu1 %932 }
 0x122   :  { %v2267_v52 = vpop.f32.mrb[23].mxu1 }
 0x123   :  { %v809_v38 = vadd.f32 %v777_v30, %v343_v27  ;;  %v780_v39 = vadd.f32 %v2256_v18, %v2192_v31  ;;  %v2268_v55 = vadd.f32 %v2267_v52, %v2266_v41  ;;  %v918_v18 = vpop.permute.xlu0 %917 }
 0x125   :  { %826 = vst.msk [vmem:[#allocation2 + $0x50] sm:$0xff] %vm40_vm10, %v809_v38  ;;  %v810_v43 = vadd.f32 %v780_v39, %v344_v36  ;;  %v2193_v44 = vpop.f32.mrb[24].mxu0  ;;  %v943_v38 = vpop.permute.xlu1 %942 }
 0x126   :  { %v2194_v45 = vpop.f32.mrb[25].mxu0 }
 0x127   :  { %827 = vst.msk [vmem:[#allocation2 + $0x58] sm:$0xff] %vm40_vm10, %v810_v43  ;;  %v2195_v46 = vadd.f32 %v2194_v45, %v2193_v44  ;;  %v2196_v47 = vpop.f32.mrb[26].mxu0  ;;  %v923_v31 = vpop.permute.xlu0 %922 }
 0x128   :  { %v2197_v48 = vpop.f32.mrb[27].mxu0 }
 0x129   :  { %v785_v34 = vadd.f32 %v2259_v32, %v2195_v46  ;;  %v2198_v17 = vadd.f32 %v2197_v48, %v2196_v47  ;;  %v953_v47 = vpop.permute.xlu1 %952  ;;  %v903_v48 = vld [vmem:[#allocation2 + $0x20] sm:$0xff] }
 0x12b   :  { %v811_v53 = vadd.f32 %v785_v34, %v345_v49  ;;  %v788_v54 = vadd.f32 %v2262_v40, %v2198_v17  ;;  %v938_v43 = vpop.permute.xlu0 %937 }
 0x12d   :  { %828 = vst.msk [vmem:[#allocation2 + $0x60] sm:$0xff] %vm40_vm10, %v811_v53  ;;  %v812_v56 = vadd.f32 %v788_v54, %v346_v51  ;;  %v2199_v57 = vpop.f32.mrb[28].mxu0  ;;  %v963_v41 = vpop.permute.xlu1 %962  ;;  %v906_v53 = vld [vmem:[#allocation2 + $0x38] sm:$0xff] }
 0x12e   :  { %v2200_v58 = vpop.f32.mrb[29].mxu0 }
 0x12f   :  { %829 = vst.msk [vmem:[#allocation2 + $0x68] sm:$0xff] %vm40_vm10, %v812_v56  ;;  %v2201_v42 = vadd.f32 %v2200_v58, %v2199_v57  ;;  %v2202_v59 = vpop.f32.mrb[30].mxu0  ;;  %v948_v49 = vpop.permute.xlu0 %947  ;;  %v905_v56 = vld [vmem:[#allocation2 + $0x30] sm:$0xff]  ;;  %v1002_v57 = vmul.f32 %v953_v47, %v906_v53  ;;  %v907_v58 = vld [vmem:[#allocation2 + $0x40] sm:$0xff] }
 0x130   :  { %v2203_v61 = vpop.f32.mrb[31].mxu0 }
 0x131   :  { %v793_v62 = vadd.f32 %v2265_v21, %v2201_v42  ;;  %v2204_v63 = vadd.f32 %v2203_v61, %v2202_v59  ;;  %v999_v21 = vmul.f32 %v938_v43, %v903_v48  ;;  %v973_v59 = vpop.permute.xlu1 %972 }
 0x133   :  { %v813_v1 = vadd.f32 %v793_v62, %v347_v60  ;;  %v796_v2 = vadd.f32 %v2268_v55, %v2204_v63  ;;  %v958_v54 = vpop.permute.xlu0 %957  ;;  %v908_v55 = vld [vmem:[#allocation2 + $0x48] sm:$0xff]  ;;  %v1001_v60 = vmul.f32 %v948_v49, %v905_v56 }
 0x134   :  { %v1004_v42 = vmul.f32 %v963_v41, %v908_v55  ;;  %v1003_v61 = vmul.f32 %v958_v54, %v907_v58 }
 0x135   :  { %830 = vst.msk [vmem:[#allocation2 + $0x70] sm:$0xff] %vm40_vm10, %v813_v1  ;;  %v814_v3 = vadd.f32 %v796_v2, %v348_v0  ;;  %v2221_v4 = vpop.f32.mrb[32].mxu0  ;;  %v1014_v63 = vpack.c.bf16 %v1002_v57, %v1001_v60  ;;  %v910_v1 = vld [vmem:[#allocation2 + $0x58] sm:$0xff] }
 0x136   :  { %v2222_v5 = vpop.f32.mrb[33].mxu0  ;;  %v1015_v0 = vpack.c.bf16 %v1004_v42, %v1003_v61  ;;  %v912_v2 = vld [vmem:[#allocation2 + $0x68] sm:$0xff] }
 0x137   :  { %831 = vst.msk [vmem:[#allocation2 + $0x78] sm:$0xff] %vm40_vm10, %v814_v3  ;;  %v2223_v6 = vadd.f32 %v2222_v5, %v2221_v4  ;;  %v2224_v8 = vpop.f32.mrb[34].mxu0  ;;  %v968_v62 = vpop.permute.xlu0 %967  ;;  %v909_v3 = vld [vmem:[#allocation2 + $0x50] sm:$0xff]  ;;  %v1006_v5 = vmul.f32 %v973_v59, %v910_v1 }
 0x138   :  { %v2225_v10 = vpop.f32.mrb[35].mxu0  ;;  %v983_v4 = vpop.permute.xlu1 %982 }
 0x139   :  { %v737_v13 = vadd.f32 %v2223_v6, %v3274_v7  ;;  %v2226_v14 = vadd.f32 %v2225_v10, %v2224_v8  ;;  %v911_v6 = vld [vmem:[#allocation2 + $0x60] sm:$0xff]  ;;  %v1008_v8 = vmul.f32 %v983_v4, %v912_v2  ;;  %v1005_v10 = vmul.f32 %v968_v62, %v909_v3 }
 0x13b   :  { %v799_v19 = vadd.f32 %v737_v13, %v333_v9  ;;  %v740_v20 = vadd.f32 %v2226_v14, %v3279_v11  ;;  %v978_v9 = vpop.permute.xlu0 %977  ;;  %v1016_v13 = vpack.c.bf16 %v1006_v5, %v1005_v10 }
 0x13d   :  { %816 = vst.msk [vmem:[#allocation2] sm:$0xff] %vm40_vm10, %v799_v19  ;;  %v800_v22 = vadd.f32 %v740_v20, %v334_v16  ;;  %v2227_v24 = vpop.f32.mrb[36].mxu0  ;;  %v913_v19 = vld [vmem:[#allocation2 + $0x70] sm:$0xff] }
 0x13e   :  { %v2228_v25 = vpop.f32.mrb[37].mxu0  ;;  %v914_v16 = vld [vmem:[#allocation2 + $0x78] sm:$0xff] }
 0x13f   :  { %817 = vst.msk [vmem:[#allocation2 + $0x8] sm:$0xff] %vm40_vm10, %v800_v22  ;;  %v2229_v27 = vadd.f32 %v2228_v25, %v2227_v24  ;;  %v2230_v28 = vpop.f32.mrb[38].mxu0  ;;  %v988_v22 = vpop.permute.xlu0 %987 }
 0x140   :  { %v2231_v30 = vpop.f32.mrb[39].mxu0  ;;  %v1009_v24 = vmul.f32 %v988_v22, %v913_v19 }
 0x141   :  { %v745_v7 = vadd.f32 %v2229_v27, %v3284_v15  ;;  %v2232_v32 = vadd.f32 %v2231_v30, %v2230_v28  ;;  %v904_v15 = vld [vmem:[#allocation2 + $0x28] sm:$0xff]  ;;  %v2494_v27 = vld [vmem:[%s3429_s7] sm:$0xff]  }
 0x142   :  { %v1000_v50 = vmul.f32 %v943_v38, %v904_v15 }
 0x143   :  { %v801_v36 = vadd.f32 %v745_v7, %v335_v29  ;;  %v748_v11 = vadd.f32 %v2232_v32, %v3289_v23  ;;  %v2414_v29 = vpop.permute.xlu0 %2413 }
 0x144   :  { %v899_v37 = vld [vmem:[#allocation2] sm:$0xff]  ;;  %v1013_v52 = vpack.c.bf16 %v1000_v50, %v999_v21  ;;  %v2416_v7 = vunpack.i.h.bf16 %v2414_v29  ;;  %v2415_v32 = vunpack.i.l.bf16 %v2414_v29 }
 0x145   :  { %818 = vst.msk [vmem:[#allocation2 + $0x10] sm:$0xff] %vm40_vm10, %v801_v36  ;;  %v802_v39 = vadd.f32 %v748_v11, %v336_v35  ;;  %v995_v44 = vmul.f32 %v918_v18, %v899_v37  ;;  %v993_v18 = vpop.permute.xlu1 %992  ;;  %v3328_v35 = vld [vmem:[%s3431_s6] ss:$0 sm:$0xff] }
 0x146   :  { %v900_v40 = vld [vmem:[#allocation2 + $0x8] sm:$0xff]  ;;  %v1010_v20 = vmul.f32 %v993_v18, %v914_v16  ;;  %v1110_v43 = vmul.f32 %v2416_v7, %v3328_v35 }
 0x147   :  { %819 = vst.msk [vmem:[#allocation2 + $0x18] sm:$0xff] %vm40_vm10, %v802_v39  ;;  %v996_v45 = vmul.f32 %v923_v31, %v900_v40  ;;  %v1109_v39 = vmul.f32 %v2415_v32, %v3328_v35  ;;  %v2424_v49 = vpop.permute.xlu0 %2423 }
 0x148   :  { %v1018_v25 = vpack.c.bf16 %v1010_v20, %v1009_v24 }
 0x149   :  { %v1011_v46 = vpack.c.bf16 %v996_v45, %v995_v44  ;;  %v2419_v28 = vpop.permute.xlu1 %2418 }
 0x14a   :  { %v2421_v30 = vunpack.i.h.bf16 %v2419_v28  ;;  %v2420_v31 = vunpack.i.l.bf16 %v2419_v28 }
 0x14b   :  { %2308 = vmatprep.mubr.msk.bf16.mxu0 %vm40_vm10, %v1011_v46  ;;  %v2434_v62 = vpop.permute.xlu0 %2433 }
 0x14c   :  { %v901_v33 = vld [vmem:[#allocation2 + $0x10] sm:$0xff]  ;;  %v1111_v11 = vmul.f32 %v2420_v31, %v3328_v35  ;;  %v1112_v38 = vmul.f32 %v2421_v30, %v3328_v35  ;;  %v2436_v2 = vunpack.i.h.bf16 %v2434_v62  ;;  %v2435_v3 = vunpack.i.l.bf16 %v2434_v62 }
 0x14d   :  { %v997_v34 = vmul.f32 %v928_v12, %v901_v33  ;;  %v1007_v12 = vmul.f32 %v978_v9, %v911_v6  ;;  %v2429_v47 = vpop.permute.xlu1 %2428 }
 0x14e   :  { %v902_v23 = vld [vmem:[#allocation2 + $0x18] sm:$0xff]  ;;  %v2431_v48 = vunpack.i.h.bf16 %v2429_v47  ;;  %v1117_v10 = vmul.f32 %v2435_v3, %v3328_v35 }
 0x14f   :  { %v998_v17 = vmul.f32 %v933_v26, %v902_v23  ;;  %v1017_v14 = vpack.c.bf16 %v1008_v8, %v1007_v12  ;;  %v2493_v26 = vld [vmem:[%s3428_s8 + $0x38] sm:$0xff]   ;;  %v2430_v23 = vunpack.i.l.bf16 %v2429_v47  ;;  %v2444_v24 = vpop.permute.xlu0 %2443 }
 0x150   :  { %2338 = vmatprep.subr.bf16.mxu1 %v2493_v26  ;;  %v1116_v53 = vmul.f32 %v2431_v48, %v3328_v35  ;;  %v2446_v28 = vunpack.i.h.bf16 %v2444_v24  ;;  %v2445_v29 = vunpack.i.l.bf16 %v2444_v24  ;;  %v2499_v48 = vld [vmem:[%s3430_s4 + $0x20] sm:$0xff]  }
 0x151   :  { %v1012_v51 = vpack.c.bf16 %v998_v17, %v997_v34  ;;  %2339 = vmatpush3.bf16.msra.mxu1 %v2493_v26  ;;  %v2426_v34 = vunpack.i.h.bf16 %v2424_v49  ;;  %v2425_v17 = vunpack.i.l.bf16 %v2424_v49  ;;  %v2439_v59 = vpop.permute.xlu1 %2438  ;;  %v2498_v49 = vld [vmem:[%s3430_s4 + $0x18] sm:$0xff]  }
 0x152   :  { %2356 = vmatprep.subr.bf16.mxu1 %v2494_v27 }
 0x153   :  { %2309 = vmatmul.mubr.msk.bf16.vlgmr.msra.gmra.mrb[40].mxu0 %vm40_vm10, %v1012_v51  ;;  %v1115_v51 = vmul.f32 %v2430_v23, %v3328_v35  ;;  %v1113_v54 = vmul.f32 %v2425_v17, %v3328_v35  ;;  %v1114_v56 = vmul.f32 %v2426_v34, %v3328_v35  ;;  %v2500_v23 = vld [vmem:[%s3430_s4 + $0x28] sm:$0xff]   ;;  %v2502_v34 = vld [vmem:[%s3430_s4 + $0x38] sm:$0xff]   ;;  %v1672_v17 = vpop.permute.xlu0 %1671 }
 0x154   :  { %2312 = vmatprep.mubr.msk.bf16.mxu0 %vm40_vm10, %v1013_v52 }
 0x155   :  { %v2449_v19 = vpop.permute.xlu1 %2448 }
 0x156   :  { %v2450_v26 = vunpack.i.l.bf16 %v2449_v19 }
 0x158   :  { %v1123_v7 = vmul.f32 %v2450_v26, %v3328_v35 }
 0x15b   :  { %2313 = vmatmul.mubr.msk.bf16.gmra.mrb[44].mxu0 %vm40_vm10, %v1014_v63  ;;  %v2441_v63 = vunpack.i.h.bf16 %v2439_v59 }
 0x15c   :  { %2316 = vmatprep.mubr.msk.bf16.mxu0 %vm40_vm10, %v1015_v0  ;;  %v2440_v0 = vunpack.i.l.bf16 %v2439_v59 }
 0x15d   :  { %v1120_v9 = vmul.f32 %v2441_v63, %v3328_v35 }
 0x15e   :  { %v1119_v6 = vmul.f32 %v2440_v0, %v3328_v35 }
 0x163   :  { %2317 = vmatmul.mubr.msk.bf16.gmra.mrb[48].mxu0 %vm40_vm10, %v1016_v13  ;;  %v1118_v13 = vmul.f32 %v2436_v2, %v3328_v35 }
 0x164   :  { %2320 = vmatprep.mubr.msk.bf16.mxu0 %vm40_vm10, %v1017_v14 }
 0x16b   :  { %2321 = vmatmul.mubr.msk.bf16.gmra.mrb[52].mxu0 %vm40_vm10, %v1018_v25  ;;  %v2451_v25 = vunpack.i.h.bf16 %v2449_v19 }
 0x226   :  { %v2310_v36 = vpop.f32.mrb[40].mxu0 }
 0x227   :  { %v1196_v37 = vpop.f32.mrb[41].mxu0  ;;  %v1205_v44 = vadd.f32 %v2310_v36, %v1111_v11  ;;  %v1124_v36 = vmul.f32 %v2451_v25, %v3328_v35  ;;  %v1121_v11 = vmul.f32 %v2445_v29, %v3328_v35 }
 0x228   :  { %v2311_v40 = vpop.f32.mrb[42].mxu0  ;;  %v1197_v15 = vadd.f32 %v1196_v37, %v1109_v39 }
 0x229   :  { %v1208_v45 = vadd.f32 %v2311_v40, %v1112_v38  ;;  %v1199_v46 = vpop.f32.mrb[43].mxu0  ;;  %v1122_v38 = vmul.f32 %v2446_v28, %v3328_v35  ;;  %v2496_v35 = vld [vmem:[%s3430_s4 + $0x8] sm:$0xff]  }
 0x22a   :  { %v1200_v33 = vadd.f32 %v1199_v46, %v1110_v43 }
 0x22b   :  { %v1278_v50 = vpack.c.bf16 %v1208_v45, %v1205_v44 }
 0x22c   :  { %v1277_v21 = vpack.c.bf16 %v1200_v33, %v1197_v15  ;;  %v2495_v15 = vld [vmem:[%s3430_s4] sm:$0xff]   ;;  %v2497_v33 = vld [vmem:[%s3430_s4 + $0x10] sm:$0xff]  }
 0x22e   :  { %v2314_v41 = vpop.f32.mrb[44].mxu0  ;;  %2340 = vmatprep.mubr.bf16.mxu1 %v1277_v21  ;;  %v1677_v21 = vpop.permute.xlu1 %1676 }
 0x22f   :  { %v1212_v52 = vpop.f32.mrb[45].mxu0  ;;  %2341 = vmatmul.mubr.bf16.vlgmr.msra.gmra.mrb[24].mxu1 %v1278_v50  ;;  %v1221_v57 = vadd.f32 %v2314_v41, %v1115_v51  ;;  %v2501_v50 = vld [vmem:[%s3430_s4 + $0x30] sm:$0xff]   ;;  %v1682_v41 = vpop.permute.xlu0 %1681 }
 0x230   :  { %v2315_v55 = vpop.f32.mrb[46].mxu0  ;;  %2357 = vmatpush3.bf16.msra.mxu1 %v2494_v27  ;;  %v1213_v60 = vadd.f32 %v1212_v52, %v1113_v54  ;;  %v3381_v52 = vld [vmem:[%s3432_s9] ss:$0 sm:$0xff] }
 0x231   :  { %v1224_v58 = vadd.f32 %v2315_v55, %v1116_v53  ;;  %v1215_v42 = vpop.f32.mrb[47].mxu0 }
 0x232   :  { %v1216_v61 = vadd.f32 %v1215_v42, %v1114_v56  ;;  %v1687_v51 = vpop.permute.xlu1 %1686 }
 0x233   :  { %v1280_v1 = vpack.c.bf16 %v1224_v58, %v1221_v57  ;;  %v1692_v53 = vpop.permute.xlu0 %1691 }
 0x234   :  { %v1279_v4 = vpack.c.bf16 %v1216_v61, %v1213_v60 }
 0x236   :  { %v2318_v5 = vpop.f32.mrb[48].mxu0  ;;  %2344 = vmatprep.mubr.bf16.mxu1 %v1279_v4  ;;  %v1697_v54 = vpop.permute.xlu1 %1696 }
 0x237   :  { %v1228_v8 = vpop.f32.mrb[49].mxu0  ;;  %2345 = vmatmul.mubr.bf16.gmra.mrb[28].mxu1 %v1280_v1  ;;  %v1237_v14 = vadd.f32 %v2318_v5, %v1119_v6  ;;  %v1702_v0 = vpop.permute.xlu0 %1701 }
 0x238   :  { %v2319_v12 = vpop.f32.mrb[50].mxu0  ;;  %v1229_v20 = vadd.f32 %v1228_v8, %v1117_v10 }
 0x239   :  { %v1240_v16 = vadd.f32 %v2319_v12, %v1120_v9  ;;  %v1231_v18 = vpop.f32.mrb[51].mxu0 }
 0x23a   :  { %v1232_v22 = vadd.f32 %v1231_v18, %v1118_v13  ;;  %v1707_v2 = vpop.permute.xlu1 %1706 }
 0x23b   :  { %v1282_v27 = vpack.c.bf16 %v1240_v16, %v1237_v14  ;;  %v1712_v19 = vpop.permute.xlu0 %1711 }
 0x23c   :  { %v1281_v30 = vpack.c.bf16 %v1232_v22, %v1229_v20 }
 0x23e   :  { %v2322_v31 = vpop.f32.mrb[52].mxu0  ;;  %2348 = vmatprep.mubr.bf16.mxu1 %v1281_v30  ;;  %v1717_v25 = vpop.permute.xlu1 %1716 }
 0x23f   :  { %v1244_v32 = vpop.f32.mrb[53].mxu0  ;;  %2349 = vmatmul.mubr.bf16.gmra.mrb[32].mxu1 %v1282_v27  ;;  %v1253_v39 = vadd.f32 %v2322_v31, %v1123_v7 }
 0x240   :  { %v2323_v37 = vpop.f32.mrb[54].mxu0  ;;  %v1245_v44 = vadd.f32 %v1244_v32, %v1121_v11  ;;  %v1722_v11 = vpop.permute.xlu0 %1721 }
 0x241   :  { %v1256_v40 = vadd.f32 %v2323_v37, %v1124_v36  ;;  %v1247_v43 = vpop.f32.mrb[55].mxu0 }
 0x242   :  { %v1248_v45 = vadd.f32 %v1247_v43, %v1122_v38 }
 0x243   :  { %v1284_v46 = vpack.c.bf16 %v1256_v40, %v1253_v39  ;;  %v1727_v40 = vpop.permute.xlu1 %1726 }
 0x244   :  { %v1283_v47 = vpack.c.bf16 %v1248_v45, %v1245_v44 }
 0x246   :  { %2352 = vmatprep.mubr.bf16.mxu1 %v1283_v47 }
 0x247   :  { %2353 = vmatmul.mubr.bf16.gmra.mrb[36].mxu1 %v1284_v46 }
 0x248   :  { %2358 = vmatprep.mubr.msk.bf16.mxu1 %vm1492_vm8, %v2495_v15 }
 0x24f   :  { %2359 = vmatmul.mubr.msk.bf16.vlgmr.msra.gmra.mrb[24].mxu1 %vm1492_vm8, %v2496_v35 }
 0x250   :  { %2362 = vmatprep.mubr.msk.bf16.mxu1 %vm1492_vm8, %v2497_v33 }
 0x257   :  { %2363 = vmatmul.mubr.msk.bf16.gmra.mrb[28].mxu1 %vm1492_vm8, %v2498_v49 }
 0x258   :  { %2366 = vmatprep.mubr.msk.bf16.mxu1 %vm1492_vm8, %v2499_v48 }
 0x25f   :  { %2367 = vmatmul.mubr.msk.bf16.gmra.mrb[32].mxu1 %vm1492_vm8, %v2500_v23  ;;  %v1732_v23 = vpop.permute.xlu0 %1731 }
 0x260   :  { %2370 = vmatprep.mubr.msk.bf16.mxu1 %vm1492_vm8, %v2501_v50 }
 0x267   :  { %2371 = vmatmul.mubr.msk.bf16.gmra.mrb[36].mxu1 %vm1492_vm8, %v2502_v34 }
 0x322   :  { %v2360_v55 = vpop.f32.mrb[24].mxu1 }
 0x323   :  { %v1623_v56 = vadd.f32 %v2360_v55, %v3381_v52  ;;  %v1551_v57 = vpop.f32.mrb[25].mxu1 }
 0x324   :  { %v1621_v58 = vadd.f32 %v3381_v52, %v1551_v57  ;;  %v2361_v42 = vpop.f32.mrb[26].mxu1 }
 0x325   :  { %v1639_v59 = vmax.f32 %v1623_v56, 0.0  ;;  %v1624_v60 = vadd.f32 %v2361_v42, %v3381_v52  ;;  %v1554_v61 = vpop.f32.mrb[27].mxu1 }
 0x326   :  { %v1637_v62 = vmax.f32 %v1621_v58, 0.0  ;;  %v1622_v63 = vadd.f32 %v3381_v52, %v1554_v61 }
 0x327   :  { %v1640_v1 = vmax.f32 %v1624_v60, 0.0  ;;  %v1751_v4 = vmul.f32 %v1682_v41, %v1639_v59 }
 0x328   :  { %v1638_v3 = vmax.f32 %v1622_v63, 0.0  ;;  %v1749_v6 = vmul.f32 %v1672_v17, %v1637_v62  ;;  %v1737_v17 = vpop.permute.xlu1 %1736 }
 0x329   :  { %v1752_v5 = vmul.f32 %v1687_v51, %v1640_v1 }
 0x32a   :  { %v1750_v8 = vmul.f32 %v1677_v21, %v1638_v3  ;;  %v2364_v9 = vpop.f32.mrb[28].mxu1 }
 0x32b   :  { %v2102_v10 = vpack.c.bf16 %v1752_v5, %v1751_v4  ;;  %v1627_v12 = vadd.f32 %v2364_v9, %v3381_v52  ;;  %v1567_v13 = vpop.f32.mrb[29].mxu1 }
 0x32c   :  { %v2097_v14 = vpack.c.bf16 %v1750_v8, %v1749_v6  ;;  %v1625_v16 = vadd.f32 %v3381_v52, %v1567_v13  ;;  %v2365_v18 = vpop.f32.mrb[30].mxu1  ;;  %v1747_v1 = vpop.permute.xlu1 %1746 }
 0x32d   :  { %2134 = vst [vmem:[%s3433_s10 + $0x8] sm:$0xff] %v2102_v10   ;;  %v1643_v20 = vmax.f32 %v1627_v12, 0.0  ;;  %v1628_v22 = vadd.f32 %v2365_v18, %v3381_v52  ;;  %v1570_v24 = vpop.f32.mrb[31].mxu1 }
 0x32e   :  { %2098 = vst [vmem:[%s3433_s10] sm:$0xff] %v2097_v14   ;;  %v1641_v26 = vmax.f32 %v1625_v16, 0.0  ;;  %v1626_v27 = vadd.f32 %v3381_v52, %v1570_v24 }
 0x32f   :  { %v1644_v28 = vmax.f32 %v1628_v22, 0.0  ;;  %v1755_v30 = vmul.f32 %v1702_v0, %v1643_v20  ;;  %v1742_v0 = vpop.permute.xlu0 %1741 }
 0x330   :  { %v1642_v29 = vmax.f32 %v1626_v27, 0.0  ;;  %v1753_v7 = vmul.f32 %v1692_v53, %v1641_v26 }
 0x331   :  { %v1756_v31 = vmul.f32 %v1707_v2, %v1644_v28 }
 0x332   :  { %v1754_v32 = vmul.f32 %v1697_v54, %v1642_v29  ;;  %v2368_v36 = vpop.f32.mrb[32].mxu1 }
 0x333   :  { %v2112_v37 = vpack.c.bf16 %v1756_v31, %v1755_v30  ;;  %v1631_v38 = vadd.f32 %v2368_v36, %v3381_v52  ;;  %v1583_v39 = vpop.f32.mrb[33].mxu1 }
 0x334   :  { %v2107_v43 = vpack.c.bf16 %v1754_v32, %v1753_v7  ;;  %v1629_v44 = vadd.f32 %v3381_v52, %v1583_v39  ;;  %v2369_v45 = vpop.f32.mrb[34].mxu1 }
 0x335   :  { %2136 = vst [vmem:[%s3433_s10 + $0x18] sm:$0xff] %v2112_v37   ;;  %v1647_v46 = vmax.f32 %v1631_v38, 0.0  ;;  %v1632_v47 = vadd.f32 %v2369_v45, %v3381_v52  ;;  %v1586_v15 = vpop.f32.mrb[35].mxu1 }
 0x336   :  { %2135 = vst [vmem:[%s3433_s10 + $0x10] sm:$0xff] %v2107_v43   ;;  %v1645_v35 = vmax.f32 %v1629_v44, 0.0  ;;  %v1630_v33 = vadd.f32 %v3381_v52, %v1586_v15 }
 0x337   :  { %v1648_v49 = vmax.f32 %v1632_v47, 0.0  ;;  %v1759_v50 = vmul.f32 %v1722_v11, %v1647_v46 }
 0x338   :  { %v1646_v48 = vmax.f32 %v1630_v33, 0.0  ;;  %v1757_v21 = vmul.f32 %v1712_v19, %v1645_v35 }
 0x339   :  { %v1760_v34 = vmul.f32 %v1727_v40, %v1648_v49 }
 0x33a   :  { %v1758_v41 = vmul.f32 %v1717_v25, %v1646_v48  ;;  %v2372_v51 = vpop.f32.mrb[36].mxu1 }
 0x33b   :  { %v2122_v53 = vpack.c.bf16 %v1760_v34, %v1759_v50  ;;  %v1635_v54 = vadd.f32 %v2372_v51, %v3381_v52  ;;  %v1599_v55 = vpop.f32.mrb[37].mxu1 }
 0x33c   :  { %v2117_v56 = vpack.c.bf16 %v1758_v41, %v1757_v21  ;;  %v1633_v57 = vadd.f32 %v3381_v52, %v1599_v55  ;;  %v2373_v58 = vpop.f32.mrb[38].mxu1 }
 0x33d   :  { %2138 = vst [vmem:[%s3433_s10 + $0x28] sm:$0xff] %v2122_v53   ;;  %v1651_v42 = vmax.f32 %v1635_v54, 0.0  ;;  %v1636_v59 = vadd.f32 %v2373_v58, %v3381_v52  ;;  %v1602_v60 = vpop.f32.mrb[39].mxu1 }
 0x33e   :  { %2137 = vst [vmem:[%s3433_s10 + $0x20] sm:$0xff] %v2117_v56   ;;  %v1649_v61 = vmax.f32 %v1633_v57, 0.0  ;;  %v1634_v62 = vadd.f32 %v3381_v52, %v1602_v60 }
 0x33f   :  { %v1652_v63 = vmax.f32 %v1636_v59, 0.0  ;;  %v1763_v3 = vmul.f32 %v1742_v0, %v1651_v42 }
 0x340   :  { %v1650_v2 = vmax.f32 %v1634_v62, 0.0  ;;  %v1761_v5 = vmul.f32 %v1732_v23, %v1649_v61 }
 0x341   :  { %v1764_v4 = vmul.f32 %v1747_v1, %v1652_v63 }
 0x342   :  { %v1762_v6 = vmul.f32 %v1737_v17, %v1650_v2 }
 0x343   :  { %v2132_v8 = vpack.c.bf16 %v1764_v4, %v1763_v3 }
 0x344   :  { %v2127_v9 = vpack.c.bf16 %v1762_v6, %v1761_v5 }
 0x345   :  { %2140 = vst [vmem:[%s3433_s10 + $0x38] sm:$0xff] %v2132_v8  }
 0x346   :  { %2139 = vst [vmem:[%s3433_s10 + $0x30] sm:$0xff] %v2127_v9  }

// kernel: model_forward.4
= control target key start
LH: loop header
LB: loop body
LE: loop exit
PB: predicated region body
PF: predicated region fallthrough
CT: control target
= control target key end

     0   :  { %v74_v7 = vlaneseq  ;;  %v2765_v16 = vmov 0   ;;  %v2766_v30 = vmov 1.0|1.0   ;;  %v3959_v63 = vmov 0  ;;  %s3932_s3 = inlined_call_operand.vmem [shape: bf16[512,136], index: 3, kind: input, shape index: {}]   ;;  %s3933_s0 = inlined_call_operand.vmem [shape: s32[1,512], index: 0, kind: input, shape index: {}]   ;;  %s3934_s1 = inlined_call_operand.vmem [shape: f32[128,1], index: 1, kind: input, shape index: {}]   ;;  %s3935_s2 = inlined_call_operand.vmem [shape: f32[128,1], index: 2, kind: input, shape index: {}]   ;;  %s3936_s5 = inlined_call_operand.vmem [shape: bf16[136,32], index: 5, kind: input, shape index: {}]   ;;  %s3937_s8 = inlined_call_operand.vmem [shape: bf16[32,32], index: 8, kind: input, shape index: {}]   ;;  %s3938_s7 = inlined_call_operand.vmem [shape: bf16[128,32], index: 7, kind: input, shape index: {}]   ;;  %s3939_s4 = inlined_call_operand.vmem [shape: bf16[128,128], index: 4, kind: input, shape index: {}]   ;;  %s3940_s6 = inlined_call_operand.vmem [shape: f32[1,32], index: 6, kind: input, shape index: {}]   ;;  %s3941_s9 = inlined_call_operand.vmem [shape: f32[1,32], index: 9, kind: input, shape index: {}]   ;;  %s3942_s10 = inlined_call_operand.vmem [shape: bf16[128,32], index: 10, kind: output, shape index: {}]  }
   0x1   :  { %v2642_v0 = vld [vmem:[%s3932_s3 + $0x4] ss:$8 sps:$4 sm:$0xff]   ;;  %v2644_v1 = vld [vmem:[%s3932_s3] ss:$8 sps:$4 sm:$0xff]   ;;  %v2645_v2 = vld [vmem:[%s3932_s3 + $0x14] ss:$8 sps:$4 sm:$0xff]   ;;  %2600 = vset.pattern.permute.xlu0 %v2765_v16  ;;  %2601 = vset.pattern.permute.xlu1 %v2765_v16 }
   0x2   :  { %765 = vmatprep.subr.bf16.mxu0 %v2642_v0  ;;  %v2647_v3 = vld [vmem:[%s3932_s3 + $0x10] ss:$8 sps:$4 sm:$0xff]   ;;  %v2648_v4 = vld [vmem:[%s3932_s3 + $0x24] ss:$8 sps:$4 sm:$0xff]   ;;  %v2650_v5 = vld [vmem:[%s3932_s3 + $0x20] ss:$8 sps:$4 sm:$0xff]   ;;  %1482 = vmatprep.subr.bf16.mxu1 %v2765_v16 }
   0x3   :  { %766 = vmatpush1.bf16.msra.mxu0 %v2644_v1  ;;  %v2651_v6 = vld [vmem:[%s3932_s3 + $0x34] ss:$8 sps:$4 sm:$0xff]   ;;  %v2653_v8 = vld [vmem:[%s3932_s3 + $0x30] ss:$8 sps:$4 sm:$0xff]   ;;  %v2654_v9 = vld [vmem:[%s3932_s3 + $0x44] ss:$8 sps:$4 sm:$0xff]  }
   0x4   :  { %767 = vmatprep.subr.bf16.mxu0 %v2645_v2  ;;  %v2850_v10 = vshrl.u32 %v74_v7, 7  ;;  %v2656_v11 = vld [vmem:[%s3932_s3 + $0x40] ss:$8 sps:$4 sm:$0xff]   ;;  %v2657_v12 = vld [vmem:[%s3932_s3 + $0x54] ss:$8 sps:$4 sm:$0xff]   ;;  %v3963_v2 = vmov 0 }
   0x5   :  { %v2659_v17 = vld [vmem:[%s3932_s3 + $0x50] ss:$8 sps:$4 sm:$0xff]   ;;  %v2660_v18 = vld [vmem:[%s3932_s3 + $0x64] ss:$8 sps:$4 sm:$0xff]   ;;  %v2876_v20 = vld [vmem:[%s3933_s0] sm:$0xf] }
   0x6   :  { %v115_v13 = vsub.s32 1, %v2850_v10  ;;  %v123_v14 = vsub.s32 3, %v2850_v10  ;;  %v119_v15 = vsub.s32 2, %v2850_v10  ;;  %v2871_v19 = vadd.s32 8, %v2850_v10  ;;  %v2662_v24 = vld [vmem:[%s3932_s3 + $0x60] ss:$8 sps:$4 sm:$0xff]  }
   0x7   :  { %768 = vmatpush1.bf16.msra.mxu0 %v2647_v3  ;;  %v2663_v25 = vld [vmem:[%s3932_s3 + $0x74] ss:$8 sps:$4 sm:$0xff]   ;;  %v2898_v26 = vadd.s32 64, %v2850_v10  ;;  %v2901_v27 = vadd.s32 72, %v2850_v10  ;;  %v2904_v28 = vadd.s32 80, %v2850_v10  ;;  %v2907_v29 = vadd.s32 88, %v2850_v10 }
   0x8   :  { %769 = vmatprep.subr.bf16.mxu0 %v2648_v4  ;;  %v2879_v21 = vrot.slane %v2876_v20, %v115_v13  ;;  %v2882_v22 = vrot.slane %v2876_v20, %v123_v14  ;;  %v2885_v23 = vrot.slane %v2876_v20, %v119_v15  ;;  %v2911_v31 = vadd.s32 96, %v2850_v10  ;;  %v2665_v33 = vld [vmem:[%s3932_s3 + $0x70] ss:$8 sps:$4 sm:$0xff]   ;;  %v2666_v36 = vld [vmem:[%s3932_s3 + $0x84] ss:$8 sps:$4 sm:$0xff]  }
   0x9   :  { %v2914_v32 = vadd.s32 104, %v2850_v10  ;;  %v2920_v34 = vadd.s32 112, %v2850_v10  ;;  %v2923_v35 = vadd.s32 120, %v2850_v10  ;;  %v2933_v37 = vadd.s32 16, %v2850_v10  ;;  %v2668_v41 = vld [vmem:[%s3932_s3 + $0x80] ss:$8 sps:$4 sm:$0xff]  }
   0xa   :  { %vm126_vm0 = vcmp.eq.s32.totalorder %v2850_v10, %v2879_v21  ;;  %vm130_vm1 = vcmp.eq.s32.totalorder %v2871_v19, %v2879_v21  ;;  %vm158_vm3 = vcmp.eq.s32.totalorder %v2898_v26, %v2879_v21  ;;  %vm162_vm4 = vcmp.eq.s32.totalorder %v2901_v27, %v2879_v21  ;;  %v2669_v44 = vld [vmem:[%s3932_s3 + $0x94] ss:$8 sps:$4 sm:$0xff]   ;;  %v2671_v45 = vld [vmem:[%s3932_s3 + $0x90] ss:$8 sps:$4 sm:$0xff]   ;;  %v2672_v47 = vld [vmem:[%s3932_s3 + $0xa4] ss:$8 sps:$4 sm:$0xff]  }
   0xb   :  { %770 = vmatpush1.bf16.msra.mxu0 %v2650_v5  ;;  %vm2314_vm2 = vmpackc.low %vm130_vm1, %vm126_vm0  ;;  %v2936_v38 = vadd.s32 24, %v2850_v10  ;;  %vm166_vm5 = vcmp.eq.s32.totalorder %v2904_v28, %v2879_v21  ;;  %vm170_vm6 = vcmp.eq.s32.totalorder %v2907_v29, %v2879_v21  ;;  %v2943_v39 = vadd.s32 32, %v2850_v10  ;;  %v2674_v49 = vld [vmem:[%s3932_s3 + $0xa0] ss:$8 sps:$4 sm:$0xff]   ;;  %v2675_v50 = vld [vmem:[%s3932_s3 + $0xb4] ss:$8 sps:$4 sm:$0xff]  }
   0xc   :  { %771 = vmatprep.subr.bf16.mxu0 %v2651_v6  ;;  %2315 = vmatprep.mubr.msk.bf16.mxu0 %vm2314_vm2, %v2766_v30  ;;  %v2946_v40 = vadd.s32 40, %v2850_v10  ;;  %vm174_vm7 = vcmp.eq.s32.totalorder %v2911_v31, %v2879_v21  ;;  %vm178_vm8 = vcmp.eq.s32.totalorder %v2914_v32, %v2879_v21  ;;  %v2956_v42 = vadd.s32 48, %v2850_v10  ;;  %vm3001_vm2 = vmpackc.low %vm162_vm4, %vm158_vm3  ;;  %v2677_v52 = vld [vmem:[%s3932_s3 + $0xb0] ss:$8 sps:$4 sm:$0xff]   ;;  %v2678_v53 = vld [vmem:[%s3932_s3 + $0xc4] ss:$8 sps:$4 sm:$0xff]  }
   0xd   :  { %v2959_v43 = vadd.s32 56, %v2850_v10  ;;  %vm182_vm9 = vcmp.eq.s32.totalorder %v2920_v34, %v2879_v21  ;;  %vm186_vm10 = vcmp.eq.s32.totalorder %v2923_v35, %v2879_v21  ;;  %vm128_vm11 = vcmp.eq.s32.totalorder %v2850_v10, %v2882_v22  ;;  %vm3038_vm15 = vmpackc.low %vm170_vm6, %vm166_vm5  ;;  %v2680_v56 = vld [vmem:[%s3932_s3 + $0xc0] ss:$8 sps:$4 sm:$0xff]   ;;  %v2681_v57 = vld [vmem:[%s3932_s3 + $0xd4] ss:$8 sps:$4 sm:$0xff]  }
   0xe   :  { %vm132_vm12 = vcmp.eq.s32.totalorder %v2871_v19, %v2882_v22  ;;  %vm3054_vm5 = vmpackc.low %vm178_vm8, %vm174_vm7  ;;  %v111_v54 = vsub.s32 0, %v2850_v10  ;;  %v3105_v60 = vld [vmem:[%s3934_s1] sm:$0xff]  ;;  %vm3954_vm7 = vcmp.eq.s32.totalorder %v2871_v19, %v2885_v23  ;;  %v3121_v62 = vld [vmem:[%s3934_s1 + $0x10] sm:$0xff]  ;;  %v3967_v5 = vmov 0 }
   0xf   :  { %772 = vmatpush1.bf16.msra.mxu0 %v2653_v8  ;;  %vm3079_vm8 = vmpackc.low %vm186_vm10, %vm182_vm9  ;;  %vm3953_vm10 = vcmp.eq.s32.totalorder %v2850_v10, %v2885_v23  ;;  %1157 = vperm.xlu0 %2600, %v3105_v60   ;;  %v3136_v0 = vld [vmem:[%s3934_s1 + $0x8] sm:$0xff]  ;;  %v2683_v1 = vld [vmem:[%s3932_s3 + $0xd0] ss:$8 sps:$4 sm:$0xff]   ;;  %vm3969_vm13 = vcmp.eq.s32.totalorder %v2943_v39, %v2885_v23  ;;  %vm3970_vm0 = vcmp.eq.s32.totalorder %v2946_v40, %v2885_v23  ;;  %v3971_v6 = vmov 0 }
  0x10   :  { %773 = vmatprep.subr.bf16.mxu0 %v2654_v9  ;;  %v3090_v58 = vrot.slane %v2876_v20, %v111_v54  ;;  %vm3098_vm9 = vmpackc.low %vm132_vm12, %vm128_vm11  ;;  %vm3957_vm11 = vcmp.eq.s32.totalorder %v2933_v37, %v2882_v22  ;;  %vm3958_vm12 = vcmp.eq.s32.totalorder %v2936_v38, %v2882_v22  ;;  %1167 = vperm.xlu1 %2601, %v3121_v62   ;;  %v3157_v3 = vld [vmem:[%s3934_s1 + $0x18] sm:$0xff]  ;;  %v2684_v4 = vld [vmem:[%s3932_s3 + $0xe4] ss:$8 sps:$4 sm:$0xff]   ;;  %v3975_v7 = vmov 0 }
  0x11   :  { %vm3113_vm1 = vmpackc.low %vm3954_vm7, %vm3953_vm10  ;;  %vm3961_vm10 = vcmp.eq.s32.totalorder %v2933_v37, %v2885_v23  ;;  %v3200_v8 = vld [vmem:[%s3934_s1 + $0x20] sm:$0xff]  ;;  %v2687_v13 = vld [vmem:[%s3932_s3 + $0xf4] ss:$8 sps:$4 sm:$0xff]   ;;  %v3985_v14 = vmov 0  ;;  %v3989_v15 = vmov 0 }
  0x12   :  { %vm3129_vm3 = vmpackc.low %vm3958_vm12, %vm3957_vm11  ;;  %vm3962_vm11 = vcmp.eq.s32.totalorder %v2936_v38, %v2885_v23  ;;  %vm125_vm7 = vcmp.eq.s32.totalorder %v2850_v10, %v3090_v58  ;;  %vm129_vm6 = vcmp.eq.s32.totalorder %v2871_v19, %v3090_v58  ;;  %v2686_v9 = vld [vmem:[%s3932_s3 + $0xe0] ss:$8 sps:$4 sm:$0xff]   ;;  %v2689_v19 = vld [vmem:[%s3932_s3 + $0xf0] ss:$8 sps:$4 sm:$0xff]  }
  0x13   :  { %774 = vmatpush1.bf16.msra.mxu0 %v2656_v11  ;;  %v3960_v63 = vsel %vm3129_vm3, 4294967295, %v3959_v63  ;;  %vm3150_vm12 = vmpackc.low %vm3962_vm11, %vm3961_vm10  ;;  %vm3965_vm10 = vcmp.eq.s32.totalorder %v2943_v39, %v2882_v22  ;;  %vm3966_vm11 = vcmp.eq.s32.totalorder %v2946_v40, %v2882_v22  ;;  %1162 = vperm.xlu0 %2600, %v3136_v0   ;;  %v3981_v11 = vmov 0  ;;  %v3275_v20 = vld [vmem:[%s3934_s1 + $0x38] sm:$0xff]  ;;  %v3385_v54 = vld [vmem:[%s3934_s1 + $0x60] sm:$0xff] }
  0x14   :  { %775 = vmatprep.subr.bf16.mxu0 %v2657_v12  ;;  %v3964_v2 = vsel %vm3150_vm12, 4294967295, %v3963_v2  ;;  %vm3172_vm14 = vmpackc.low %vm3966_vm11, %vm3965_vm10  ;;  %vm3973_vm12 = vcmp.eq.s32.totalorder %v2956_v42, %v2882_v22  ;;  %vm3974_vm10 = vcmp.eq.s32.totalorder %v2959_v43, %v2882_v22  ;;  %1172 = vperm.xlu1 %2601, %v3157_v3   ;;  %v3223_v12 = vld [vmem:[%s3934_s1 + $0x28] sm:$0xff]  ;;  %v1989_v46 = vld [vmem:[%s3935_s2] sm:$0xff] }
  0x15   :  { %v3968_v5 = vsel %vm3172_vm14, 4294967295, %v3967_v5  ;;  %vm3182_vm4 = vmpackc.low %vm3970_vm0, %vm3969_vm13  ;;  %vm3979_vm0 = vcmp.eq.s32.totalorder %v2956_v42, %v2885_v23  ;;  %vm4004_vm14 = vcmp.eq.s32.totalorder %v2914_v32, %v2885_v23  ;;  %v2704_v10 = vld [vmem:[%s3932_s3 + $0x144] ss:$8 sps:$4 sm:$0xff]   ;;  %v2720_v48 = vld [vmem:[%s3932_s3 + $0x1a0] ss:$8 sps:$4 sm:$0xff]  }
  0x16   :  { %v3972_v6 = vsel %vm3182_vm4, 4294967295, %v3971_v6  ;;  %vm3193_vm11 = vmpackc.low %vm3974_vm10, %vm3973_vm12  ;;  %vm3980_vm12 = vcmp.eq.s32.totalorder %v2959_v43, %v2885_v23  ;;  %v2741_v51 = vld [vmem:[%s3936_s5 + $0x18] sm:$0xff]   ;;  %v2001_v55 = vld [vmem:[%s3935_s2 + $0x60] sm:$0xff] }
  0x17   :  { %776 = vmatpush1.bf16.msra.mxu0 %v2659_v17  ;;  %v3976_v7 = vsel %vm3193_vm11, 4294967295, %v3975_v7  ;;  %vm3206_vm13 = vmpackc.low %vm129_vm6, %vm125_vm7  ;;  %vm3983_vm6 = vcmp.eq.s32.totalorder %v2898_v26, %v2882_v22  ;;  %vm3984_vm7 = vcmp.eq.s32.totalorder %v2901_v27, %v2882_v22  ;;  %1177 = vperm.xlu0 %2600, %v3200_v8   ;;  %v3252_v17 = vld [vmem:[%s3934_s1 + $0x30] sm:$0xff]  ;;  %v2743_v59 = vld [vmem:[%s3936_s5 + $0x28] sm:$0xff]  }
  0x18   :  { %777 = vmatprep.subr.bf16.mxu0 %v2660_v18  ;;  %vm3216_vm10 = vmpackc.low %vm3980_vm12, %vm3979_vm0  ;;  %vm3987_vm12 = vcmp.eq.s32.totalorder %v2898_v26, %v2885_v23  ;;  %1182 = vperm.xlu1 %2601, %v3223_v12   ;;  %v3993_v18 = vmov 0  ;;  %v2744_v61 = vld [vmem:[%s3936_s5 + $0x30] sm:$0xff]  }
  0x19   :  { %v3982_v11 = vsel %vm3216_vm10, 4294967295, %v3981_v11  ;;  %vm3234_vm0 = vmpackc.low %vm3984_vm7, %vm3983_vm6  ;;  %vm3988_vm10 = vcmp.eq.s32.totalorder %v2901_v27, %v2885_v23  ;;  %vm3991_vm6 = vcmp.eq.s32.totalorder %v2904_v28, %v2882_v22  ;;  %vm3992_vm7 = vcmp.eq.s32.totalorder %v2907_v29, %v2882_v22 }
  0x1a   :  { %v3986_v14 = vsel %vm3234_vm0, 4294967295, %v3985_v14  ;;  %vm3245_vm11 = vmpackc.low %vm3988_vm10, %vm3987_vm12  ;;  %vm187_vm12 = vcmp.eq.s32.totalorder %v2923_v35, %v2885_v23 }
  0x1b   :  { %778 = vmatpush1.bf16.msra.mxu0 %v2662_v24  ;;  %v3990_v15 = vsel %vm3245_vm11, 4294967295, %v3989_v15  ;;  %vm3261_vm0 = vmpackc.low %vm3992_vm7, %vm3991_vm6  ;;  %vm3995_vm6 = vcmp.eq.s32.totalorder %v2904_v28, %v2885_v23  ;;  %vm3996_vm7 = vcmp.eq.s32.totalorder %v2907_v29, %v2885_v23  ;;  %v3997_v24 = vmov 0  ;;  %1187 = vperm.xlu0 %2600, %v3252_v17  }
  0x1c   :  { %779 = vmatprep.subr.bf16.mxu0 %v2663_v25  ;;  %v3994_v18 = vsel %vm3261_vm0, 4294967295, %v3993_v18  ;;  %vm3283_vm10 = vmpackc.low %vm3996_vm7, %vm3995_vm6  ;;  %v2692_v25 = vld [vmem:[%s3932_s3 + $0x104] ss:$8 sps:$4 sm:$0xff]   ;;  %vm3999_vm0 = vcmp.eq.s32.totalorder %v2911_v31, %v2882_v22  ;;  %vm4000_vm11 = vcmp.eq.s32.totalorder %v2914_v32, %v2882_v22  ;;  %vm134_vm6 = vcmp.eq.s32.totalorder %v2933_v37, %v2879_v21  ;;  %1192 = vperm.xlu1 %2601, %v3275_v20  }
  0x1d   :  { %v3998_v24 = vsel %vm3283_vm10, 4294967295, %v3997_v24  ;;  %vm3298_vm4 = vmpackc.low %vm4000_vm11, %vm3999_vm0  ;;  %vm138_vm7 = vcmp.eq.s32.totalorder %v2936_v38, %v2879_v21  ;;  %vm4003_vm10 = vcmp.eq.s32.totalorder %v2911_v31, %v2885_v23  ;;  %vm4007_vm11 = vcmp.eq.s32.totalorder %v2920_v34, %v2882_v22 }
  0x1e   :  { %vm3313_vm3 = vmpackc.low %vm4004_vm14, %vm4003_vm10  ;;  %vm4008_vm0 = vcmp.eq.s32.totalorder %v2923_v35, %v2882_v22  ;;  %vm4011_vm14 = vcmp.eq.s32.totalorder %v2920_v34, %v2885_v23  ;;  %v2695_v22 = vld [vmem:[%s3932_s3 + $0x114] ss:$8 sps:$4 sm:$0xff]  }
  0x1f   :  { %780 = vmatpush1.bf16.msra.mxu0 %v2665_v33  ;;  %v4001_v33 = vmov 0  ;;  %vm3344_vm10 = vmpackc.low %vm187_vm12, %vm4011_vm14  ;;  %v3358_v23 = vld [vmem:[%s3934_s1 + $0x50] sm:$0xff]  ;;  %vm137_vm12 = vcmp.eq.s32.totalorder %v2936_v38, %v3090_v58  ;;  %vm1075_vm14 = vcmp.gt.f32.partialorder %v3105_v60, 0.0  ;;  %v3396_v38 = vld [vmem:[%s3934_s1 + $0x68] sm:$0xff]  ;;  %v2767_v60 = vmov 0.0  }
  0x20   :  { %781 = vmatprep.subr.bf16.mxu0 %v2666_v36  ;;  %v4002_v33 = vsel %vm3298_vm4, 4294967295, %v4001_v33  ;;  %vm3329_vm4 = vmpackc.low %vm4008_vm0, %vm4007_vm11 }
  0x21   :  { %vm2318_vm11 = vmpackc.low %vm138_vm7, %vm134_vm6  ;;  %vm142_vm6 = vcmp.eq.s32.totalorder %v2943_v39, %v2879_v21  ;;  %vm146_vm7 = vcmp.eq.s32.totalorder %v2946_v40, %v2879_v21 }
  0x23   :  { %782 = vmatpush1.bf16.msra.mxu0 %v2668_v41  ;;  %v3320_v41 = vld [vmem:[%s3934_s1 + $0x40] sm:$0xff] }
  0x24   :  { %783 = vmatprep.subr.bf16.mxu0 %v2669_v44  ;;  %v4009_v44 = vmov 0  ;;  %1197 = vperm.xlu0 %2600, %v3320_v41  }
  0x25   :  { %v4010_v44 = vsel %vm3329_vm4, 4294967295, %v4009_v44 }
  0x27   :  { %784 = vmatpush1.bf16.msra.mxu0 %v2671_v45  ;;  %v2690_v45 = vld [vmem:[%s3932_s3 + $0x100] ss:$8 sps:$4 sm:$0xff]  }
  0x28   :  { %785 = vmatprep.subr.bf16.mxu0 %v2672_v47  ;;  %v3339_v47 = vld [vmem:[%s3934_s1 + $0x48] sm:$0xff]  ;;  %1207 = vperm.xlu0 %2600, %v3358_v23  }
  0x29   :  { %1202 = vperm.xlu1 %2601, %v3339_v47  }
  0x2b   :  { %786 = vmatpush1.bf16.msra.mxu0 %v2674_v49  ;;  %v4012_v49 = vmov 0 }
  0x2c   :  { %787 = vmatprep.subr.bf16.mxu0 %v2675_v50  ;;  %v4013_v49 = vsel %vm3344_vm10, 4294967295, %v4012_v49  ;;  %v2693_v50 = vld [vmem:[%s3932_s3 + $0x110] ss:$8 sps:$4 sm:$0xff]   ;;  %vm2322_vm10 = vmpackc.low %vm146_vm7, %vm142_vm6  ;;  %1217 = vperm.xlu0 %2600, %v3385_v54   ;;  %vm1079_vm6 = vcmp.gt.f32.partialorder %v3200_v8, 0.0  ;;  %vm1080_vm7 = vcmp.gt.f32.partialorder %v3223_v12, 0.0 }
  0x2d   :  { %v2382_v8 = vsel %vm1079_vm6, 1.0, %v2767_v60  ;;  %vm4014_vm6 = vcmp.eq.s32.totalorder %v2956_v42, %v2879_v21 }
  0x2f   :  { %788 = vmatpush1.bf16.msra.mxu0 %v2677_v52  ;;  %v3368_v52 = vld [vmem:[%s3934_s1 + $0x58] sm:$0xff] }
  0x30   :  { %789 = vmatprep.subr.bf16.mxu0 %v2678_v53  ;;  %v2698_v53 = vld [vmem:[%s3932_s3 + $0x124] ss:$8 sps:$4 sm:$0xff]   ;;  %1212 = vperm.xlu1 %2601, %v3368_v52  }
  0x33   :  { %790 = vmatpush1.bf16.msra.mxu0 %v2680_v56  ;;  %v2701_v56 = vld [vmem:[%s3932_s3 + $0x134] ss:$8 sps:$4 sm:$0xff]  }
  0x34   :  { %791 = vmatprep.subr.bf16.mxu0 %v2681_v57  ;;  %v2699_v57 = vld [vmem:[%s3932_s3 + $0x130] ss:$8 sps:$4 sm:$0xff]   ;;  %1222 = vperm.xlu1 %2601, %v3396_v38  }
  0x37   :  { %792 = vmatpush1.bf16.msra.mxu0 %v2683_v1 }
  0x38   :  { %793 = vmatprep.subr.bf16.mxu0 %v2684_v4  ;;  %v3413_v4 = vld [vmem:[%s3934_s1 + $0x70] sm:$0xff] }
  0x39   :  { %1227 = vperm.xlu0 %2600, %v3413_v4  }
  0x3b   :  { %794 = vmatpush1.bf16.msra.mxu0 %v2686_v9  ;;  %v1074_v9 = vld [vmem:[%s3934_s1 + $0x78] sm:$0xff] }
  0x3c   :  { %795 = vmatprep.subr.bf16.mxu0 %v2687_v13  ;;  %1232 = vperm.xlu1 %2601, %v1074_v9   ;;  %v2702_v13 = vld [vmem:[%s3932_s3 + $0x140] ss:$8 sps:$4 sm:$0xff]  }
  0x3f   :  { %796 = vmatpush1.bf16.msra.mxu0 %v2689_v19 }
  0x40   :  { %878 = vmatprep.subr.bf16.mxu0 %v2692_v25 }
  0x42   :  { %2317 = vmatmul.mubr.msk.bf16.vlgmr.msra.gmra.mrb[0].mxu0 %vm3206_vm13, %v2766_v30  ;;  %vm133_vm13 = vcmp.eq.s32.totalorder %v2933_v37, %v3090_v58  ;;  %v2696_v37 = vld [vmem:[%s3932_s3 + $0x120] ss:$8 sps:$4 sm:$0xff]  }
  0x43   :  { %879 = vmatpush1.bf16.msra.mxu0 %v2690_v45  ;;  %2319 = vmatprep.mubr.msk.bf16.mxu0 %vm2318_vm11, %v2766_v30  ;;  %vm2320_vm0 = vmpackc.low %vm137_vm12, %vm133_vm13  ;;  %vm1076_vm11 = vcmp.gt.f32.partialorder %v3136_v0, 0.0  ;;  %vm1077_vm13 = vcmp.gt.f32.partialorder %v3121_v62, 0.0  ;;  %vm1078_vm12 = vcmp.gt.f32.partialorder %v3157_v3, 0.0  ;;  %v2378_v0 = vsel %vm1075_vm14, 1.0, %v2767_v60 }
  0x44   :  { %880 = vmatprep.subr.bf16.mxu0 %v2695_v22  ;;  %v2379_v1 = vsel %vm1076_vm11, 1.0, %v2767_v60  ;;  %v2380_v62 = vsel %vm1077_vm13, 1.0, %v2767_v60  ;;  %v2381_v3 = vsel %vm1078_vm12, 1.0, %v2767_v60  ;;  %vm145_vm14 = vcmp.eq.s32.totalorder %v2946_v40, %v3090_v58 }
  0x45   :  { %vm1082_vm11 = vcmp.gt.f32.partialorder %v3275_v20, 0.0  ;;  %v2383_v40 = vsel %vm1080_vm7, 1.0, %v2767_v60  ;;  %v2607_v12 = vpack.i.bf16 %v2381_v3, %v2380_v62  ;;  %vm1083_vm13 = vcmp.gt.f32.partialorder %v3320_v41, 0.0  ;;  %v2707_v20 = vld [vmem:[%s3932_s3 + $0x154] ss:$8 sps:$4 sm:$0xff]  }
  0x46   :  { %v2385_v19 = vsel %vm1082_vm11, 1.0, %v2767_v60  ;;  %vm1084_vm12 = vcmp.gt.f32.partialorder %v3339_v47, 0.0  ;;  %vm4015_vm7 = vcmp.eq.s32.totalorder %v2959_v43, %v2879_v21  ;;  %v2612_v25 = vpack.i.bf16 %v2383_v40, %v2382_v8  ;;  %v2705_v21 = vld [vmem:[%s3932_s3 + $0x150] ss:$8 sps:$4 sm:$0xff]   ;;  %v1993_v8 = vld [vmem:[%s3935_s2 + $0x20] sm:$0xff]  ;;  %v2739_v40 = vld [vmem:[%s3936_s5 + $0x8] sm:$0xff]  }
  0x47   :  { %881 = vmatpush1.bf16.msra.mxu0 %v2693_v50  ;;  %v2386_v41 = vsel %vm1083_vm13, 1.0, %v2767_v60  ;;  %v2387_v45 = vsel %vm1084_vm12, 1.0, %v2767_v60  ;;  %2608 = vperm.xlu1 %2601, %v2607_v12   ;;  %vm1087_vm11 = vcmp.gt.f32.partialorder %v3385_v54, 0.0  ;;  %vm149_vm13 = vcmp.eq.s32.totalorder %v2956_v42, %v3090_v58  ;;  %v2710_v50 = vld [vmem:[%s3932_s3 + $0x164] ss:$8 sps:$4 sm:$0xff]   ;;  %v1991_v62 = vld [vmem:[%s3935_s2 + $0x10] sm:$0xff] }
  0x48   :  { %882 = vmatprep.subr.bf16.mxu0 %v2698_v53  ;;  %vm153_vm12 = vcmp.eq.s32.totalorder %v2959_v43, %v3090_v58  ;;  %v2390_v53 = vsel %vm1087_vm11, 1.0, %v2767_v60  ;;  %v2708_v42 = vld [vmem:[%s3932_s3 + $0x160] ss:$8 sps:$4 sm:$0xff]   ;;  %vm165_vm11 = vcmp.eq.s32.totalorder %v2904_v28, %v3090_v58  ;;  %v2719_v28 = vld [vmem:[%s3932_s3 + $0x194] ss:$8 sps:$4 sm:$0xff]  }
  0x49   :  { %v2717_v3 = vld [vmem:[%s3932_s3 + $0x190] ss:$8 sps:$4 sm:$0xff]   ;;  %v1994_v12 = vld [vmem:[%s3935_s2 + $0x28] sm:$0xff] }
  0x4a   :  { %2321 = vmatmul.mubr.msk.bf16.gmra.mrb[4].mxu0 %vm2320_vm0, %v2766_v30  ;;  %vm141_vm0 = vcmp.eq.s32.totalorder %v2943_v39, %v3090_v58  ;;  %v2602_v39 = vpack.i.bf16 %v2379_v1, %v2378_v0  ;;  %v2711_v1 = vld [vmem:[%s3932_s3 + $0x170] ss:$8 sps:$4 sm:$0xff]  }
  0x4b   :  { %883 = vmatpush1.bf16.msra.mxu0 %v2696_v37  ;;  %2323 = vmatprep.mubr.msk.bf16.mxu0 %vm2322_vm10, %v2766_v30  ;;  %vm1081_vm10 = vcmp.gt.f32.partialorder %v3252_v17, 0.0  ;;  %vm2324_vm4 = vmpackc.low %vm145_vm14, %vm141_vm0  ;;  %vm1085_vm14 = vcmp.gt.f32.partialorder %v3358_v23, 0.0 }
  0x4c   :  { %884 = vmatprep.subr.bf16.mxu0 %v2701_v56  ;;  %v2384_v17 = vsel %vm1081_vm10, 1.0, %v2767_v60  ;;  %vm2326_vm0 = vmpackc.low %vm4015_vm7, %vm4014_vm6  ;;  %vm1086_vm10 = vcmp.gt.f32.partialorder %v3368_v52, 0.0  ;;  %2603 = vperm.xlu0 %2600, %v2602_v39   ;;  %v2388_v22 = vsel %vm1085_vm14, 1.0, %v2767_v60  ;;  %vm1089_vm6 = vcmp.gt.f32.partialorder %v3413_v4, 0.0  ;;  %v2713_v56 = vld [vmem:[%s3932_s3 + $0x174] ss:$8 sps:$4 sm:$0xff]  }
  0x4d   :  { %v2617_v47 = vpack.i.bf16 %v2385_v19, %v2384_v17  ;;  %v2389_v23 = vsel %vm1086_vm10, 1.0, %v2767_v60  ;;  %vm1090_vm7 = vcmp.gt.f32.partialorder %v1074_v9, 0.0  ;;  %v2622_v52 = vpack.i.bf16 %v2387_v45, %v2386_v41  ;;  %v2716_v4 = vld [vmem:[%s3932_s3 + $0x184] ss:$8 sps:$4 sm:$0xff]   ;;  %v1992_v9 = vld [vmem:[%s3935_s2 + $0x18] sm:$0xff]  ;;  %v2740_v17 = vld [vmem:[%s3936_s5 + $0x10] sm:$0xff]  }
  0x4e   :  { %v2627_v37 = vpack.i.bf16 %v2389_v23, %v2388_v22  ;;  %v2392_v43 = vsel %vm1089_vm6, 1.0, %v2767_v60  ;;  %vm157_vm14 = vcmp.eq.s32.totalorder %v2898_v26, %v3090_v58  ;;  %vm161_vm10 = vcmp.eq.s32.totalorder %v2901_v27, %v3090_v58  ;;  %v2714_v26 = vld [vmem:[%s3932_s3 + $0x180] ss:$8 sps:$4 sm:$0xff]   ;;  %v2722_v39 = vld [vmem:[%s3932_s3 + $0x1a4] ss:$8 sps:$4 sm:$0xff]   ;;  %v1995_v19 = vld [vmem:[%s3935_s2 + $0x30] sm:$0xff] }
  0x4f   :  { %885 = vmatpush1.bf16.msra.mxu0 %v2699_v57  ;;  %2618 = vperm.xlu1 %2601, %v2617_v47   ;;  %v1990_v27 = vld [vmem:[%s3935_s2 + $0x8] sm:$0xff]  ;;  %v1997_v45 = vld [vmem:[%s3935_s2 + $0x40] sm:$0xff]  ;;  %v2731_v47 = vld [vmem:[%s3932_s3 + $0x1d4] ss:$8 sps:$4 sm:$0xff]   ;;  %vm181_vm6 = vcmp.eq.s32.totalorder %v2920_v34, %v3090_v58 }
  0x50   :  { %886 = vmatprep.subr.bf16.mxu0 %v2704_v10  ;;  %2613 = vperm.xlu0 %2600, %v2612_v25   ;;  %v2738_v10 = vld [vmem:[%s3936_s5] sm:$0xff]   ;;  %v1996_v25 = vld [vmem:[%s3935_s2 + $0x38] sm:$0xff]  ;;  %v2002_v34 = vld [vmem:[%s3935_s2 + $0x68] sm:$0xff] }
  0x51   :  { %1483 = vmatpush1.bf16.msra.mxu1 %v2738_v10  ;;  %v2728_v41 = vld [vmem:[%s3932_s3 + $0x1c4] ss:$8 sps:$4 sm:$0xff]   ;;  %v2729_v22 = vld [vmem:[%s3932_s3 + $0x1d0] ss:$8 sps:$4 sm:$0xff]  }
  0x52   :  { %2325 = vmatmul.mubr.msk.bf16.gmra.mrb[8].mxu0 %vm2324_vm4, %v2766_v30  ;;  %vm1088_vm4 = vcmp.gt.f32.partialorder %v3396_v38, 0.0  ;;  %v2393_v38 = vsel %vm1090_vm7, 1.0, %v2767_v60  ;;  %1484 = vmatprep.subr.bf16.mxu1 %v2765_v16  ;;  %v2000_v23 = vld [vmem:[%s3935_s2 + $0x58] sm:$0xff]  ;;  %vm185_vm7 = vcmp.eq.s32.totalorder %v2923_v35, %v3090_v58 }
  0x53   :  { %887 = vmatpush1.bf16.msra.mxu0 %v2702_v13  ;;  %2327 = vmatprep.mubr.msk.bf16.mxu0 %vm2326_vm0, %v2766_v30  ;;  %v2391_v54 = vsel %vm1088_vm4, 1.0, %v2767_v60  ;;  %vm2328_vm0 = vmpackc.low %vm153_vm12, %vm149_vm13  ;;  %v2637_v0 = vpack.i.bf16 %v2393_v38, %v2392_v43  ;;  %vm169_vm4 = vcmp.eq.s32.totalorder %v2907_v29, %v3090_v58  ;;  %v2725_v13 = vld [vmem:[%s3932_s3 + $0x1b4] ss:$8 sps:$4 sm:$0xff]   ;;  %vm177_vm12 = vcmp.eq.s32.totalorder %v2914_v32, %v3090_v58  ;;  %v1998_v32 = vld [vmem:[%s3935_s2 + $0x48] sm:$0xff] }
  0x54   :  { %888 = vmatprep.subr.bf16.mxu0 %v2707_v20  ;;  %2623 = vperm.xlu0 %2600, %v2622_v52   ;;  %v2632_v57 = vpack.i.bf16 %v2391_v54, %v2390_v53  ;;  %vm3517_vm13 = vmpackc.low %vm169_vm4, %vm165_vm11  ;;  %v2723_v20 = vld [vmem:[%s3932_s3 + $0x1b0] ss:$8 sps:$4 sm:$0xff]   ;;  %v2732_v52 = vld [vmem:[%s3932_s3 + $0x1e0] ss:$8 sps:$4 sm:$0xff]   ;;  %vm4022_vm11 = vnez %v3976_v7  ;;  %vm4024_vm4 = vnez %v3986_v14 }
  0x55   :  { %2628 = vperm.xlu1 %2601, %v2627_v37   ;;  %1485 = vmatpush1.bf16.msra.mxu1 %v2739_v40  ;;  %v2737_v35 = vld [vmem:[%s3932_s3 + $0x1f4] ss:$8 sps:$4 sm:$0xff]   ;;  %v2735_v53 = vld [vmem:[%s3932_s3 + $0x1f0] ss:$8 sps:$4 sm:$0xff]  }
  0x56   :  { %1486 = vmatprep.subr.bf16.mxu1 %v2765_v16  ;;  %v2004_v54 = vld [vmem:[%s3935_s2 + $0x78] sm:$0xff] }
  0x57   :  { %889 = vmatpush1.bf16.msra.mxu0 %v2705_v21  ;;  %v1999_v21 = vld [vmem:[%s3935_s2 + $0x50] sm:$0xff] }
  0x58   :  { %890 = vmatprep.subr.bf16.mxu0 %v2710_v50  ;;  %2633 = vperm.xlu0 %2600, %v2632_v57   ;;  %v2734_v50 = vld [vmem:[%s3932_s3 + $0x1e4] ss:$8 sps:$4 sm:$0xff]  }
  0x59   :  { %2638 = vperm.xlu1 %2601, %v2637_v0   ;;  %1487 = vmatpush1.bf16.msra.mxu1 %v2740_v17 }
  0x5a   :  { %2329 = vmatmul.mubr.msk.bf16.gmra.mrb[12].mxu0 %vm2328_vm0, %v2766_v30  ;;  %1488 = vmatprep.subr.bf16.mxu1 %v2765_v16  ;;  %vm4018_vm0 = vnez %v3960_v63  ;;  %v2745_v63 = vld [vmem:[%s3936_s5 + $0x38] sm:$0xff]  }
  0x5b   :  { %891 = vmatpush1.bf16.msra.mxu0 %v2708_v42  ;;  %2331 = vmatprep.mubr.msk.bf16.mxu0 %vm3001_vm2, %v2766_v30  ;;  %vm2332_vm2 = vmpackc.low %vm161_vm10, %vm157_vm14  ;;  %vm4019_vm14 = vnez %v3964_v2  ;;  %vm4021_vm10 = vnez %v3972_v6  ;;  %v2746_v2 = vld [vmem:[%s3936_s5 + $0x40] ss:$0 sps:$4 sm:$0xff]  }
  0x5c   :  { %892 = vmatprep.subr.bf16.mxu0 %v2713_v56  ;;  %2007 = vperm.xlu0 %2600, %v1989_v46   ;;  %v2747_v6 = vld [vmem:[%s3937_s8] sm:$0xff]  }
  0x5d   :  { %2012 = vperm.xlu1 %2601, %v1990_v27   ;;  %1489 = vmatpush1.bf16.msra.mxu1 %v2741_v51 }
  0x5e   :  { %1490 = vmatprep.subr.bf16.mxu1 %v2765_v16 }
  0x5f   :  { %893 = vmatpush1.bf16.msra.mxu0 %v2711_v1 }
  0x60   :  { %894 = vmatprep.subr.bf16.mxu0 %v2716_v4  ;;  %2017 = vperm.xlu0 %2600, %v1991_v62  }
  0x61   :  { %2022 = vperm.xlu1 %2601, %v1992_v9  }
  0x62   :  { %2333 = vmatmul.mubr.msk.bf16.gmra.mrb[16].mxu0 %vm2332_vm2, %v2766_v30  ;;  %vm4025_vm2 = vnez %v3990_v15 }
  0x63   :  { %895 = vmatpush1.bf16.msra.mxu0 %v2714_v26  ;;  %2335 = vmatprep.mubr.msk.bf16.mxu0 %vm3038_vm15, %v2766_v30  ;;  %vm173_vm15 = vcmp.eq.s32.totalorder %v2911_v31, %v3090_v58  ;;  %v2726_v31 = vld [vmem:[%s3932_s3 + $0x1c0] ss:$8 sps:$4 sm:$0xff]   ;;  %v2003_v58 = vld [vmem:[%s3935_s2 + $0x70] sm:$0xff] }
  0x64   :  { %896 = vmatprep.subr.bf16.mxu0 %v2719_v28  ;;  %2027 = vperm.xlu0 %2600, %v1993_v8  }
  0x65   :  { %2032 = vperm.xlu1 %2601, %v1994_v12  }
  0x67   :  { %897 = vmatpush1.bf16.msra.mxu0 %v2717_v3 }
  0x68   :  { %898 = vmatprep.subr.bf16.mxu0 %v2722_v39  ;;  %2037 = vperm.xlu0 %2600, %v1995_v19  }
  0x69   :  { %2042 = vperm.xlu1 %2601, %v1996_v25  }
  0x6a   :  { %2337 = vmatmul.mubr.msk.bf16.gmra.mrb[20].mxu0 %vm3517_vm13, %v2766_v30  ;;  %vm4026_vm13 = vnez %v3994_v18 }
  0x6b   :  { %899 = vmatpush1.bf16.msra.mxu0 %v2720_v48  ;;  %2339 = vmatprep.mubr.msk.bf16.mxu0 %vm3054_vm5, %v2766_v30  ;;  %vm2340_vm5 = vmpackc.low %vm177_vm12, %vm173_vm15  ;;  %vm4027_vm15 = vnez %v3998_v24  ;;  %vm4028_vm12 = vnez %v4002_v33 }
  0x6c   :  { %900 = vmatprep.subr.bf16.mxu0 %v2725_v13  ;;  %2047 = vperm.xlu0 %2600, %v1997_v45  }
  0x6d   :  { %2052 = vperm.xlu1 %2601, %v1998_v32  }
  0x6f   :  { %901 = vmatpush1.bf16.msra.mxu0 %v2723_v20 }
  0x70   :  { %902 = vmatprep.subr.bf16.mxu0 %v2728_v41  ;;  %2057 = vperm.xlu0 %2600, %v1999_v21  }
  0x71   :  { %2062 = vperm.xlu1 %2601, %v2000_v23  }
  0x72   :  { %2341 = vmatmul.mubr.msk.bf16.gmra.mrb[24].mxu0 %vm2340_vm5, %v2766_v30  ;;  %vm4029_vm5 = vnez %v4010_v44 }
  0x73   :  { %903 = vmatpush1.bf16.msra.mxu0 %v2726_v31  ;;  %2343 = vmatprep.mubr.msk.bf16.mxu0 %vm3079_vm8, %v2766_v30  ;;  %vm2344_vm8 = vmpackc.low %vm185_vm7, %vm181_vm6  ;;  %vm4030_vm6 = vnez %v4013_v49  ;;  %vm41_vm7 = vcmask 64512  }
  0x74   :  { %904 = vmatprep.subr.bf16.mxu0 %v2731_v47  ;;  %2067 = vperm.xlu0 %2600, %v2001_v55   ;;  %42 = vst.msk [vmem:[#allocation2 + $0x8] sm:$0xff] %vm41_vm7, %v2767_v60  ;;  %44 = vst.msk [vmem:[#allocation2 + $0x18] sm:$0xff] %vm41_vm7, %v2767_v60 }
  0x75   :  { %2072 = vperm.xlu1 %2601, %v2002_v34   ;;  %46 = vst.msk [vmem:[#allocation2 + $0x28] sm:$0xff] %vm41_vm7, %v2767_v60  ;;  %48 = vst.msk [vmem:[#allocation2 + $0x38] sm:$0xff] %vm41_vm7, %v2767_v60 }
  0x76   :  { %50 = vst.msk [vmem:[#allocation2 + $0x48] sm:$0xff] %vm41_vm7, %v2767_v60  ;;  %52 = vst.msk [vmem:[#allocation2 + $0x58] sm:$0xff] %vm41_vm7, %v2767_v60 }
  0x77   :  { %905 = vmatpush1.bf16.msra.mxu0 %v2729_v22  ;;  %54 = vst.msk [vmem:[#allocation2 + $0x68] sm:$0xff] %vm41_vm7, %v2767_v60  ;;  %56 = vst.msk [vmem:[#allocation2 + $0x78] sm:$0xff] %vm41_vm7, %v2767_v60 }
  0x78   :  { %906 = vmatprep.subr.bf16.mxu0 %v2734_v50  ;;  %2077 = vperm.xlu0 %2600, %v2003_v58   ;;  %58 = vst.msk [vmem:[#allocation2 + $0x88] sm:$0xff] %vm41_vm7, %v2767_v60  ;;  %60 = vst.msk [vmem:[#allocation2 + $0x98] sm:$0xff] %vm41_vm7, %v2767_v60 }
  0x79   :  { %2082 = vperm.xlu1 %2601, %v2004_v54   ;;  %62 = vst.msk [vmem:[#allocation2 + $0xa8] sm:$0xff] %vm41_vm7, %v2767_v60  ;;  %64 = vst.msk [vmem:[#allocation2 + $0xb8] sm:$0xff] %vm41_vm7, %v2767_v60 }
  0x7a   :  { %2345 = vmatmul.mubr.msk.bf16.gmra.mrb[28].mxu0 %vm2344_vm8, %v2766_v30  ;;  %66 = vst.msk [vmem:[#allocation2 + $0xc8] sm:$0xff] %vm41_vm7, %v2767_v60  ;;  %68 = vst.msk [vmem:[#allocation2 + $0xd8] sm:$0xff] %vm41_vm7, %v2767_v60  ;;  %vm1635_vm8 = vcmask 261120  }
  0x7b   :  { %907 = vmatpush1.bf16.msra.mxu0 %v2732_v52  ;;  %2347 = vmatprep.mubr.msk.bf16.mxu0 %vm3098_vm9, %v2766_v30  ;;  %vm4020_vm9 = vnez %v3968_v5  ;;  %70 = vst.msk [vmem:[#allocation2 + $0xe8] sm:$0xff] %vm41_vm7, %v2767_v60  ;;  %72 = vst.msk [vmem:[#allocation2 + $0xf8] sm:$0xff] %vm41_vm7, %v2767_v60  ;;  %v352_v18 = vld [vmem:[#allocation2 + $0x18] sm:$0xff] }
  0x7c   :  { %908 = vmatprep.subr.bf16.mxu0 %v2737_v35  ;;  %v354_v42 = vld [vmem:[#allocation2 + $0x28] sm:$0xff]  ;;  %v356_v57 = vld [vmem:[#allocation2 + $0x38] sm:$0xff] }
  0x7d   :  { %v358_v10 = vld [vmem:[#allocation2 + $0x48] sm:$0xff]  ;;  %v360_v12 = vld [vmem:[#allocation2 + $0x58] sm:$0xff] }
  0x7e   :  { %v362_v22 = vld [vmem:[#allocation2 + $0x68] sm:$0xff]  ;;  %v364_v34 = vld [vmem:[#allocation2 + $0x78] sm:$0xff] }
  0x7f   :  { %909 = vmatpush1.bf16.msra.mxu0 %v2735_v53 }
  0x82   :  { %2349 = vmatmul.mubr.msk.bf16.vlgmr.msra.gmra.mrb[0].mxu0 %vm3113_vm1, %v2766_v30  ;;  %vm4023_vm1 = vnez %v3982_v11  ;;  %v350_v11 = vld [vmem:[#allocation2 + $0x8] sm:$0xff] }
  0x83   :  { %2351 = vmatprep.mubr.msk.bf16.mxu0 %vm4018_vm0, %v2766_v30  ;;  %vm2165_vm0 = vcmask 257024  }
  0x8a   :  { %2353 = vmatmul.mubr.msk.bf16.gmra.mrb[4].mxu0 %vm4019_vm14, %v2766_v30 }
  0x8b   :  { %2355 = vmatprep.mubr.msk.bf16.mxu0 %vm4020_vm9, %v2766_v30 }
  0x8e   :  { %v1158_v7 = vpop.permute.xlu0 %1157 }
  0x8f   :  { %v1168_v37 = vpop.permute.xlu1 %1167 }
  0x92   :  { %2357 = vmatmul.mubr.msk.bf16.gmra.mrb[8].mxu0 %vm4021_vm10, %v2766_v30  ;;  %v1163_v36 = vpop.permute.xlu0 %1162 }
  0x93   :  { %2359 = vmatprep.mubr.msk.bf16.mxu0 %vm4022_vm11, %v2766_v30  ;;  %v1173_v26 = vpop.permute.xlu1 %1172 }
  0x96   :  { %v1178_v25 = vpop.permute.xlu0 %1177 }
  0x97   :  { %v1183_v41 = vpop.permute.xlu1 %1182 }
  0x9a   :  { %2361 = vmatmul.mubr.msk.bf16.gmra.mrb[12].mxu0 %vm4023_vm1, %v2766_v30 }
  0x9b   :  { %2363 = vmatprep.mubr.msk.bf16.mxu0 %vm4024_vm4, %v2766_v30 }
  0xa2   :  { %2365 = vmatmul.mubr.msk.bf16.gmra.mrb[16].mxu0 %vm4025_vm2, %v2766_v30 }
  0xa3   :  { %2367 = vmatprep.mubr.msk.bf16.mxu0 %vm4026_vm13, %v2766_v30 }
  0xaa   :  { %2369 = vmatmul.mubr.msk.bf16.gmra.mrb[20].mxu0 %vm4027_vm15, %v2766_v30 }
  0xab   :  { %2371 = vmatprep.mubr.msk.bf16.mxu0 %vm4028_vm12, %v2766_v30 }
  0xb2   :  { %2373 = vmatmul.mubr.msk.bf16.gmra.mrb[24].mxu0 %vm3313_vm3, %v2766_v30  ;;  %vm1478_vm3 = vcmask 1043456  }
  0xb3   :  { %2375 = vmatprep.mubr.msk.bf16.mxu0 %vm4029_vm5, %v2766_v30  ;;  %v1480_v5 = vsel %vm1478_vm3, %v2746_v2, 0 }
  0xba   :  { %2377 = vmatmul.mubr.msk.bf16.gmra.mrb[28].mxu0 %vm4030_vm6, %v2766_v30  ;;  %v2742_v30 = vld [vmem:[%s3936_s5 + $0x20] sm:$0xff]  }
  0xbb   :  { %1491 = vmatpush1.bf16.msra.mxu1 %v2742_v30  ;;  %v1188_v30 = vpop.permute.xlu0 %1187 }
  0xbc   :  { %1492 = vmatprep.subr.bf16.mxu1 %v2765_v16 }
  0xbf   :  { %1493 = vmatpush1.bf16.msra.mxu1 %v2743_v59  ;;  %v1193_v59 = vpop.permute.xlu1 %1192 }
  0xc0   :  { %1494 = vmatprep.subr.bf16.mxu1 %v2765_v16 }
  0xc3   :  { %1495 = vmatpush1.bf16.msra.mxu1 %v2744_v61 }
  0xc4   :  { %1496 = vmatprep.subr.bf16.mxu1 %v2765_v16 }
  0xc7   :  { %1497 = vmatpush1.bf16.msra.mxu1 %v2745_v63 }
  0xc8   :  { %1498 = vmatprep.subr.bf16.mxu1 %v2765_v16 }
  0xcb   :  { %1499 = vmatpush1.bf16.msra.mxu1 %v1480_v5 }
  0xcc   :  { %2497 = vmatprep.subr.bf16.mxu1 %v2747_v6 }
 0x155   :  { %v912_v14 = vpop.f32.mrb[0].mxu0 }
 0x156   :  { %v914_v15 = vpop.f32.mrb[1].mxu0  ;;  %v1235_v49 = vmul.f32 %v1158_v7, %v912_v14 }
 0x157   :  { %v992_v24 = vadd.f32 %v914_v15, %v350_v11  ;;  %v916_v33 = vpop.f32.mrb[2].mxu0  ;;  %v366_v11 = vld [vmem:[#allocation2 + $0x88] sm:$0xff] }
 0x158   :  { %v918_v16 = vpop.f32.mrb[3].mxu0  ;;  %v1237_v60 = vmul.f32 %v1163_v36, %v916_v33  ;;  %v368_v33 = vld [vmem:[#allocation2 + $0x98] sm:$0xff] }
 0x159   :  { %1025 = vst.msk [vmem:[#allocation2 + $0x8] sm:$0xff] %vm41_vm7, %v992_v24  ;;  %v994_v44 = vadd.f32 %v918_v16, %v352_v18 }
 0x15a   :  { %v1267_v43 = vpack.c.bf16 %v1237_v60, %v1235_v49  ;;  %v1198_v60 = vpop.permute.xlu0 %1197 }
 0x15b   :  { %1027 = vst.msk [vmem:[#allocation2 + $0x18] sm:$0xff] %vm41_vm7, %v994_v44 }
 0x15d   :  { %v922_v38 = vpop.f32.mrb[4].mxu0 }
 0x15e   :  { %v924_v56 = vpop.f32.mrb[5].mxu0  ;;  %v1239_v29 = vmul.f32 %v1168_v37, %v922_v38 }
 0x15f   :  { %v996_v0 = vadd.f32 %v924_v56, %v354_v42  ;;  %v926_v1 = vpop.f32.mrb[6].mxu0 }
 0x160   :  { %v928_v4 = vpop.f32.mrb[7].mxu0  ;;  %v1124_v46 = vld [vmem:[#allocation2 + $0x8] sm:$0xff]  ;;  %v1241_v62 = vmul.f32 %v1173_v26, %v926_v1 }
 0x161   :  { %1029 = vst.msk [vmem:[#allocation2 + $0x28] sm:$0xff] %vm41_vm7, %v996_v0  ;;  %v998_v27 = vadd.f32 %v928_v4, %v356_v57  ;;  %v1236_v3 = vmul.f32 %v1158_v7, %v1124_v46  ;;  %v370_v1 = vld [vmem:[#allocation2 + $0xa8] sm:$0xff] }
 0x162   :  { %v1126_v28 = vld [vmem:[#allocation2 + $0x18] sm:$0xff]  ;;  %v1269_v39 = vpack.c.bf16 %v1241_v62, %v1239_v29 }
 0x163   :  { %1031 = vst.msk [vmem:[#allocation2 + $0x38] sm:$0xff] %vm41_vm7, %v998_v27  ;;  %v1238_v9 = vmul.f32 %v1163_v36, %v1126_v28  ;;  %v372_v28 = vld [vmem:[#allocation2 + $0xb8] sm:$0xff] }
 0x165   :  { %v932_v8 = vpop.f32.mrb[8].mxu0  ;;  %v1268_v40 = vpack.c.bf16 %v1238_v9, %v1236_v3 }
 0x166   :  { %v934_v48 = vpop.f32.mrb[9].mxu0  ;;  %v1243_v31 = vmul.f32 %v1178_v25, %v932_v8 }
 0x167   :  { %v1000_v13 = vadd.f32 %v934_v48, %v358_v10  ;;  %v936_v17 = vpop.f32.mrb[10].mxu0  ;;  %2404 = vmatprep.mubr.msk.bf16.mxu1 %vm41_vm7, %v1268_v40  ;;  %v1208_v10 = vpop.permute.xlu0 %1207 }
 0x168   :  { %v938_v19 = vpop.f32.mrb[11].mxu0  ;;  %1515 = vmatmul.mubr.bf16.vlgmr.msra.gmra.mrb[0].mxu1 %v1267_v43  ;;  %v1128_v20 = vld [vmem:[#allocation2 + $0x28] sm:$0xff]  ;;  %v1245_v32 = vmul.f32 %v1183_v41, %v936_v17 }
 0x169   :  { %1033 = vst.msk [vmem:[#allocation2 + $0x48] sm:$0xff] %vm41_vm7, %v1000_v13  ;;  %v1002_v51 = vadd.f32 %v938_v19, %v360_v12  ;;  %2498 = vmatpush3.bf16.msra.mxu1 %v2747_v6  ;;  %v1240_v47 = vmul.f32 %v1168_v37, %v1128_v20  ;;  %v1203_v37 = vpop.permute.xlu1 %1202  ;;  %v374_v19 = vld [vmem:[#allocation2 + $0xc8] sm:$0xff] }
 0x16a   :  { %v1130_v45 = vld [vmem:[#allocation2 + $0x38] sm:$0xff]  ;;  %v1271_v23 = vpack.c.bf16 %v1245_v32, %v1243_v31 }
 0x16b   :  { %1035 = vst.msk [vmem:[#allocation2 + $0x58] sm:$0xff] %vm41_vm7, %v1002_v51  ;;  %v1242_v21 = vmul.f32 %v1173_v26, %v1130_v45  ;;  %v376_v45 = vld [vmem:[#allocation2 + $0xd8] sm:$0xff] }
 0x16d   :  { %v942_v50 = vpop.f32.mrb[12].mxu0  ;;  %v1270_v55 = vpack.c.bf16 %v1242_v21, %v1240_v47 }
 0x16e   :  { %v944_v52 = vpop.f32.mrb[13].mxu0  ;;  %v1247_v2 = vmul.f32 %v1188_v30, %v942_v50 }
 0x16f   :  { %v1004_v35 = vadd.f32 %v944_v52, %v362_v22  ;;  %v946_v58 = vpop.f32.mrb[14].mxu0  ;;  %2405 = vmatprep.mubr.msk.bf16.mxu1 %vm41_vm7, %v1270_v55  ;;  %v1218_v22 = vpop.permute.xlu0 %1217 }
 0x170   :  { %v948_v53 = vpop.f32.mrb[15].mxu0  ;;  %1523 = vmatmul.mubr.bf16.gmra.mrb[4].mxu1 %v1269_v39  ;;  %v1132_v54 = vld [vmem:[#allocation2 + $0x48] sm:$0xff]  ;;  %v1249_v5 = vmul.f32 %v1193_v59, %v946_v58  ;;  %v1213_v39 = vpop.permute.xlu1 %1212 }
 0x171   :  { %1037 = vst.msk [vmem:[#allocation2 + $0x68] sm:$0xff] %vm41_vm7, %v1004_v35  ;;  %v1006_v61 = vadd.f32 %v948_v53, %v364_v34  ;;  %v1244_v6 = vmul.f32 %v1178_v25, %v1132_v54  ;;  %v378_v53 = vld [vmem:[#allocation2 + $0xe8] sm:$0xff] }
 0x172   :  { %v1134_v63 = vld [vmem:[#allocation2 + $0x58] sm:$0xff]  ;;  %v1273_v14 = vpack.c.bf16 %v1249_v5, %v1247_v2 }
 0x173   :  { %1039 = vst.msk [vmem:[#allocation2 + $0x78] sm:$0xff] %vm41_vm7, %v1006_v61  ;;  %v1246_v7 = vmul.f32 %v1183_v41, %v1134_v63  ;;  %v380_v63 = vld [vmem:[#allocation2 + $0xf8] sm:$0xff] }
 0x175   :  { %v952_v15 = vpop.f32.mrb[16].mxu0  ;;  %v1272_v18 = vpack.c.bf16 %v1246_v7, %v1244_v6 }
 0x176   :  { %v954_v24 = vpop.f32.mrb[17].mxu0  ;;  %v1251_v38 = vmul.f32 %v1198_v60, %v952_v15 }
 0x177   :  { %v1008_v16 = vadd.f32 %v954_v24, %v366_v11  ;;  %v956_v36 = vpop.f32.mrb[18].mxu0  ;;  %2406 = vmatprep.mubr.msk.bf16.mxu1 %vm41_vm7, %v1272_v18  ;;  %v1228_v11 = vpop.permute.xlu0 %1227 }
 0x178   :  { %v958_v44 = vpop.f32.mrb[19].mxu0  ;;  %1531 = vmatmul.mubr.bf16.gmra.mrb[8].mxu1 %v1271_v23  ;;  %v1136_v49 = vld [vmem:[#allocation2 + $0x68] sm:$0xff]  ;;  %v1253_v56 = vmul.f32 %v1203_v37, %v956_v36  ;;  %v1223_v23 = vpop.permute.xlu1 %1222 }
 0x179   :  { %1041 = vst.msk [vmem:[#allocation2 + $0x88] sm:$0xff] %vm41_vm7, %v1008_v16  ;;  %v1010_v42 = vadd.f32 %v958_v44, %v368_v33  ;;  %v1248_v57 = vmul.f32 %v1188_v30, %v1136_v49 }
 0x17a   :  { %v1138_v43 = vld [vmem:[#allocation2 + $0x78] sm:$0xff]  ;;  %v1275_v4 = vpack.c.bf16 %v1253_v56, %v1251_v38  ;;  %v2748_v56 = vld [vmem:[%s3937_s8 + $0x8] sm:$0xff]  }
 0x17b   :  { %1043 = vst.msk [vmem:[#allocation2 + $0x98] sm:$0xff] %vm41_vm7, %v1010_v42  ;;  %v1250_v0 = vmul.f32 %v1193_v59, %v1138_v43  ;;  %2499 = vmatprep.subr.bf16.mxu1 %v2748_v56 }
 0x17c   :  { %2500 = vmatpush3.bf16.msra.mxu1 %v2748_v56 }
 0x17d   :  { %v962_v46 = vpop.f32.mrb[20].mxu0  ;;  %v1274_v26 = vpack.c.bf16 %v1250_v0, %v1248_v57  ;;  %v2749_v57 = vld [vmem:[%s3938_s7] sm:$0xff]   ;;  %v2604_v0 = vpop.permute.xlu0 %2603 }
 0x17e   :  { %v964_v27 = vpop.f32.mrb[21].mxu0  ;;  %v1255_v48 = vmul.f32 %v1208_v10, %v962_v46  ;;  %2517 = vmatprep.subr.bf16.mxu1 %v2749_v57  ;;  %v3776_v46 = vld [vmem:[%s3940_s6] ss:$0 sm:$0xff] }
 0x17f   :  { %v1012_v29 = vadd.f32 %v964_v27, %v370_v1  ;;  %v966_v62 = vpop.f32.mrb[22].mxu0  ;;  %2407 = vmatprep.mubr.msk.bf16.mxu1 %vm41_vm7, %v1274_v26  ;;  %v2606_v1 = vunpack.i.h.bf16 %v2604_v0 }
 0x180   :  { %v968_v3 = vpop.f32.mrb[23].mxu0  ;;  %1539 = vmatmul.mubr.bf16.gmra.mrb[12].mxu1 %v1273_v14  ;;  %v1140_v9 = vld [vmem:[#allocation2 + $0x88] sm:$0xff]  ;;  %v1257_v12 = vmul.f32 %v1213_v39, %v966_v62  ;;  %v1233_v14 = vpop.permute.xlu1 %1232 }
 0x181   :  { %1045 = vst.msk [vmem:[#allocation2 + $0xa8] sm:$0xff] %vm41_vm7, %v1012_v29  ;;  %v1014_v8 = vadd.f32 %v968_v3, %v372_v28  ;;  %v1252_v13 = vmul.f32 %v1198_v60, %v1140_v9  ;;  %v1388_v29 = vmul.f32 %v2606_v1, %v3776_v46 }
 0x182   :  { %v1142_v40 = vld [vmem:[#allocation2 + $0x98] sm:$0xff]  ;;  %v1277_v20 = vpack.c.bf16 %v1257_v12, %v1255_v48 }
 0x183   :  { %1047 = vst.msk [vmem:[#allocation2 + $0xb8] sm:$0xff] %vm41_vm7, %v1014_v8  ;;  %v1254_v17 = vmul.f32 %v1203_v37, %v1142_v40 }
 0x185   :  { %v972_v25 = vpop.f32.mrb[24].mxu0  ;;  %v1276_v41 = vpack.c.bf16 %v1254_v17, %v1252_v13 }
 0x186   :  { %v974_v51 = vpop.f32.mrb[25].mxu0  ;;  %v1259_v52 = vmul.f32 %v1218_v22, %v972_v25 }
 0x187   :  { %v1016_v31 = vadd.f32 %v974_v51, %v374_v19  ;;  %v976_v32 = vpop.f32.mrb[26].mxu0  ;;  %2408 = vmatprep.mubr.msk.bf16.mxu1 %vm41_vm7, %v1276_v41 }
 0x188   :  { %v978_v47 = vpop.f32.mrb[27].mxu0  ;;  %1547 = vmatmul.mubr.bf16.gmra.mrb[16].mxu1 %v1275_v4  ;;  %v1144_v21 = vld [vmem:[#allocation2 + $0xa8] sm:$0xff]  ;;  %v1261_v34 = vmul.f32 %v1223_v23, %v976_v32  ;;  %v2605_v4 = vunpack.i.l.bf16 %v2604_v0 }
 0x189   :  { %1049 = vst.msk [vmem:[#allocation2 + $0xc8] sm:$0xff] %vm41_vm7, %v1016_v31  ;;  %v1018_v50 = vadd.f32 %v978_v47, %v376_v45  ;;  %v1256_v35 = vmul.f32 %v1208_v10, %v1144_v21  ;;  %v2614_v45 = vpop.permute.xlu0 %2613  ;;  %v2750_v21 = vld [vmem:[%s3938_s7 + $0x8] sm:$0xff]  }
 0x18a   :  { %v1146_v55 = vld [vmem:[#allocation2 + $0xb8] sm:$0xff]  ;;  %v1279_v54 = vpack.c.bf16 %v1261_v34, %v1259_v52  ;;  %v1387_v27 = vmul.f32 %v2605_v4, %v3776_v46  ;;  %v2616_v31 = vunpack.i.h.bf16 %v2614_v45  ;;  %v2615_v32 = vunpack.i.l.bf16 %v2614_v45  ;;  %v2751_v52 = vld [vmem:[%s3938_s7 + $0x10] sm:$0xff]  }
 0x18b   :  { %1051 = vst.msk [vmem:[#allocation2 + $0xd8] sm:$0xff] %vm41_vm7, %v1018_v50  ;;  %v1258_v58 = vmul.f32 %v1213_v39, %v1146_v55  ;;  %v2609_v39 = vpop.permute.xlu1 %2608 }
 0x18c   :  { %v2611_v8 = vunpack.i.h.bf16 %v2609_v39  ;;  %v2610_v40 = vunpack.i.l.bf16 %v2609_v39  ;;  %v1392_v55 = vmul.f32 %v2616_v31, %v3776_v46 }
 0x18d   :  { %v982_v30 = vpop.f32.mrb[28].mxu0  ;;  %v1278_v59 = vpack.c.bf16 %v1258_v58, %v1256_v35 }
 0x18e   :  { %v984_v61 = vpop.f32.mrb[29].mxu0  ;;  %v1263_v24 = vmul.f32 %v1228_v11, %v982_v30  ;;  %v1389_v13 = vmul.f32 %v2610_v40, %v3776_v46  ;;  %v1390_v19 = vmul.f32 %v2611_v8, %v3776_v46 }
 0x18f   :  { %v1020_v2 = vadd.f32 %v984_v61, %v378_v53  ;;  %v986_v5 = vpop.f32.mrb[30].mxu0  ;;  %2409 = vmatprep.mubr.msk.bf16.mxu1 %vm41_vm7, %v1278_v59 }
 0x190   :  { %v988_v6 = vpop.f32.mrb[31].mxu0  ;;  %1555 = vmatmul.mubr.bf16.gmra.mrb[20].mxu1 %v1277_v20  ;;  %v1148_v7 = vld [vmem:[#allocation2 + $0xc8] sm:$0xff]  ;;  %v1265_v33 = vmul.f32 %v1233_v14, %v986_v5 }
 0x191   :  { %1053 = vst.msk [vmem:[#allocation2 + $0xe8] sm:$0xff] %vm41_vm7, %v1020_v2  ;;  %v1022_v15 = vadd.f32 %v988_v6, %v380_v63  ;;  %v1260_v16 = vmul.f32 %v1218_v22, %v1148_v7  ;;  %v2752_v63 = vld [vmem:[%s3938_s7 + $0x18] sm:$0xff]  }
 0x192   :  { %v1150_v18 = vld [vmem:[#allocation2 + $0xd8] sm:$0xff]  ;;  %v1281_v44 = vpack.c.bf16 %v1265_v33, %v1263_v24  ;;  %v2624_v33 = vpop.permute.xlu0 %2623 }
 0x193   :  { %1055 = vst.msk [vmem:[#allocation2 + $0xf8] sm:$0xff] %vm41_vm7, %v1022_v15  ;;  %v1262_v36 = vmul.f32 %v1223_v23, %v1150_v18  ;;  %v1391_v23 = vmul.f32 %v2615_v32, %v3776_v46 }
 0x195   :  { %v1280_v49 = vpack.c.bf16 %v1262_v36, %v1260_v16  ;;  %v2626_v16 = vunpack.i.h.bf16 %v2624_v33  ;;  %v2625_v36 = vunpack.i.l.bf16 %v2624_v33 }
 0x197   :  { %2410 = vmatprep.mubr.msk.bf16.mxu1 %vm41_vm7, %v1280_v49  ;;  %v2754_v49 = vld [vmem:[%s3938_s7 + $0x28] sm:$0xff]  }
 0x198   :  { %1563 = vmatmul.mubr.bf16.gmra.mrb[24].mxu1 %v1279_v54  ;;  %v1152_v60 = vld [vmem:[#allocation2 + $0xe8] sm:$0xff]  ;;  %v2619_v54 = vpop.permute.xlu1 %2618 }
 0x199   :  { %v1264_v42 = vmul.f32 %v1228_v11, %v1152_v60  ;;  %v2621_v30 = vunpack.i.h.bf16 %v2619_v54  ;;  %v2620_v59 = vunpack.i.l.bf16 %v2619_v54  ;;  %v2753_v11 = vld [vmem:[%s3938_s7 + $0x20] sm:$0xff]  }
 0x19a   :  { %v1154_v37 = vld [vmem:[#allocation2 + $0xf8] sm:$0xff] }
 0x19b   :  { %v1266_v43 = vmul.f32 %v1233_v14, %v1154_v37  ;;  %v1393_v5 = vmul.f32 %v2620_v59, %v3776_v46  ;;  %v1394_v7 = vmul.f32 %v2621_v30, %v3776_v46  ;;  %v1395_v37 = vmul.f32 %v2625_v36, %v3776_v46  ;;  %v2757_v59 = vld [vmem:[%s3939_s4] sm:$0xff]  }
 0x19c   :  { %v2629_v4 = vpop.permute.xlu1 %2628 }
 0x19d   :  { %v1282_v38 = vpack.c.bf16 %v1266_v43, %v1264_v42  ;;  %v1396_v43 = vmul.f32 %v2626_v16, %v3776_v46  ;;  %v3850_v16 = vld [vmem:[%s3941_s9] ss:$0 sm:$0xff] }
 0x19f   :  { %2411 = vmatprep.mubr.msk.bf16.mxu1 %vm41_vm7, %v1282_v38  ;;  %v2755_v38 = vld [vmem:[%s3938_s7 + $0x30] sm:$0xff]  }
 0x1a0   :  { %1571 = vmatmul.mubr.bf16.gmra.mrb[28].mxu1 %v1281_v44 }
 0x23b   :  { %v1516_v26 = vpop.f32.mrb[0].mxu1 }
 0x23c   :  { %v1518_v28 = vpop.f32.mrb[1].mxu1  ;;  %v1517_v3 = vadd.f32 %v1516_v26, %v1387_v27  ;;  %v2631_v26 = vunpack.i.h.bf16 %v2629_v4  ;;  %v2630_v27 = vunpack.i.l.bf16 %v2629_v4 }
 0x23d   :  { %v1519_v62 = vpop.f32.mrb[2].mxu1 }
 0x23e   :  { %v1520_v9 = vadd.f32 %v1519_v62, %v1388_v29  ;;  %v1521_v10 = vpop.f32.mrb[3].mxu1  ;;  %v2756_v29 = vld [vmem:[%s3938_s7 + $0x38] sm:$0xff]  }
 0x23f   :  { %v1398_v10 = vmul.f32 %v2631_v26, %v3776_v46 }
 0x240   :  { %v1611_v48 = vpack.c.bf16 %v1520_v9, %v1517_v3  ;;  %v1397_v3 = vmul.f32 %v2630_v27, %v3776_v46 }
 0x242   :  { %2501 = vmatprep.mubr.msk.bf16.mxu1 %vm1635_vm8, %v1611_v48 }
 0x243   :  { %v1524_v12 = vpop.f32.mrb[4].mxu1 }
 0x244   :  { %v1526_v17 = vpop.f32.mrb[5].mxu1  ;;  %v1525_v25 = vadd.f32 %v1524_v12, %v1389_v13  ;;  %v2634_v12 = vpop.permute.xlu0 %2633 }
 0x245   :  { %v1527_v20 = vpop.f32.mrb[6].mxu1  ;;  %v2636_v13 = vunpack.i.h.bf16 %v2634_v12  ;;  %v2635_v17 = vunpack.i.l.bf16 %v2634_v12 }
 0x246   :  { %v1528_v41 = vadd.f32 %v1527_v20, %v1390_v19  ;;  %v1529_v51 = vpop.f32.mrb[7].mxu1 }
 0x247   :  { %v1400_v51 = vmul.f32 %v2636_v13, %v3776_v46 }
 0x248   :  { %v1612_v47 = vpack.c.bf16 %v1528_v41, %v1525_v25  ;;  %v1399_v25 = vmul.f32 %v2635_v17, %v3776_v46 }
 0x24a   :  { %2502 = vmatmul.mubr.msk.bf16.vlgmr.msra.gmra.mrb[32].mxu1 %vm1635_vm8, %v1612_v47 }
 0x24b   :  { %v1532_v22 = vpop.f32.mrb[8].mxu1  ;;  %2518 = vmatpush3.bf16.msra.mxu1 %v2749_v57 }
 0x24c   :  { %v1534_v50 = vpop.f32.mrb[9].mxu1  ;;  %2519 = vmatprep.subr.bf16.mxu1 %v2750_v21  ;;  %v1533_v35 = vadd.f32 %v1532_v22, %v1391_v23 }
 0x24d   :  { %v1535_v34 = vpop.f32.mrb[10].mxu1 }
 0x24e   :  { %v1536_v58 = vadd.f32 %v1535_v34, %v1392_v55  ;;  %v1537_v53 = vpop.f32.mrb[11].mxu1 }
 0x24f   :  { %2520 = vmatpush3.bf16.msra.mxu1 %v2750_v21  ;;  %v2639_v21 = vpop.permute.xlu1 %2638 }
 0x250   :  { %v1613_v61 = vpack.c.bf16 %v1536_v58, %v1533_v35  ;;  %2521 = vmatprep.subr.bf16.mxu1 %v2751_v52  ;;  %v2641_v22 = vunpack.i.h.bf16 %v2639_v21  ;;  %v2640_v23 = vunpack.i.l.bf16 %v2639_v21 }
 0x252   :  { %2505 = vmatprep.mubr.msk.bf16.mxu1 %vm1635_vm8, %v1613_v61  ;;  %v1402_v35 = vmul.f32 %v2641_v22, %v3776_v46 }
 0x253   :  { %v1540_v2 = vpop.f32.mrb[12].mxu1  ;;  %2522 = vmatpush3.bf16.msra.mxu1 %v2751_v52  ;;  %v1401_v52 = vmul.f32 %v2640_v23, %v3776_v46  ;;  %v2759_v46 = vld [vmem:[%s3939_s4 + $0x10] sm:$0xff]  }
 0x254   :  { %v1542_v6 = vpop.f32.mrb[13].mxu1  ;;  %2523 = vmatprep.subr.bf16.mxu1 %v2752_v63  ;;  %v1541_v15 = vadd.f32 %v1540_v2, %v1393_v5  ;;  %v2760_v2 = vld [vmem:[%s3939_s4 + $0x18] sm:$0xff]   ;;  %v2761_v5 = vld [vmem:[%s3939_s4 + $0x20] sm:$0xff]  }
 0x255   :  { %v1543_v14 = vpop.f32.mrb[14].mxu1  ;;  %v2762_v6 = vld [vmem:[%s3939_s4 + $0x28] sm:$0xff]  }
 0x256   :  { %v1544_v18 = vadd.f32 %v1543_v14, %v1394_v7  ;;  %v1545_v24 = vpop.f32.mrb[15].mxu1  ;;  %v2763_v7 = vld [vmem:[%s3939_s4 + $0x30] sm:$0xff]   ;;  %v2008_v14 = vpop.permute.xlu0 %2007 }
 0x257   :  { %2524 = vmatpush3.bf16.msra.mxu1 %v2752_v63  ;;  %v2758_v63 = vld [vmem:[%s3939_s4 + $0x8] sm:$0xff]  }
 0x258   :  { %v1614_v44 = vpack.c.bf16 %v1544_v18, %v1541_v15  ;;  %2525 = vmatprep.subr.bf16.mxu1 %v2753_v11  ;;  %v2013_v15 = vpop.permute.xlu1 %2012 }
 0x25a   :  { %2506 = vmatmul.mubr.msk.bf16.gmra.mrb[36].mxu1 %vm1635_vm8, %v1614_v44  ;;  %v2018_v18 = vpop.permute.xlu0 %2017 }
 0x25b   :  { %v1548_v60 = vpop.f32.mrb[16].mxu1  ;;  %2526 = vmatpush3.bf16.msra.mxu1 %v2753_v11  ;;  %v2764_v11 = vld [vmem:[%s3939_s4 + $0x38] sm:$0xff]  }
 0x25c   :  { %v1550_v42 = vpop.f32.mrb[17].mxu1  ;;  %2527 = vmatprep.subr.bf16.mxu1 %v2754_v49  ;;  %v1549_v57 = vadd.f32 %v1548_v60, %v1395_v37  ;;  %v2023_v24 = vpop.permute.xlu1 %2022 }
 0x25d   :  { %v1551_v56 = vpop.f32.mrb[18].mxu1 }
 0x25e   :  { %v1552_v0 = vadd.f32 %v1551_v56, %v1396_v43  ;;  %v1553_v1 = vpop.f32.mrb[19].mxu1  ;;  %v2028_v33 = vpop.permute.xlu0 %2027 }
 0x25f   :  { %2528 = vmatpush3.bf16.msra.mxu1 %v2754_v49 }
 0x260   :  { %v1615_v28 = vpack.c.bf16 %v1552_v0, %v1549_v57  ;;  %2529 = vmatprep.subr.bf16.mxu1 %v2755_v38  ;;  %v2033_v36 = vpop.permute.xlu1 %2032 }
 0x262   :  { %2509 = vmatprep.mubr.msk.bf16.mxu1 %vm1635_vm8, %v1615_v28  ;;  %v2038_v57 = vpop.permute.xlu0 %2037 }
 0x263   :  { %v1556_v62 = vpop.f32.mrb[20].mxu1  ;;  %2530 = vmatpush3.bf16.msra.mxu1 %v2755_v38 }
 0x264   :  { %v1558_v9 = vpop.f32.mrb[21].mxu1  ;;  %2531 = vmatprep.subr.bf16.mxu1 %v2756_v29  ;;  %v1557_v8 = vadd.f32 %v1556_v62, %v1397_v3  ;;  %v2043_v27 = vpop.permute.xlu1 %2042 }
 0x265   :  { %v1559_v39 = vpop.f32.mrb[22].mxu1 }
 0x266   :  { %v1560_v40 = vadd.f32 %v1559_v39, %v1398_v10  ;;  %v1561_v48 = vpop.f32.mrb[23].mxu1  ;;  %v2048_v12 = vpop.permute.xlu0 %2047 }
 0x267   :  { %2532 = vmatpush3.bf16.msra.mxu1 %v2756_v29 }
 0x268   :  { %v1616_v19 = vpack.c.bf16 %v1560_v40, %v1557_v8 }
 0x26a   :  { %2510 = vmatmul.mubr.msk.bf16.gmra.mrb[40].mxu1 %vm1635_vm8, %v1616_v19 }
 0x26b   :  { %v1564_v20 = vpop.f32.mrb[24].mxu1 }
 0x26c   :  { %v1566_v41 = vpop.f32.mrb[25].mxu1  ;;  %v1565_v31 = vadd.f32 %v1564_v20, %v1399_v25 }
 0x26d   :  { %v1567_v45 = vpop.f32.mrb[26].mxu1 }
 0x26e   :  { %v1568_v32 = vadd.f32 %v1567_v45, %v1400_v51  ;;  %v1569_v47 = vpop.f32.mrb[27].mxu1  ;;  %v2053_v51 = vpop.permute.xlu1 %2052 }
 0x270   :  { %v1617_v50 = vpack.c.bf16 %v1568_v32, %v1565_v31 }
 0x272   :  { %2513 = vmatprep.mubr.msk.bf16.mxu1 %vm1635_vm8, %v1617_v50 }
 0x273   :  { %v1572_v55 = vpop.f32.mrb[28].mxu1 }
 0x274   :  { %v1574_v34 = vpop.f32.mrb[29].mxu1  ;;  %v1573_v53 = vadd.f32 %v1572_v55, %v1401_v52  ;;  %v2058_v55 = vpop.permute.xlu0 %2057 }
 0x275   :  { %v1575_v58 = vpop.f32.mrb[30].mxu1 }
 0x276   :  { %v1576_v54 = vadd.f32 %v1575_v58, %v1402_v35  ;;  %v1577_v30 = vpop.f32.mrb[31].mxu1 }
 0x277   :  { %v2063_v30 = vpop.permute.xlu1 %2062 }
 0x278   :  { %v1618_v61 = vpack.c.bf16 %v1576_v54, %v1573_v53 }
 0x27a   :  { %2514 = vmatmul.mubr.msk.bf16.gmra.mrb[44].mxu1 %vm1635_vm8, %v1618_v61 }
 0x27b   :  { %2533 = vmatprep.mubr.bf16.mxu1 %v2757_v59 }
 0x282   :  { %2534 = vmatmul.mubr.bf16.vlgmr.msra.gmra.mrb[32].mxu1 %v2758_v63 }
 0x283   :  { %2537 = vmatprep.mubr.bf16.mxu1 %v2759_v46 }
 0x28a   :  { %2538 = vmatmul.mubr.bf16.gmra.mrb[36].mxu1 %v2760_v2 }
 0x28b   :  { %2541 = vmatprep.mubr.bf16.mxu1 %v2761_v5 }
 0x292   :  { %2542 = vmatmul.mubr.bf16.gmra.mrb[40].mxu1 %v2762_v6 }
 0x293   :  { %2545 = vmatprep.mubr.bf16.mxu1 %v2763_v7 }
 0x29a   :  { %2546 = vmatmul.mubr.bf16.gmra.mrb[44].mxu1 %v2764_v11 }
 0x355   :  { %v2535_v44 = vpop.f32.mrb[32].mxu1 }
 0x356   :  { %v1959_v49 = vadd.f32 %v2535_v44, %v3850_v16  ;;  %v1887_v60 = vpop.f32.mrb[33].mxu1  ;;  %v2073_v44 = vpop.permute.xlu1 %2072 }
 0x357   :  { %v1957_v37 = vadd.f32 %v3850_v16, %v1887_v60  ;;  %v2536_v42 = vpop.f32.mrb[34].mxu1 }
 0x358   :  { %v1975_v43 = vmax.f32 %v1959_v49, 0.0  ;;  %v1960_v38 = vadd.f32 %v2536_v42, %v3850_v16  ;;  %v1890_v56 = vpop.f32.mrb[35].mxu1 }
 0x359   :  { %v1973_v0 = vmax.f32 %v1957_v37, 0.0  ;;  %v1958_v1 = vadd.f32 %v3850_v16, %v1890_v56 }
 0x35a   :  { %v2087_v4 = vmul.f32 %v2018_v18, %v1975_v43  ;;  %v1976_v26 = vmax.f32 %v1960_v38, 0.0 }
 0x35b   :  { %v2085_v28 = vmul.f32 %v2008_v14, %v1973_v0  ;;  %v1974_v29 = vmax.f32 %v1958_v1, 0.0 }
 0x35c   :  { %v2457_v62 = vpack.c.bf16 %v2087_v4, %v2087_v4  ;;  %v2088_v3 = vmul.f32 %v2023_v24, %v1976_v26 }
 0x35d   :  { %v2455_v9 = vpack.c.bf16 %v2085_v28, %v2085_v28  ;;  %v2086_v10 = vmul.f32 %v2013_v15, %v1974_v29  ;;  %v2539_v39 = vpop.f32.mrb[36].mxu1  ;;  %v2068_v15 = vpop.permute.xlu0 %2067 }
 0x35e   :  { %2168 = vst.msk [vmem:[%s3942_s10 + $0x8] sm:$0xf] %vm2165_vm0, %v2457_v62  ;;  %v2458_v8 = vpack.c.bf16 %v2088_v3, %v2088_v3  ;;  %v1963_v40 = vadd.f32 %v2539_v39, %v3850_v16  ;;  %v1903_v48 = vpop.f32.mrb[37].mxu1 }
 0x35f   :  { %2166 = vst.msk [vmem:[%s3942_s10] sm:$0xf] %vm2165_vm0, %v2455_v9  ;;  %v2456_v13 = vpack.c.bf16 %v2086_v10, %v2086_v10  ;;  %v1961_v17 = vadd.f32 %v3850_v16, %v1903_v48  ;;  %v2540_v19 = vpop.f32.mrb[38].mxu1  ;;  %v2083_v9 = vpop.permute.xlu1 %2082 }
 0x360   :  { %2169 = vst.msk [vmem:[%s3942_s10 + $0xc] sm:$0xf] %vm2165_vm0, %v2458_v8  ;;  %v1979_v20 = vmax.f32 %v1963_v40, 0.0  ;;  %v1964_v25 = vadd.f32 %v2540_v19, %v3850_v16  ;;  %v1906_v41 = vpop.f32.mrb[39].mxu1 }
 0x361   :  { %2167 = vst.msk [vmem:[%s3942_s10 + $0x4] sm:$0xf] %vm2165_vm0, %v2456_v13  ;;  %v1977_v45 = vmax.f32 %v1961_v17, 0.0  ;;  %v1962_v31 = vadd.f32 %v3850_v16, %v1906_v41 }
 0x362   :  { %v2091_v32 = vmul.f32 %v2038_v57, %v1979_v20  ;;  %v1980_v47 = vmax.f32 %v1964_v25, 0.0 }
 0x363   :  { %v2089_v21 = vmul.f32 %v2028_v33, %v1977_v45  ;;  %v1978_v22 = vmax.f32 %v1962_v31, 0.0 }
 0x364   :  { %v2461_v23 = vpack.c.bf16 %v2091_v32, %v2091_v32  ;;  %v2092_v50 = vmul.f32 %v2043_v27, %v1980_v47  ;;  %v2078_v27 = vpop.permute.xlu0 %2077 }
 0x365   :  { %v2459_v52 = vpack.c.bf16 %v2089_v21, %v2089_v21  ;;  %v2090_v34 = vmul.f32 %v2033_v36, %v1978_v22  ;;  %v2543_v35 = vpop.f32.mrb[40].mxu1 }
 0x366   :  { %2172 = vst.msk [vmem:[%s3942_s10 + $0x18] sm:$0xf] %vm2165_vm0, %v2461_v23  ;;  %v2462_v58 = vpack.c.bf16 %v2092_v50, %v2092_v50  ;;  %v1967_v53 = vadd.f32 %v2543_v35, %v3850_v16  ;;  %v1919_v54 = vpop.f32.mrb[41].mxu1 }
 0x367   :  { %2170 = vst.msk [vmem:[%s3942_s10 + $0x10] sm:$0xf] %vm2165_vm0, %v2459_v52  ;;  %v2460_v59 = vpack.c.bf16 %v2090_v34, %v2090_v34  ;;  %v1965_v61 = vadd.f32 %v3850_v16, %v1919_v54  ;;  %v2544_v63 = vpop.f32.mrb[42].mxu1 }
 0x368   :  { %2173 = vst.msk [vmem:[%s3942_s10 + $0x1c] sm:$0xf] %vm2165_vm0, %v2462_v58  ;;  %v1983_v46 = vmax.f32 %v1967_v53, 0.0  ;;  %v1968_v2 = vadd.f32 %v2544_v63, %v3850_v16  ;;  %v1922_v5 = vpop.f32.mrb[43].mxu1 }
 0x369   :  { %2171 = vst.msk [vmem:[%s3942_s10 + $0x14] sm:$0xf] %vm2165_vm0, %v2460_v59  ;;  %v1981_v6 = vmax.f32 %v1965_v61, 0.0  ;;  %v1966_v7 = vadd.f32 %v3850_v16, %v1922_v5 }
 0x36a   :  { %v2095_v11 = vmul.f32 %v2058_v55, %v1983_v46  ;;  %v1984_v14 = vmax.f32 %v1968_v2, 0.0 }
 0x36b   :  { %v2093_v18 = vmul.f32 %v2048_v12, %v1981_v6  ;;  %v1982_v24 = vmax.f32 %v1966_v7, 0.0 }
 0x36c   :  { %v2465_v33 = vpack.c.bf16 %v2095_v11, %v2095_v11  ;;  %v2096_v36 = vmul.f32 %v2063_v30, %v1984_v14 }
 0x36d   :  { %v2463_v49 = vpack.c.bf16 %v2093_v18, %v2093_v18  ;;  %v2094_v60 = vmul.f32 %v2053_v51, %v1982_v24  ;;  %v2547_v37 = vpop.f32.mrb[44].mxu1 }
 0x36e   :  { %2176 = vst.msk [vmem:[%s3942_s10 + $0x28] sm:$0xf] %vm2165_vm0, %v2465_v33  ;;  %v2466_v42 = vpack.c.bf16 %v2096_v36, %v2096_v36  ;;  %v1971_v43 = vadd.f32 %v2547_v37, %v3850_v16  ;;  %v1935_v38 = vpop.f32.mrb[45].mxu1 }
 0x36f   :  { %2174 = vst.msk [vmem:[%s3942_s10 + $0x20] sm:$0xf] %vm2165_vm0, %v2463_v49  ;;  %v2464_v56 = vpack.c.bf16 %v2094_v60, %v2094_v60  ;;  %v1969_v57 = vadd.f32 %v3850_v16, %v1935_v38  ;;  %v2548_v0 = vpop.f32.mrb[46].mxu1 }
 0x370   :  { %2177 = vst.msk [vmem:[%s3942_s10 + $0x2c] sm:$0xf] %vm2165_vm0, %v2466_v42  ;;  %v1987_v1 = vmax.f32 %v1971_v43, 0.0  ;;  %v1972_v4 = vadd.f32 %v2548_v0, %v3850_v16  ;;  %v1938_v26 = vpop.f32.mrb[47].mxu1 }
 0x371   :  { %2175 = vst.msk [vmem:[%s3942_s10 + $0x24] sm:$0xf] %vm2165_vm0, %v2464_v56  ;;  %v1985_v28 = vmax.f32 %v1969_v57, 0.0  ;;  %v1970_v29 = vadd.f32 %v3850_v16, %v1938_v26 }
 0x372   :  { %v2099_v62 = vmul.f32 %v2078_v27, %v1987_v1  ;;  %v1988_v3 = vmax.f32 %v1972_v4, 0.0 }
 0x373   :  { %v2097_v10 = vmul.f32 %v2068_v15, %v1985_v28  ;;  %v1986_v39 = vmax.f32 %v1970_v29, 0.0 }
 0x374   :  { %v2469_v8 = vpack.c.bf16 %v2099_v62, %v2099_v62  ;;  %v2100_v40 = vmul.f32 %v2083_v9, %v1988_v3 }
 0x375   :  { %v2467_v48 = vpack.c.bf16 %v2097_v10, %v2097_v10  ;;  %v2098_v12 = vmul.f32 %v2073_v44, %v1986_v39 }
 0x376   :  { %2180 = vst.msk [vmem:[%s3942_s10 + $0x38] sm:$0xf] %vm2165_vm0, %v2469_v8  ;;  %v2470_v13 = vpack.c.bf16 %v2100_v40, %v2100_v40 }
 0x377   :  { %2178 = vst.msk [vmem:[%s3942_s10 + $0x30] sm:$0xf] %vm2165_vm0, %v2467_v48  ;;  %v2468_v16 = vpack.c.bf16 %v2098_v12, %v2098_v12 }
 0x378   :  { %2181 = vst.msk [vmem:[%s3942_s10 + $0x3c] sm:$0xf] %vm2165_vm0, %v2470_v13 }
 0x379   :  { %2179 = vst.msk [vmem:[%s3942_s10 + $0x34] sm:$0xf] %vm2165_vm0, %v2468_v16 }

</bundles_post_ra>
